<compile_context>
chip_gen: v5e
topology: v5e:2x2
jax: 0.10.0
libtpu: 0.0.40
codegen_flags: <defaults>
</compile_context>

<pallas_src>
import functools

import jax
import jax.numpy as jnp
from jax import lax
from jax.experimental import pallas as pl
from jax.experimental.pallas import tpu as pltpu


def _round_up(x, m):
    return (x + m - 1) // m * m


# ---------------------------------------------------------------------------
# Kernel 1: row-tiled direct convolution + fused per-channel BN statistics.
#   x_ref  : (1, S*S, hq, wq_pad, CinP)  phase-decomposed padded plane (bf16),
#            block index depends only on the image -> resident across tiles.
#   w_ref  : (KH*KW, CinP, TN)           weights for this cout tile (bf16)
#   o_ref  : (1, th, OW, TN)             conv output rows (bf16)
#   st_ref : (1, 8, TN)                  row 0 = sum, row 1 = sum of squares
# ---------------------------------------------------------------------------
def _conv_kernel(x_ref, w_ref, o_ref, st_ref, *, kh, kw, s, th, ow):
    r = pl.program_id(2)                       # output-row tile index
    wq_pad = x_ref.shape[3]
    cinp = x_ref.shape[4]
    tn = w_ref.shape[-1]
    m = th * wq_pad
    row0 = r * th

    acc = jnp.zeros((m, tn), jnp.float32)
    for dy in range(kh):                       # static tap loop (<= 9 taps)
        for dx in range(kw):
            ph = (dy % s) * s + (dx % s)
            # Aligned whole-row slice (major dim) -> no relayout copy.
            slab = x_ref[0, ph, pl.ds(row0 + dy // s, th), :, :]
            slab = slab.reshape(m, cinp)       # free relabel (wq_pad % 8 == 0)
            part = jnp.dot(slab, w_ref[dy * kw + dx],
                           preferred_element_type=jnp.float32)
            c = dx // s                        # column offset of this tap
            if c:
                # part[i] <- part[i + c]: XLU rotate of the f32 result; any
                # wrapped rows land in discarded columns >= OW.
                part = pltpu.roll(part, shift=m - c, axis=0)
            acc = acc + part

    out = acc.reshape(th, wq_pad, tn)[:, :ow, :]        # drop slop columns
    o_ref[...] = out.reshape(1, th, ow, tn).astype(o_ref.dtype)
    colsum = jnp.sum(out, axis=(0, 1))
    sqsum = jnp.sum(out * out, axis=(0, 1))
    st_ref[...] = jnp.concatenate(
        [colsum.reshape(1, tn), sqsum.reshape(1, tn),
         jnp.zeros((6, tn), jnp.float32)], axis=0).reshape(1, 8, tn)


def _pick_th(oh, wq_pad, tn, acc_budget=256 * 1024):
    """Largest divisor of oh whose f32 accumulator fits ~the vreg file."""
    th = 1
    for t in range(1, oh + 1):
        if oh % t == 0 and t * wq_pad * tn * 4 <= acc_budget:
            th = t
    return th


def conv2d_pallas(x, w_taps, kh, kw, stride, padding):
    """x: (B, H, W, CinP) bf16 NHWC, channel-padded.  Returns (out, stats)."""
    B, H, W, cinp = x.shape
    coutp = w_taps.shape[-1]
    s = stride
    oh = (H + 2 * padding - kh) // s + 1
    ow = (W + 2 * padding - kw) // s + 1

    # Per-phase plane extents; width rounded to a sublane multiple (review item).
    hq = (kh - 1) // s + oh
    wq_pad = _round_up((kw - 1) // s + ow, 8)
    xp = jnp.pad(x, ((0, 0),
                     (padding, s * hq - H - padding),
                     (padding, s * wq_pad - W - padding),
                     (0, 0)))
    if s == 1:
        xph = xp[:, None]                                        # (B,1,hq,wq_pad,C)
    else:
        # stride x stride phase split (one rearrangement) so the kernel only ever
        # does unit-stride, aligned slices.
        xph = jnp.stack([xp[:, i::s, j::s, :]
                         for i in range(s) for j in range(s)], axis=1)
    s2 = s * s

    tn = 256 if coutp % 256 == 0 else 128
    nt = coutp // tn
    th = _pick_th(oh, wq_pad, tn)
    nrow = oh // th

    kern = functools.partial(_conv_kernel, kh=kh, kw=kw, s=s, th=th, ow=ow)
    return pl.pallas_call(
        kern,
        out_shape=(jax.ShapeDtypeStruct((B, oh, ow, coutp), jnp.bfloat16),
                   jax.ShapeDtypeStruct((B, 8 * nrow, coutp), jnp.float32)),
        grid_spec=pltpu.PrefetchScalarGridSpec(
            num_scalar_prefetch=0,
            grid=(B, nt, nrow),
            in_specs=[
                # Plane block indexed by image only -> reused across (n, r) steps.
                pl.BlockSpec((1, s2, hq, wq_pad, cinp),
                             lambda b, n, r: (b, 0, 0, 0, 0)),
                pl.BlockSpec((kh * kw, cinp, tn), lambda b, n, r: (0, 0, n)),
            ],
            out_specs=(
                pl.BlockSpec((1, th, ow, tn), lambda b, n, r: (b, r, 0, n)),
                pl.BlockSpec((1, 8, tn), lambda b, n, r: (b, r, n)),
            ),
        ),
        compiler_params=pltpu.CompilerParams(
            dimension_semantics=("parallel", "parallel", "arbitrary")),
    )(xph, w_taps)


# ---------------------------------------------------------------------------
# Kernel 2: row-tiled BN apply with fused ReLU, and (optionally) a fused
# residual whose own BatchNorm is applied inline -> the whole ResBlock tail
# relu( relu(bn2(conv2)) + bn_sc(conv_sc) ) is a single HBM pass.
# ---------------------------------------------------------------------------
def _bn_tail_kernel(*refs, relu_pre, relu_post, res):
    if res == 2:
        x_ref, s_ref, t_ref, r_ref, rs_ref, rt_ref, o_ref = refs
    elif res == 1:
        x_ref, s_ref, t_ref, r_ref, o_ref = refs
    else:
        x_ref, s_ref, t_ref, o_ref = refs
    y = x_ref[...].astype(jnp.float32) * s_ref[...] + t_ref[...]
    if relu_pre:
        y = jnp.maximum(y, 0.0)
    if res == 2:
        y = y + (r_ref[...].astype(jnp.float32) * rs_ref[...] + rt_ref[...])
    elif res == 1:
        y = y + r_ref[...].astype(jnp.float32)
    if relu_post:
        y = jnp.maximum(y, 0.0)
    o_ref[...] = y.astype(o_ref.dtype)


def _row_tile(m, c):
    """~0.5 MB (256..2048 row) blocks for the mem-bound elementwise pass."""
    target = max(256, min(2048, (512 * 1024) // (2 * c)))
    if m <= target:
        return m
    divs = [t for t in range(8, m, 8) if m % t == 0]
    fit = [t for t in divs if t <= target]
    if fit:
        return max(fit)
    if divs:
        return min(divs)
    return m


def bn_tail(x, scale, shift, residual=None, res_scale=None, res_shift=None,
            relu_pre=False, relu_post=False):
    """x: (M, CP) bf16.  out = [relu](x*s+t) [+ (r*rs+rt) | + r] [relu], bf16."""
    M, C = x.shape
    tm = _row_tile(M, C)
    res = 0 if residual is None else (2 if res_scale is not None else 1)

    in_specs = [pl.BlockSpec((tm, C), lambda i: (i, 0)),
                pl.BlockSpec((1, C), lambda i: (0, 0)),
                pl.BlockSpec((1, C), lambda i: (0, 0))]
    args = [x, scale.reshape(1, C).astype(jnp.float32),
            shift.reshape(1, C).astype(jnp.float32)]
    if res:
        in_specs.append(pl.BlockSpec((tm, C), lambda i: (i, 0)))
        args.append(residual)
    if res == 2:
        in_specs += [pl.BlockSpec((1, C), lambda i: (0, 0)),
                     pl.BlockSpec((1, C), lambda i: (0, 0))]
        args += [res_scale.reshape(1, C).astype(jnp.float32),
                 res_shift.reshape(1, C).astype(jnp.float32)]

    kern = functools.partial(_bn_tail_kernel, relu_pre=relu_pre,
                             relu_post=relu_post, res=res)
    return pl.pallas_call(
        kern,
        out_shape=jax.ShapeDtypeStruct((M, C), jnp.bfloat16),
        grid_spec=pltpu.PrefetchScalarGridSpec(
            num_scalar_prefetch=0,
            grid=(M // tm,),
            in_specs=in_specs,
            out_specs=pl.BlockSpec((tm, C), lambda i: (i, 0)),
        ),
        compiler_params=pltpu.CompilerParams(dimension_semantics=("parallel",)),
    )(*args)


# ---------------------------------------------------------------------------
# BN scale/shift finalization from the conv kernel's fused statistics
# (tiny (C,)-sized math; plain JAX).
# ---------------------------------------------------------------------------
def _bn_scale_shift(stats, count, gamma, beta, eps=1e-5):
    B, R8, C = stats.shape
    st = stats.reshape(B, R8 // 8, 8, C)
    s = jnp.sum(st[:, :, 0, :], axis=(0, 1))
    q = jnp.sum(st[:, :, 1, :], axis=(0, 1))
    mean = s / count
    var = jnp.maximum(q / count - mean * mean, 0.0)     # biased var (train mode)
    scale = gamma * lax.rsqrt(var + eps)
    shift = beta - mean * scale
    return scale, shift


# ---------------------------------------------------------------------------
# Parameters.  Conv weights stored as (KH*KW, CinP, CoutP) bf16 (channel dims
# zero-padded to multiples of 128).  Conv bias is omitted: every conv here is
# followed by train-mode BatchNorm, which cancels a per-channel constant
# exactly.  An f32 copy of the (bf16-rounded) weights is kept for the
# pure-JAX reference check.
# ---------------------------------------------------------------------------
def _make_conv(key, kh, kw, cin, cout):
    cinp, coutp = _round_up(cin, 128), _round_up(cout, 128)
    fan_in = kh * kw * cin
    w = jax.random.normal(key, (kh, kw, cin, cout), jnp.float32) * (2.0 / fan_in) ** 0.5
    w = w.astype(jnp.bfloat16)
    w_ref = w.astype(jnp.float32)
    wk = jnp.pad(w_ref, ((0, 0), (0, 0), (0, cinp - cin), (0, coutp - cout)))
    wk = wk.reshape(kh * kw, cinp, coutp).astype(jnp.bfloat16)
    return wk, w_ref


def _make_bn(cout):
    coutp = _round_up(cout, 128)
    # Padded gamma entries are 0 so padded channels stay exactly zero through BN.
    gamma = jnp.pad(jnp.ones((cout,), jnp.float32), (0, coutp - cout))
    beta = jnp.zeros((coutp,), jnp.float32)
    return gamma, beta


def init_resblock(key, in_channels, out_channels, downsample):
    ks = jax.random.split(key, 3)
    p = {}
    p["conv1_w"], p["conv1_w_ref"] = _make_conv(ks[0], 3, 3, in_channels, out_channels)
    p["conv2_w"], p["conv2_w_ref"] = _make_conv(ks[1], 3, 3, out_channels, out_channels)
    p["bn1_g"], p["bn1_b"] = _make_bn(out_channels)
    p["bn2_g"], p["bn2_b"] = _make_bn(out_channels)
    if downsample:
        p["sc_w"], p["sc_w_ref"] = _make_conv(ks[2], 1, 1, in_channels, out_channels)
        p["sc_bn_g"], p["sc_bn_b"] = _make_bn(out_channels)
    return p


# ---------------------------------------------------------------------------
# ResBlock forward (NHWC, channel-padded bf16 activations).
# ---------------------------------------------------------------------------
def resblock_forward(p, x):
    downsample = "sc_w" in p          # structural, jit-safe
    stride = 2 if downsample else 1
    coutp = p["conv1_w"].shape[-1]
    B = x.shape[0]

    # main path: conv1 -> bn1 -> relu
    h1, st1 = conv2d_pallas(x, p["conv1_w"], 3, 3, stride, 1)
    _, OH, OW, _ = h1.shape
    count = float(B * OH * OW)
    sc1, sh1 = _bn_scale_shift(st1, count, p["bn1_g"], p["bn1_b"])
    h1 = bn_tail(h1.reshape(-1, coutp), sc1, sh1,
                 relu_pre=True).reshape(B, OH, OW, coutp)

    # main path: conv2 (bn2 applied in the fused tail below)
    h2, st2 = conv2d_pallas(h1, p["conv2_w"], 3, 3, 1, 1)
    sc2, sh2 = _bn_scale_shift(st2, count, p["bn2_g"], p["bn2_b"])

    if downsample:
        # 1x1 stride-2 conv == 1x1 stride-1 conv on the subsampled input.
        x_ds = x[:, ::2, ::2, :]
        sc_raw, sts = conv2d_pallas(x_ds, p["sc_w"], 1, 1, 1, 0)
        scs, shs = _bn_scale_shift(sts, count, p["sc_bn_g"], p["sc_bn_b"])
        # Fused tail: relu( relu(bn2(conv2)) + bn_sc(conv_sc) ) -- one HBM pass,
        # shortcut BN applied inline (no separate shortcut pass).
        out = bn_tail(h2.reshape(-1, coutp), sc2, sh2,
                      residual=sc_raw.reshape(-1, coutp),
                      res_scale=scs, res_shift=shs,
                      relu_pre=True, relu_post=True)
    else:
        assert x.shape[-1] == coutp, "identity shortcut needs CinP == CoutP"
        out = bn_tail(h2.reshape(-1, coutp), sc2, sh2,
                      residual=x.reshape(-1, coutp),
                      relu_pre=True, relu_post=True)
    return out.reshape(B, OH, OW, coutp)


# ---------------------------------------------------------------------------
# Pure-JAX reference (f32, true channels, same bf16-rounded weights/input),
# mirroring the torch module in train mode.
# ---------------------------------------------------------------------------
def resblock_ref(p, x):
    downsample = "sc_w" in p
    stride = 2 if downsample else 1

    def conv(a, w, s, pad):
        return lax.conv_general_dilated(
            a, w, (s, s), ((pad, pad), (pad, pad)),
            dimension_numbers=("NHWC", "HWIO", "NHWC"))

    def bn(a):  # gamma=1, beta=0, train-mode batch stats, biased variance
        m = jnp.mean(a, axis=(0, 1, 2))
        v = jnp.var(a, axis=(0, 1, 2))
        return (a - m) * lax.rsqrt(v + 1e-5)

    shortcut = bn(conv(x, p["sc_w_ref"], 2, 0)) if downsample else x
    h = jnp.maximum(bn(conv(x, p["conv1_w_ref"], stride, 1)), 0.0)
    h = jnp.maximum(bn(conv(h, p["conv2_w_ref"], 1, 1)), 0.0)
    return jnp.maximum(h + shortcut, 0.0)


if __name__ == "__main__":
    key = jax.random.PRNGKey(0)
    k1, k2, kx = jax.random.split(key, 3)

    B, Cin, H, W, Cout = 2, 8, 16, 16, 16
    block1 = init_resblock(k1, Cin, Cout, downsample=True)    # 8 -> 16, stride-2 conv+BN shortcut
    block2 = init_resblock(k2, Cout, Cout, downsample=False)  # identity shortcut

    # Module-style NCHW input -> internal NHWC, channel-padded, bf16.
    x_nchw = jax.random.normal(kx, (B, Cin, H, W), jnp.float32)
    x_nhwc = jnp.transpose(x_nchw, (0, 2, 3, 1)).astype(jnp.bfloat16)
    cinp = _round_up(Cin, 128)
    x = jnp.pad(x_nhwc, ((0, 0), (0, 0), (0, 0), (0, cinp - Cin)))

    @jax.jit
    def forward(p1, p2, xin):
        return resblock_forward(p2, resblock_forward(p1, xin))

    out = jax.block_until_ready(forward(block1, block2, x))
    out = out[..., :Cout].astype(jnp.float32)          # strip channel padding

    # Reference (bf16-rounded params / input, f32 math throughout).
    xr = x_nhwc.astype(jnp.float32)
    ref = resblock_ref(block2, resblock_ref(block1, xr))

    assert out.shape == ref.shape == (B, H // 2, W // 2, Cout), out.shape
    assert bool(jnp.all(jnp.isfinite(out)))
    assert bool(jnp.all(out >= 0.0))                   # final ReLU
    rel = float(jnp.linalg.norm(out - ref) / jnp.linalg.norm(ref))
    assert rel < 0.05, f"relative error vs reference too large: {rel}"
    print("KERNEL_OK")
</pallas_src>

<mosaic_0001>
module attributes {stable_mosaic.version = 11 : i64} {
  func.func @_conv_kernel(%arg0: i32, %arg1: i32, %arg2: i32, %arg3: memref<1x4x9x16x128xbf16, #tpu.memory_space<vmem>>, %arg4: memref<9x128x128xbf16, #tpu.memory_space<vmem>>, %arg5: memref<1x8x8x128xbf16, #tpu.memory_space<vmem>>, %arg6: memref<1x8x128xf32, #tpu.memory_space<vmem>>) attributes {dimension_semantics = [#tpu.dimension_semantics<parallel>, #tpu.dimension_semantics<parallel>, #tpu.dimension_semantics<arbitrary>], iteration_bounds = array<i64: 2, 1, 1>, scalar_prefetch = 0 : i64, scratch_operands = 0 : i64, tpu.core_type = #tpu.core_type<tc>, window_params = [{transform_indices = @transform_0, window_bounds = array<i64: 1, 4, 9, 16, 128>}, {transform_indices = @transform_1, window_bounds = array<i64: 9, 128, 128>}, {transform_indices = @transform_2, window_bounds = array<i64: 1, 8, 8, 128>}, {transform_indices = @transform_3, window_bounds = array<i64: 1, 8, 128>}]} {
    %c8_i32 = arith.constant 8 : i32
    %0 = arith.muli %arg2, %c8_i32 : i32
    %cst = arith.constant 0.000000e+00 : f32
    %1 = vector.broadcast %cst : f32 to vector<128x128xf32>
    %c0_i32 = arith.constant 0 : i32
    %2 = arith.addi %0, %c0_i32 : i32
    %c0 = arith.constant 0 : index
    %c0_0 = arith.constant 0 : index
    %3 = arith.index_cast %2 : i32 to index
    %c0_1 = arith.constant 0 : index
    %c0_2 = arith.constant 0 : index
    %4 = vector.load %arg3[%c0, %c0_0, %3, %c0_1, %c0_2] : memref<1x4x9x16x128xbf16, #tpu.memory_space<vmem>>, vector<1x1x8x16x128xbf16>
    %5 = vector.shape_cast %4 : vector<1x1x8x16x128xbf16> to vector<8x16x128xbf16>
    %6 = vector.shape_cast %5 : vector<8x16x128xbf16> to vector<128x128xbf16>
    %c0_3 = arith.constant 0 : index
    %c0_4 = arith.constant 0 : index
    %c0_5 = arith.constant 0 : index
    %7 = vector.load %arg4[%c0_3, %c0_4, %c0_5] : memref<9x128x128xbf16, #tpu.memory_space<vmem>>, vector<1x128x128xbf16>
    %8 = vector.shape_cast %7 : vector<1x128x128xbf16> to vector<128x128xbf16>
    %cst_6 = arith.constant dense<0.000000e+00> : vector<128x128xf32>
    %9 = tpu.matmul %6, %8, %cst_6 {dimension_numbers = #tpu.dot_dimension_numbers<[1], [0], [0], [1], [0, 0, 1, 1], [], []>} : vector<128x128xbf16>, vector<128x128xbf16>, vector<128x128xf32> -> vector<128x128xf32>
    %10 = arith.addf %1, %9 : vector<128x128xf32>
    %c0_i32_7 = arith.constant 0 : i32
    %11 = arith.addi %0, %c0_i32_7 : i32
    %c0_8 = arith.constant 0 : index
    %c1 = arith.constant 1 : index
    %12 = arith.index_cast %11 : i32 to index
    %c0_9 = arith.constant 0 : index
    %c0_10 = arith.constant 0 : index
    %13 = vector.load %arg3[%c0_8, %c1, %12, %c0_9, %c0_10] : memref<1x4x9x16x128xbf16, #tpu.memory_space<vmem>>, vector<1x1x8x16x128xbf16>
    %14 = vector.shape_cast %13 : vector<1x1x8x16x128xbf16> to vector<8x16x128xbf16>
    %15 = vector.shape_cast %14 : vector<8x16x128xbf16> to vector<128x128xbf16>
    %c1_11 = arith.constant 1 : index
    %c0_12 = arith.constant 0 : index
    %c0_13 = arith.constant 0 : index
    %16 = vector.load %arg4[%c1_11, %c0_12, %c0_13] : memref<9x128x128xbf16, #tpu.memory_space<vmem>>, vector<1x128x128xbf16>
    %17 = vector.shape_cast %16 : vector<1x128x128xbf16> to vector<128x128xbf16>
    %cst_14 = arith.constant dense<0.000000e+00> : vector<128x128xf32>
    %18 = tpu.matmul %15, %17, %cst_14 {dimension_numbers = #tpu.dot_dimension_numbers<[1], [0], [0], [1], [0, 0, 1, 1], [], []>} : vector<128x128xbf16>, vector<128x128xbf16>, vector<128x128xf32> -> vector<128x128xf32>
    %19 = arith.addf %10, %18 : vector<128x128xf32>
    %c0_i32_15 = arith.constant 0 : i32
    %20 = arith.addi %0, %c0_i32_15 : i32
    %c0_16 = arith.constant 0 : index
    %c0_17 = arith.constant 0 : index
    %21 = arith.index_cast %20 : i32 to index
    %c0_18 = arith.constant 0 : index
    %c0_19 = arith.constant 0 : index
    %22 = vector.load %arg3[%c0_16, %c0_17, %21, %c0_18, %c0_19] : memref<1x4x9x16x128xbf16, #tpu.memory_space<vmem>>, vector<1x1x8x16x128xbf16>
    %23 = vector.shape_cast %22 : vector<1x1x8x16x128xbf16> to vector<8x16x128xbf16>
    %24 = vector.shape_cast %23 : vector<8x16x128xbf16> to vector<128x128xbf16>
    %c2 = arith.constant 2 : index
    %c0_20 = arith.constant 0 : index
    %c0_21 = arith.constant 0 : index
    %25 = vector.load %arg4[%c2, %c0_20, %c0_21] : memref<9x128x128xbf16, #tpu.memory_space<vmem>>, vector<1x128x128xbf16>
    %26 = vector.shape_cast %25 : vector<1x128x128xbf16> to vector<128x128xbf16>
    %cst_22 = arith.constant dense<0.000000e+00> : vector<128x128xf32>
    %27 = tpu.matmul %24, %26, %cst_22 {dimension_numbers = #tpu.dot_dimension_numbers<[1], [0], [0], [1], [0, 0, 1, 1], [], []>} : vector<128x128xbf16>, vector<128x128xbf16>, vector<128x128xf32> -> vector<128x128xf32>
    %c127_i32 = arith.constant 127 : i32
    %28 = tpu.dynamic_rotate %27 by %c127_i32 dim 0 : vector<128x128xf32>, i32 -> vector<128x128xf32>
    %29 = arith.addf %19, %28 : vector<128x128xf32>
    %c0_i32_23 = arith.constant 0 : i32
    %30 = arith.addi %0, %c0_i32_23 : i32
    %c0_24 = arith.constant 0 : index
    %c2_25 = arith.constant 2 : index
    %31 = arith.index_cast %30 : i32 to index
    %c0_26 = arith.constant 0 : index
    %c0_27 = arith.constant 0 : index
    %32 = vector.load %arg3[%c0_24, %c2_25, %31, %c0_26, %c0_27] : memref<1x4x9x16x128xbf16, #tpu.memory_space<vmem>>, vector<1x1x8x16x128xbf16>
    %33 = vector.shape_cast %32 : vector<1x1x8x16x128xbf16> to vector<8x16x128xbf16>
    %34 = vector.shape_cast %33 : vector<8x16x128xbf16> to vector<128x128xbf16>
    %c3 = arith.constant 3 : index
    %c0_28 = arith.constant 0 : index
    %c0_29 = arith.constant 0 : index
    %35 = vector.load %arg4[%c3, %c0_28, %c0_29] : memref<9x128x128xbf16, #tpu.memory_space<vmem>>, vector<1x128x128xbf16>
    %36 = vector.shape_cast %35 : vector<1x128x128xbf16> to vector<128x128xbf16>
    %cst_30 = arith.constant dense<0.000000e+00> : vector<128x128xf32>
    %37 = tpu.matmul %34, %36, %cst_30 {dimension_numbers = #tpu.dot_dimension_numbers<[1], [0], [0], [1], [0, 0, 1, 1], [], []>} : vector<128x128xbf16>, vector<128x128xbf16>, vector<128x128xf32> -> vector<128x128xf32>
    %38 = arith.addf %29, %37 : vector<128x128xf32>
    %c0_i32_31 = arith.constant 0 : i32
    %39 = arith.addi %0, %c0_i32_31 : i32
    %c0_32 = arith.constant 0 : index
    %c3_33 = arith.constant 3 : index
    %40 = arith.index_cast %39 : i32 to index
    %c0_34 = arith.constant 0 : index
    %c0_35 = arith.constant 0 : index
    %41 = vector.load %arg3[%c0_32, %c3_33, %40, %c0_34, %c0_35] : memref<1x4x9x16x128xbf16, #tpu.memory_space<vmem>>, vector<1x1x8x16x128xbf16>
    %42 = vector.shape_cast %41 : vector<1x1x8x16x128xbf16> to vector<8x16x128xbf16>
    %43 = vector.shape_cast %42 : vector<8x16x128xbf16> to vector<128x128xbf16>
    %c4 = arith.constant 4 : index
    %c0_36 = arith.constant 0 : index
    %c0_37 = arith.constant 0 : index
    %44 = vector.load %arg4[%c4, %c0_36, %c0_37] : memref<9x128x128xbf16, #tpu.memory_space<vmem>>, vector<1x128x128xbf16>
    %45 = vector.shape_cast %44 : vector<1x128x128xbf16> to vector<128x128xbf16>
    %cst_38 = arith.constant dense<0.000000e+00> : vector<128x128xf32>
    %46 = tpu.matmul %43, %45, %cst_38 {dimension_numbers = #tpu.dot_dimension_numbers<[1], [0], [0], [1], [0, 0, 1, 1], [], []>} : vector<128x128xbf16>, vector<128x128xbf16>, vector<128x128xf32> -> vector<128x128xf32>
    %47 = arith.addf %38, %46 : vector<128x128xf32>
    %c0_i32_39 = arith.constant 0 : i32
    %48 = arith.addi %0, %c0_i32_39 : i32
    %c0_40 = arith.constant 0 : index
    %c2_41 = arith.constant 2 : index
    %49 = arith.index_cast %48 : i32 to index
    %c0_42 = arith.constant 0 : index
    %c0_43 = arith.constant 0 : index
    %50 = vector.load %arg3[%c0_40, %c2_41, %49, %c0_42, %c0_43] : memref<1x4x9x16x128xbf16, #tpu.memory_space<vmem>>, vector<1x1x8x16x128xbf16>
    %51 = vector.shape_cast %50 : vector<1x1x8x16x128xbf16> to vector<8x16x128xbf16>
    %52 = vector.shape_cast %51 : vector<8x16x128xbf16> to vector<128x128xbf16>
    %c5 = arith.constant 5 : index
    %c0_44 = arith.constant 0 : index
    %c0_45 = arith.constant 0 : index
    %53 = vector.load %arg4[%c5, %c0_44, %c0_45] : memref<9x128x128xbf16, #tpu.memory_space<vmem>>, vector<1x128x128xbf16>
    %54 = vector.shape_cast %53 : vector<1x128x128xbf16> to vector<128x128xbf16>
    %cst_46 = arith.constant dense<0.000000e+00> : vector<128x128xf32>
    %55 = tpu.matmul %52, %54, %cst_46 {dimension_numbers = #tpu.dot_dimension_numbers<[1], [0], [0], [1], [0, 0, 1, 1], [], []>} : vector<128x128xbf16>, vector<128x128xbf16>, vector<128x128xf32> -> vector<128x128xf32>
    %c127_i32_47 = arith.constant 127 : i32
    %56 = tpu.dynamic_rotate %55 by %c127_i32_47 dim 0 : vector<128x128xf32>, i32 -> vector<128x128xf32>
    %57 = arith.addf %47, %56 : vector<128x128xf32>
    %c1_i32 = arith.constant 1 : i32
    %58 = arith.addi %0, %c1_i32 : i32
    %c0_48 = arith.constant 0 : index
    %c0_49 = arith.constant 0 : index
    %59 = arith.index_cast %58 : i32 to index
    %c0_50 = arith.constant 0 : index
    %c0_51 = arith.constant 0 : index
    %60 = vector.load %arg3[%c0_48, %c0_49, %59, %c0_50, %c0_51] : memref<1x4x9x16x128xbf16, #tpu.memory_space<vmem>>, vector<1x1x8x16x128xbf16>
    %61 = vector.shape_cast %60 : vector<1x1x8x16x128xbf16> to vector<8x16x128xbf16>
    %62 = vector.shape_cast %61 : vector<8x16x128xbf16> to vector<128x128xbf16>
    %c6 = arith.constant 6 : index
    %c0_52 = arith.constant 0 : index
    %c0_53 = arith.constant 0 : index
    %63 = vector.load %arg4[%c6, %c0_52, %c0_53] : memref<9x128x128xbf16, #tpu.memory_space<vmem>>, vector<1x128x128xbf16>
    %64 = vector.shape_cast %63 : vector<1x128x128xbf16> to vector<128x128xbf16>
    %cst_54 = arith.constant dense<0.000000e+00> : vector<128x128xf32>
    %65 = tpu.matmul %62, %64, %cst_54 {dimension_numbers = #tpu.dot_dimension_numbers<[1], [0], [0], [1], [0, 0, 1, 1], [], []>} : vector<128x128xbf16>, vector<128x128xbf16>, vector<128x128xf32> -> vector<128x128xf32>
    %66 = arith.addf %57, %65 : vector<128x128xf32>
    %c1_i32_55 = arith.constant 1 : i32
    %67 = arith.addi %0, %c1_i32_55 : i32
    %c0_56 = arith.constant 0 : index
    %c1_57 = arith.constant 1 : index
    %68 = arith.index_cast %67 : i32 to index
    %c0_58 = arith.constant 0 : index
    %c0_59 = arith.constant 0 : index
    %69 = vector.load %arg3[%c0_56, %c1_57, %68, %c0_58, %c0_59] : memref<1x4x9x16x128xbf16, #tpu.memory_space<vmem>>, vector<1x1x8x16x128xbf16>
    %70 = vector.shape_cast %69 : vector<1x1x8x16x128xbf16> to vector<8x16x128xbf16>
    %71 = vector.shape_cast %70 : vector<8x16x128xbf16> to vector<128x128xbf16>
    %c7 = arith.constant 7 : index
    %c0_60 = arith.constant 0 : index
    %c0_61 = arith.constant 0 : index
    %72 = vector.load %arg4[%c7, %c0_60, %c0_61] : memref<9x128x128xbf16, #tpu.memory_space<vmem>>, vector<1x128x128xbf16>
    %73 = vector.shape_cast %72 : vector<1x128x128xbf16> to vector<128x128xbf16>
    %cst_62 = arith.constant dense<0.000000e+00> : vector<128x128xf32>
    %74 = tpu.matmul %71, %73, %cst_62 {dimension_numbers = #tpu.dot_dimension_numbers<[1], [0], [0], [1], [0, 0, 1, 1], [], []>} : vector<128x128xbf16>, vector<128x128xbf16>, vector<128x128xf32> -> vector<128x128xf32>
    %75 = arith.addf %66, %74 : vector<128x128xf32>
    %c1_i32_63 = arith.constant 1 : i32
    %76 = arith.addi %0, %c1_i32_63 : i32
    %c0_64 = arith.constant 0 : index
    %c0_65 = arith.constant 0 : index
    %77 = arith.index_cast %76 : i32 to index
    %c0_66 = arith.constant 0 : index
    %c0_67 = arith.constant 0 : index
    %78 = vector.load %arg3[%c0_64, %c0_65, %77, %c0_66, %c0_67] : memref<1x4x9x16x128xbf16, #tpu.memory_space<vmem>>, vector<1x1x8x16x128xbf16>
    %79 = vector.shape_cast %78 : vector<1x1x8x16x128xbf16> to vector<8x16x128xbf16>
    %80 = vector.shape_cast %79 : vector<8x16x128xbf16> to vector<128x128xbf16>
    %c8 = arith.constant 8 : index
    %c0_68 = arith.constant 0 : index
    %c0_69 = arith.constant 0 : index
    %81 = vector.load %arg4[%c8, %c0_68, %c0_69] : memref<9x128x128xbf16, #tpu.memory_space<vmem>>, vector<1x128x128xbf16>
    %82 = vector.shape_cast %81 : vector<1x128x128xbf16> to vector<128x128xbf16>
    %cst_70 = arith.constant dense<0.000000e+00> : vector<128x128xf32>
    %83 = tpu.matmul %80, %82, %cst_70 {dimension_numbers = #tpu.dot_dimension_numbers<[1], [0], [0], [1], [0, 0, 1, 1], [], []>} : vector<128x128xbf16>, vector<128x128xbf16>, vector<128x128xf32> -> vector<128x128xf32>
    %c127_i32_71 = arith.constant 127 : i32
    %84 = tpu.dynamic_rotate %83 by %c127_i32_71 dim 0 : vector<128x128xf32>, i32 -> vector<128x128xf32>
    %85 = arith.addf %75, %84 : vector<128x128xf32>
    %86 = vector.shape_cast %85 : vector<128x128xf32> to vector<8x16x128xf32>
    %87 = vector.extract_strided_slice %86 {offsets = [0, 0, 0], sizes = [8, 8, 128], strides = [1, 1, 1]} : vector<8x16x128xf32> to vector<8x8x128xf32>
    %88 = vector.shape_cast %87 : vector<8x8x128xf32> to vector<1x8x8x128xf32>
    %89 = arith.truncf %88 : vector<1x8x8x128xf32> to vector<1x8x8x128xbf16>
    %c0_72 = arith.constant 0 : index
    %c0_73 = arith.constant 0 : index
    %c0_74 = arith.constant 0 : index
    %c0_75 = arith.constant 0 : index
    %90 = vector.load %arg5[%c0_72, %c0_73, %c0_74, %c0_75] : memref<1x8x8x128xbf16, #tpu.memory_space<vmem>>, vector<1x8x8x128xbf16>
    tpu.vector_store %arg5[%c0_72, %c0_73, %c0_74, %c0_75], %89 {strides = array<i32>} : memref<1x8x8x128xbf16, #tpu.memory_space<vmem>>, vector<1x8x8x128xbf16>,
    %cst_76 = arith.constant dense<0.000000e+00> : vector<128xf32>
    %91 = vector.multi_reduction <add>, %87, %cst_76 [0, 1] : vector<8x8x128xf32> to vector<128xf32>
    %92 = arith.mulf %87, %87 : vector<8x8x128xf32>
    %cst_77 = arith.constant dense<0.000000e+00> : vector<128xf32>
    %93 = vector.multi_reduction <add>, %92, %cst_77 [0, 1] : vector<8x8x128xf32> to vector<128xf32>
    %94 = vector.shape_cast %91 : vector<128xf32> to vector<1x128xf32>
    %95 = vector.shape_cast %93 : vector<128xf32> to vector<1x128xf32>
    %cst_78 = arith.constant 0.000000e+00 : f32
    %96 = vector.broadcast %cst_78 : f32 to vector<6x128xf32>
    %97 = tpu.concatenate %94, %95, %96 in 0 : vector<1x128xf32>, vector<1x128xf32>, vector<6x128xf32> -> vector<8x128xf32>
    %98 = vector.shape_cast %97 : vector<8x128xf32> to vector<1x8x128xf32>
    %c0_79 = arith.constant 0 : index
    %c0_80 = arith.constant 0 : index
    %c0_81 = arith.constant 0 : index
    %99 = vector.load %arg6[%c0_79, %c0_80, %c0_81] : memref<1x8x128xf32, #tpu.memory_space<vmem>>, vector<1x8x128xf32>
    tpu.vector_store %arg6[%c0_79, %c0_80, %c0_81], %98 {strides = array<i32>} : memref<1x8x128xf32, #tpu.memory_space<vmem>>, vector<1x8x128xf32>,
    return
  }
  func.func @transform_0(%arg0: i32, %arg1: i32, %arg2: i32) -> (i32, i32, i32, i32, i32) {
    %c0_i32 = arith.constant 0 : i32
    %c0_i32_0 = arith.constant 0 : i32
    %c0_i32_1 = arith.constant 0 : i32
    %c0_i32_2 = arith.constant 0 : i32
    %c0_i32_3 = arith.constant 0 : i32
    return %arg0, %c0_i32, %c0_i32_0, %c0_i32_1, %c0_i32_2 : i32, i32, i32, i32, i32
  }
  func.func @transform_1(%arg0: i32, %arg1: i32, %arg2: i32) -> (i32, i32, i32) {
    %c0_i32 = arith.constant 0 : i32
    %c0_i32_0 = arith.constant 0 : i32
    %c0_i32_1 = arith.constant 0 : i32
    return %c0_i32, %c0_i32_0, %arg1 : i32, i32, i32
  }
  func.func @transform_2(%arg0: i32, %arg1: i32, %arg2: i32) -> (i32, i32, i32, i32) {
    %c0_i32 = arith.constant 0 : i32
    %c0_i32_0 = arith.constant 0 : i32
    return %arg0, %arg2, %c0_i32, %arg1 : i32, i32, i32, i32
  }
  func.func @transform_3(%arg0: i32, %arg1: i32, %arg2: i32) -> (i32, i32, i32) {
    %c0_i32 = arith.constant 0 : i32
    return %arg0, %arg2, %arg1 : i32, i32, i32
  }
}

module attributes {stable_mosaic.version = 11 : i64} {
  func.func @_bn_tail_kernel(%arg0: i32, %arg1: memref<128x128xbf16, #tpu.memory_space<vmem>>, %arg2: memref<1x128xf32, #tpu.memory_space<vmem>>, %arg3: memref<1x128xf32, #tpu.memory_space<vmem>>, %arg4: memref<128x128xbf16, #tpu.memory_space<vmem>>) attributes {dimension_semantics = [#tpu.dimension_semantics<parallel>], iteration_bounds = array<i64: 1>, scalar_prefetch = 0 : i64, scratch_operands = 0 : i64, tpu.core_type = #tpu.core_type<tc>, window_params = [{transform_indices = @transform_0, window_bounds = array<i64: 128, 128>}, {pipeline_mode = #tpu.pipeline_mode<synchronous>, transform_indices = @transform_1, window_bounds = array<i64: 1, 128>}, {pipeline_mode = #tpu.pipeline_mode<synchronous>, transform_indices = @transform_2, window_bounds = array<i64: 1, 128>}, {transform_indices = @transform_3, window_bounds = array<i64: 128, 128>}]} {
    %c0 = arith.constant 0 : index
    %c0_0 = arith.constant 0 : index
    %0 = vector.load %arg1[%c0, %c0_0] : memref<128x128xbf16, #tpu.memory_space<vmem>>, vector<128x128xbf16>
    %1 = arith.extf %0 : vector<128x128xbf16> to vector<128x128xf32>
    %c0_1 = arith.constant 0 : index
    %c0_2 = arith.constant 0 : index
    %2 = vector.load %arg2[%c0_1, %c0_2] : memref<1x128xf32, #tpu.memory_space<vmem>>, vector<1x128xf32>
    %3 = vector.broadcast %2 : vector<1x128xf32> to vector<128x128xf32>
    %4 = arith.mulf %1, %3 : vector<128x128xf32>
    %c0_3 = arith.constant 0 : index
    %c0_4 = arith.constant 0 : index
    %5 = vector.load %arg3[%c0_3, %c0_4] : memref<1x128xf32, #tpu.memory_space<vmem>>, vector<1x128xf32>
    %6 = vector.broadcast %5 : vector<1x128xf32> to vector<128x128xf32>
    %7 = arith.addf %4, %6 : vector<128x128xf32>
    %cst = arith.constant 0.000000e+00 : f32
    %8 = vector.broadcast %cst : f32 to vector<128x128xf32>
    %9 = arith.maximumf %7, %8 : vector<128x128xf32>
    %10 = arith.truncf %9 : vector<128x128xf32> to vector<128x128xbf16>
    %c0_5 = arith.constant 0 : index
    %c0_6 = arith.constant 0 : index
    %11 = vector.load %arg4[%c0_5, %c0_6] : memref<128x128xbf16, #tpu.memory_space<vmem>>, vector<128x128xbf16>
    tpu.vector_store %arg4[%c0_5, %c0_6], %10 {strides = array<i32>} : memref<128x128xbf16, #tpu.memory_space<vmem>>, vector<128x128xbf16>,
    return
  }
  func.func @transform_0(%arg0: i32) -> (i32, i32) {
    %c0_i32 = arith.constant 0 : i32
    %c0_i32_0 = arith.constant 0 : i32
    return %arg0, %c0_i32 : i32, i32
  }
  func.func @transform_1(%arg0: i32) -> (i32, i32) {
    %c0_i32 = arith.constant 0 : i32
    %c0_i32_0 = arith.constant 0 : i32
    %c0_i32_1 = arith.constant 0 : i32
    return %c0_i32, %c0_i32_0 : i32, i32
  }
  func.func @transform_2(%arg0: i32) -> (i32, i32) {
    %c0_i32 = arith.constant 0 : i32
    %c0_i32_0 = arith.constant 0 : i32
    %c0_i32_1 = arith.constant 0 : i32
    return %c0_i32, %c0_i32_0 : i32, i32
  }
  func.func @transform_3(%arg0: i32) -> (i32, i32) {
    %c0_i32 = arith.constant 0 : i32
    %c0_i32_0 = arith.constant 0 : i32
    return %arg0, %c0_i32 : i32, i32
  }
}

module attributes {stable_mosaic.version = 11 : i64} {
  func.func @_conv_kernel(%arg0: i32, %arg1: i32, %arg2: i32, %arg3: memref<1x1x8x8x128xbf16, #tpu.memory_space<vmem>>, %arg4: memref<1x128x128xbf16, #tpu.memory_space<vmem>>, %arg5: memref<1x8x8x128xbf16, #tpu.memory_space<vmem>>, %arg6: memref<1x8x128xf32, #tpu.memory_space<vmem>>) attributes {dimension_semantics = [#tpu.dimension_semantics<parallel>, #tpu.dimension_semantics<parallel>, #tpu.dimension_semantics<arbitrary>], iteration_bounds = array<i64: 2, 1, 1>, scalar_prefetch = 0 : i64, scratch_operands = 0 : i64, tpu.core_type = #tpu.core_type<tc>, window_params = [{transform_indices = @transform_0, window_bounds = array<i64: 1, 1, 8, 8, 128>}, {transform_indices = @transform_1, window_bounds = array<i64: 1, 128, 128>}, {transform_indices = @transform_2, window_bounds = array<i64: 1, 8, 8, 128>}, {transform_indices = @transform_3, window_bounds = array<i64: 1, 8, 128>}]} {
    %c8_i32 = arith.constant 8 : i32
    %0 = arith.muli %arg2, %c8_i32 : i32
    %cst = arith.constant 0.000000e+00 : f32
    %1 = vector.broadcast %cst : f32 to vector<64x128xf32>
    %c0_i32 = arith.constant 0 : i32
    %2 = arith.addi %0, %c0_i32 : i32
    %c0 = arith.constant 0 : index
    %c0_0 = arith.constant 0 : index
    %3 = arith.index_cast %2 : i32 to index
    %c0_1 = arith.constant 0 : index
    %c0_2 = arith.constant 0 : index
    %4 = vector.load %arg3[%c0, %c0_0, %3, %c0_1, %c0_2] : memref<1x1x8x8x128xbf16, #tpu.memory_space<vmem>>, vector<1x1x8x8x128xbf16>
    %5 = vector.shape_cast %4 : vector<1x1x8x8x128xbf16> to vector<8x8x128xbf16>
    %6 = vector.shape_cast %5 : vector<8x8x128xbf16> to vector<64x128xbf16>
    %c0_3 = arith.constant 0 : index
    %c0_4 = arith.constant 0 : index
    %c0_5 = arith.constant 0 : index
    %7 = vector.load %arg4[%c0_3, %c0_4, %c0_5] : memref<1x128x128xbf16, #tpu.memory_space<vmem>>, vector<1x128x128xbf16>
    %8 = vector.shape_cast %7 : vector<1x128x128xbf16> to vector<128x128xbf16>
    %cst_6 = arith.constant dense<0.000000e+00> : vector<64x128xf32>
    %9 = tpu.matmul %6, %8, %cst_6 {dimension_numbers = #tpu.dot_dimension_numbers<[1], [0], [0], [1], [0, 0, 1, 1], [], []>} : vector<64x128xbf16>, vector<128x128xbf16>, vector<64x128xf32> -> vector<64x128xf32>
    %10 = arith.addf %1, %9 : vector<64x128xf32>
    %11 = vector.shape_cast %10 : vector<64x128xf32> to vector<8x8x128xf32>
    %12 = vector.shape_cast %11 : vector<8x8x128xf32> to vector<1x8x8x128xf32>
    %13 = arith.truncf %12 : vector<1x8x8x128xf32> to vector<1x8x8x128xbf16>
    %c0_7 = arith.constant 0 : index
    %c0_8 = arith.constant 0 : index
    %c0_9 = arith.constant 0 : index
    %c0_10 = arith.constant 0 : index
    %14 = vector.load %arg5[%c0_7, %c0_8, %c0_9, %c0_10] : memref<1x8x8x128xbf16, #tpu.memory_space<vmem>>, vector<1x8x8x128xbf16>
    tpu.vector_store %arg5[%c0_7, %c0_8, %c0_9, %c0_10], %13 {strides = array<i32>} : memref<1x8x8x128xbf16, #tpu.memory_space<vmem>>, vector<1x8x8x128xbf16>,
    %cst_11 = arith.constant dense<0.000000e+00> : vector<128xf32>
    %15 = vector.multi_reduction <add>, %11, %cst_11 [0, 1] : vector<8x8x128xf32> to vector<128xf32>
    %16 = arith.mulf %11, %11 : vector<8x8x128xf32>
    %cst_12 = arith.constant dense<0.000000e+00> : vector<128xf32>
    %17 = vector.multi_reduction <add>, %16, %cst_12 [0, 1] : vector<8x8x128xf32> to vector<128xf32>
    %18 = vector.shape_cast %15 : vector<128xf32> to vector<1x128xf32>
    %19 = vector.shape_cast %17 : vector<128xf32> to vector<1x128xf32>
    %cst_13 = arith.constant 0.000000e+00 : f32
    %20 = vector.broadcast %cst_13 : f32 to vector<6x128xf32>
    %21 = tpu.concatenate %18, %19, %20 in 0 : vector<1x128xf32>, vector<1x128xf32>, vector<6x128xf32> -> vector<8x128xf32>
    %22 = vector.shape_cast %21 : vector<8x128xf32> to vector<1x8x128xf32>
    %c0_14 = arith.constant 0 : index
    %c0_15 = arith.constant 0 : index
    %c0_16 = arith.constant 0 : index
    %23 = vector.load %arg6[%c0_14, %c0_15, %c0_16] : memref<1x8x128xf32, #tpu.memory_space<vmem>>, vector<1x8x128xf32>
    tpu.vector_store %arg6[%c0_14, %c0_15, %c0_16], %22 {strides = array<i32>} : memref<1x8x128xf32, #tpu.memory_space<vmem>>, vector<1x8x128xf32>,
    return
  }
  func.func @transform_0(%arg0: i32, %arg1: i32, %arg2: i32) -> (i32, i32, i32, i32, i32) {
    %c0_i32 = arith.constant 0 : i32
    %c0_i32_0 = arith.constant 0 : i32
    %c0_i32_1 = arith.constant 0 : i32
    %c0_i32_2 = arith.constant 0 : i32
    %c0_i32_3 = arith.constant 0 : i32
    return %arg0, %c0_i32, %c0_i32_0, %c0_i32_1, %c0_i32_2 : i32, i32, i32, i32, i32
  }
  func.func @transform_1(%arg0: i32, %arg1: i32, %arg2: i32) -> (i32, i32, i32) {
    %c0_i32 = arith.constant 0 : i32
    %c0_i32_0 = arith.constant 0 : i32
    %c0_i32_1 = arith.constant 0 : i32
    return %c0_i32, %c0_i32_0, %arg1 : i32, i32, i32
  }
  func.func @transform_2(%arg0: i32, %arg1: i32, %arg2: i32) -> (i32, i32, i32, i32) {
    %c0_i32 = arith.constant 0 : i32
    %c0_i32_0 = arith.constant 0 : i32
    return %arg0, %arg2, %c0_i32, %arg1 : i32, i32, i32, i32
  }
  func.func @transform_3(%arg0: i32, %arg1: i32, %arg2: i32) -> (i32, i32, i32) {
    %c0_i32 = arith.constant 0 : i32
    return %arg0, %arg2, %arg1 : i32, i32, i32
  }
}

module attributes {stable_mosaic.version = 11 : i64} {
  func.func @_conv_kernel(%arg0: i32, %arg1: i32, %arg2: i32, %arg3: memref<1x1x10x16x128xbf16, #tpu.memory_space<vmem>>, %arg4: memref<9x128x128xbf16, #tpu.memory_space<vmem>>, %arg5: memref<1x8x8x128xbf16, #tpu.memory_space<vmem>>, %arg6: memref<1x8x128xf32, #tpu.memory_space<vmem>>) attributes {dimension_semantics = [#tpu.dimension_semantics<parallel>, #tpu.dimension_semantics<parallel>, #tpu.dimension_semantics<arbitrary>], iteration_bounds = array<i64: 2, 1, 1>, scalar_prefetch = 0 : i64, scratch_operands = 0 : i64, tpu.core_type = #tpu.core_type<tc>, window_params = [{transform_indices = @transform_0, window_bounds = array<i64: 1, 1, 10, 16, 128>}, {transform_indices = @transform_1, window_bounds = array<i64: 9, 128, 128>}, {transform_indices = @transform_2, window_bounds = array<i64: 1, 8, 8, 128>}, {transform_indices = @transform_3, window_bounds = array<i64: 1, 8, 128>}]} {
    %c8_i32 = arith.constant 8 : i32
    %0 = arith.muli %arg2, %c8_i32 : i32
    %cst = arith.constant 0.000000e+00 : f32
    %1 = vector.broadcast %cst : f32 to vector<128x128xf32>
    %c0_i32 = arith.constant 0 : i32
    %2 = arith.addi %0, %c0_i32 : i32
    %c0 = arith.constant 0 : index
    %c0_0 = arith.constant 0 : index
    %3 = arith.index_cast %2 : i32 to index
    %c0_1 = arith.constant 0 : index
    %c0_2 = arith.constant 0 : index
    %4 = vector.load %arg3[%c0, %c0_0, %3, %c0_1, %c0_2] : memref<1x1x10x16x128xbf16, #tpu.memory_space<vmem>>, vector<1x1x8x16x128xbf16>
    %5 = vector.shape_cast %4 : vector<1x1x8x16x128xbf16> to vector<8x16x128xbf16>
    %6 = vector.shape_cast %5 : vector<8x16x128xbf16> to vector<128x128xbf16>
    %c0_3 = arith.constant 0 : index
    %c0_4 = arith.constant 0 : index
    %c0_5 = arith.constant 0 : index
    %7 = vector.load %arg4[%c0_3, %c0_4, %c0_5] : memref<9x128x128xbf16, #tpu.memory_space<vmem>>, vector<1x128x128xbf16>
    %8 = vector.shape_cast %7 : vector<1x128x128xbf16> to vector<128x128xbf16>
    %cst_6 = arith.constant dense<0.000000e+00> : vector<128x128xf32>
    %9 = tpu.matmul %6, %8, %cst_6 {dimension_numbers = #tpu.dot_dimension_numbers<[1], [0], [0], [1], [0, 0, 1, 1], [], []>} : vector<128x128xbf16>, vector<128x128xbf16>, vector<128x128xf32> -> vector<128x128xf32>
    %10 = arith.addf %1, %9 : vector<128x128xf32>
    %c0_i32_7 = arith.constant 0 : i32
    %11 = arith.addi %0, %c0_i32_7 : i32
    %c0_8 = arith.constant 0 : index
    %c0_9 = arith.constant 0 : index
    %12 = arith.index_cast %11 : i32 to index
    %c0_10 = arith.constant 0 : index
    %c0_11 = arith.constant 0 : index
    %13 = vector.load %arg3[%c0_8, %c0_9, %12, %c0_10, %c0_11] : memref<1x1x10x16x128xbf16, #tpu.memory_space<vmem>>, vector<1x1x8x16x128xbf16>
    %14 = vector.shape_cast %13 : vector<1x1x8x16x128xbf16> to vector<8x16x128xbf16>
    %15 = vector.shape_cast %14 : vector<8x16x128xbf16> to vector<128x128xbf16>
    %c1 = arith.constant 1 : index
    %c0_12 = arith.constant 0 : index
    %c0_13 = arith.constant 0 : index
    %16 = vector.load %arg4[%c1, %c0_12, %c0_13] : memref<9x128x128xbf16, #tpu.memory_space<vmem>>, vector<1x128x128xbf16>
    %17 = vector.shape_cast %16 : vector<1x128x128xbf16> to vector<128x128xbf16>
    %cst_14 = arith.constant dense<0.000000e+00> : vector<128x128xf32>
    %18 = tpu.matmul %15, %17, %cst_14 {dimension_numbers = #tpu.dot_dimension_numbers<[1], [0], [0], [1], [0, 0, 1, 1], [], []>} : vector<128x128xbf16>, vector<128x128xbf16>, vector<128x128xf32> -> vector<128x128xf32>
    %c127_i32 = arith.constant 127 : i32
    %19 = tpu.dynamic_rotate %18 by %c127_i32 dim 0 : vector<128x128xf32>, i32 -> vector<128x128xf32>
    %20 = arith.addf %10, %19 : vector<128x128xf32>
    %c0_i32_15 = arith.constant 0 : i32
    %21 = arith.addi %0, %c0_i32_15 : i32
    %c0_16 = arith.constant 0 : index
    %c0_17 = arith.constant 0 : index
    %22 = arith.index_cast %21 : i32 to index
    %c0_18 = arith.constant 0 : index
    %c0_19 = arith.constant 0 : index
    %23 = vector.load %arg3[%c0_16, %c0_17, %22, %c0_18, %c0_19] : memref<1x1x10x16x128xbf16, #tpu.memory_space<vmem>>, vector<1x1x8x16x128xbf16>
    %24 = vector.shape_cast %23 : vector<1x1x8x16x128xbf16> to vector<8x16x128xbf16>
    %25 = vector.shape_cast %24 : vector<8x16x128xbf16> to vector<128x128xbf16>
    %c2 = arith.constant 2 : index
    %c0_20 = arith.constant 0 : index
    %c0_21 = arith.constant 0 : index
    %26 = vector.load %arg4[%c2, %c0_20, %c0_21] : memref<9x128x128xbf16, #tpu.memory_space<vmem>>, vector<1x128x128xbf16>
    %27 = vector.shape_cast %26 : vector<1x128x128xbf16> to vector<128x128xbf16>
    %cst_22 = arith.constant dense<0.000000e+00> : vector<128x128xf32>
    %28 = tpu.matmul %25, %27, %cst_22 {dimension_numbers = #tpu.dot_dimension_numbers<[1], [0], [0], [1], [0, 0, 1, 1], [], []>} : vector<128x128xbf16>, vector<128x128xbf16>, vector<128x128xf32> -> vector<128x128xf32>
    %c126_i32 = arith.constant 126 : i32
    %29 = tpu.dynamic_rotate %28 by %c126_i32 dim 0 : vector<128x128xf32>, i32 -> vector<128x128xf32>
    %30 = arith.addf %20, %29 : vector<128x128xf32>
    %c1_i32 = arith.constant 1 : i32
    %31 = arith.addi %0, %c1_i32 : i32
    %c0_23 = arith.constant 0 : index
    %c0_24 = arith.constant 0 : index
    %32 = arith.index_cast %31 : i32 to index
    %c0_25 = arith.constant 0 : index
    %c0_26 = arith.constant 0 : index
    %33 = vector.load %arg3[%c0_23, %c0_24, %32, %c0_25, %c0_26] : memref<1x1x10x16x128xbf16, #tpu.memory_space<vmem>>, vector<1x1x8x16x128xbf16>
    %34 = vector.shape_cast %33 : vector<1x1x8x16x128xbf16> to vector<8x16x128xbf16>
    %35 = vector.shape_cast %34 : vector<8x16x128xbf16> to vector<128x128xbf16>
    %c3 = arith.constant 3 : index
    %c0_27 = arith.constant 0 : index
    %c0_28 = arith.constant 0 : index
    %36 = vector.load %arg4[%c3, %c0_27, %c0_28] : memref<9x128x128xbf16, #tpu.memory_space<vmem>>, vector<1x128x128xbf16>
    %37 = vector.shape_cast %36 : vector<1x128x128xbf16> to vector<128x128xbf16>
    %cst_29 = arith.constant dense<0.000000e+00> : vector<128x128xf32>
    %38 = tpu.matmul %35, %37, %cst_29 {dimension_numbers = #tpu.dot_dimension_numbers<[1], [0], [0], [1], [0, 0, 1, 1], [], []>} : vector<128x128xbf16>, vector<128x128xbf16>, vector<128x128xf32> -> vector<128x128xf32>
    %39 = arith.addf %30, %38 : vector<128x128xf32>
    %c1_i32_30 = arith.constant 1 : i32
    %40 = arith.addi %0, %c1_i32_30 : i32
    %c0_31 = arith.constant 0 : index
    %c0_32 = arith.constant 0 : index
    %41 = arith.index_cast %40 : i32 to index
    %c0_33 = arith.constant 0 : index
    %c0_34 = arith.constant 0 : index
    %42 = vector.load %arg3[%c0_31, %c0_32, %41, %c0_33, %c0_34] : memref<1x1x10x16x128xbf16, #tpu.memory_space<vmem>>, vector<1x1x8x16x128xbf16>
    %43 = vector.shape_cast %42 : vector<1x1x8x16x128xbf16> to vector<8x16x128xbf16>
    %44 = vector.shape_cast %43 : vector<8x16x128xbf16> to vector<128x128xbf16>
    %c4 = arith.constant 4 : index
    %c0_35 = arith.constant 0 : index
    %c0_36 = arith.constant 0 : index
    %45 = vector.load %arg4[%c4, %c0_35, %c0_36] : memref<9x128x128xbf16, #tpu.memory_space<vmem>>, vector<1x128x128xbf16>
    %46 = vector.shape_cast %45 : vector<1x128x128xbf16> to vector<128x128xbf16>
    %cst_37 = arith.constant dense<0.000000e+00> : vector<128x128xf32>
    %47 = tpu.matmul %44, %46, %cst_37 {dimension_numbers = #tpu.dot_dimension_numbers<[1], [0], [0], [1], [0, 0, 1, 1], [], []>} : vector<128x128xbf16>, vector<128x128xbf16>, vector<128x128xf32> -> vector<128x128xf32>
    %c127_i32_38 = arith.constant 127 : i32
    %48 = tpu.dynamic_rotate %47 by %c127_i32_38 dim 0 : vector<128x128xf32>, i32 -> vector<128x128xf32>
    %49 = arith.addf %39, %48 : vector<128x128xf32>
    %c1_i32_39 = arith.constant 1 : i32
    %50 = arith.addi %0, %c1_i32_39 : i32
    %c0_40 = arith.constant 0 : index
    %c0_41 = arith.constant 0 : index
    %51 = arith.index_cast %50 : i32 to index
    %c0_42 = arith.constant 0 : index
    %c0_43 = arith.constant 0 : index
    %52 = vector.load %arg3[%c0_40, %c0_41, %51, %c0_42, %c0_43] : memref<1x1x10x16x128xbf16, #tpu.memory_space<vmem>>, vector<1x1x8x16x128xbf16>
    %53 = vector.shape_cast %52 : vector<1x1x8x16x128xbf16> to vector<8x16x128xbf16>
    %54 = vector.shape_cast %53 : vector<8x16x128xbf16> to vector<128x128xbf16>
    %c5 = arith.constant 5 : index
    %c0_44 = arith.constant 0 : index
    %c0_45 = arith.constant 0 : index
    %55 = vector.load %arg4[%c5, %c0_44, %c0_45] : memref<9x128x128xbf16, #tpu.memory_space<vmem>>, vector<1x128x128xbf16>
    %56 = vector.shape_cast %55 : vector<1x128x128xbf16> to vector<128x128xbf16>
    %cst_46 = arith.constant dense<0.000000e+00> : vector<128x128xf32>
    %57 = tpu.matmul %54, %56, %cst_46 {dimension_numbers = #tpu.dot_dimension_numbers<[1], [0], [0], [1], [0, 0, 1, 1], [], []>} : vector<128x128xbf16>, vector<128x128xbf16>, vector<128x128xf32> -> vector<128x128xf32>
    %c126_i32_47 = arith.constant 126 : i32
    %58 = tpu.dynamic_rotate %57 by %c126_i32_47 dim 0 : vector<128x128xf32>, i32 -> vector<128x128xf32>
    %59 = arith.addf %49, %58 : vector<128x128xf32>
    %c2_i32 = arith.constant 2 : i32
    %60 = arith.addi %0, %c2_i32 : i32
    %c0_48 = arith.constant 0 : index
    %c0_49 = arith.constant 0 : index
    %61 = arith.index_cast %60 : i32 to index
    %c0_50 = arith.constant 0 : index
    %c0_51 = arith.constant 0 : index
    %62 = vector.load %arg3[%c0_48, %c0_49, %61, %c0_50, %c0_51] : memref<1x1x10x16x128xbf16, #tpu.memory_space<vmem>>, vector<1x1x8x16x128xbf16>
    %63 = vector.shape_cast %62 : vector<1x1x8x16x128xbf16> to vector<8x16x128xbf16>
    %64 = vector.shape_cast %63 : vector<8x16x128xbf16> to vector<128x128xbf16>
    %c6 = arith.constant 6 : index
    %c0_52 = arith.constant 0 : index
    %c0_53 = arith.constant 0 : index
    %65 = vector.load %arg4[%c6, %c0_52, %c0_53] : memref<9x128x128xbf16, #tpu.memory_space<vmem>>, vector<1x128x128xbf16>
    %66 = vector.shape_cast %65 : vector<1x128x128xbf16> to vector<128x128xbf16>
    %cst_54 = arith.constant dense<0.000000e+00> : vector<128x128xf32>
    %67 = tpu.matmul %64, %66, %cst_54 {dimension_numbers = #tpu.dot_dimension_numbers<[1], [0], [0], [1], [0, 0, 1, 1], [], []>} : vector<128x128xbf16>, vector<128x128xbf16>, vector<128x128xf32> -> vector<128x128xf32>
    %68 = arith.addf %59, %67 : vector<128x128xf32>
    %c2_i32_55 = arith.constant 2 : i32
    %69 = arith.addi %0, %c2_i32_55 : i32
    %c0_56 = arith.constant 0 : index
    %c0_57 = arith.constant 0 : index
    %70 = arith.index_cast %69 : i32 to index
    %c0_58 = arith.constant 0 : index
    %c0_59 = arith.constant 0 : index
    %71 = vector.load %arg3[%c0_56, %c0_57, %70, %c0_58, %c0_59] : memref<1x1x10x16x128xbf16, #tpu.memory_space<vmem>>, vector<1x1x8x16x128xbf16>
    %72 = vector.shape_cast %71 : vector<1x1x8x16x128xbf16> to vector<8x16x128xbf16>
    %73 = vector.shape_cast %72 : vector<8x16x128xbf16> to vector<128x128xbf16>
    %c7 = arith.constant 7 : index
    %c0_60 = arith.constant 0 : index
    %c0_61 = arith.constant 0 : index
    %74 = vector.load %arg4[%c7, %c0_60, %c0_61] : memref<9x128x128xbf16, #tpu.memory_space<vmem>>, vector<1x128x128xbf16>
    %75 = vector.shape_cast %74 : vector<1x128x128xbf16> to vector<128x128xbf16>
    %cst_62 = arith.constant dense<0.000000e+00> : vector<128x128xf32>
    %76 = tpu.matmul %73, %75, %cst_62 {dimension_numbers = #tpu.dot_dimension_numbers<[1], [0], [0], [1], [0, 0, 1, 1], [], []>} : vector<128x128xbf16>, vector<128x128xbf16>, vector<128x128xf32> -> vector<128x128xf32>
    %c127_i32_63 = arith.constant 127 : i32
    %77 = tpu.dynamic_rotate %76 by %c127_i32_63 dim 0 : vector<128x128xf32>, i32 -> vector<128x128xf32>
    %78 = arith.addf %68, %77 : vector<128x128xf32>
    %c2_i32_64 = arith.constant 2 : i32
    %79 = arith.addi %0, %c2_i32_64 : i32
    %c0_65 = arith.constant 0 : index
    %c0_66 = arith.constant 0 : index
    %80 = arith.index_cast %79 : i32 to index
    %c0_67 = arith.constant 0 : index
    %c0_68 = arith.constant 0 : index
    %81 = vector.load %arg3[%c0_65, %c0_66, %80, %c0_67, %c0_68] : memref<1x1x10x16x128xbf16, #tpu.memory_space<vmem>>, vector<1x1x8x16x128xbf16>
    %82 = vector.shape_cast %81 : vector<1x1x8x16x128xbf16> to vector<8x16x128xbf16>
    %83 = vector.shape_cast %82 : vector<8x16x128xbf16> to vector<128x128xbf16>
    %c8 = arith.constant 8 : index
    %c0_69 = arith.constant 0 : index
    %c0_70 = arith.constant 0 : index
    %84 = vector.load %arg4[%c8, %c0_69, %c0_70] : memref<9x128x128xbf16, #tpu.memory_space<vmem>>, vector<1x128x128xbf16>
    %85 = vector.shape_cast %84 : vector<1x128x128xbf16> to vector<128x128xbf16>
    %cst_71 = arith.constant dense<0.000000e+00> : vector<128x128xf32>
    %86 = tpu.matmul %83, %85, %cst_71 {dimension_numbers = #tpu.dot_dimension_numbers<[1], [0], [0], [1], [0, 0, 1, 1], [], []>} : vector<128x128xbf16>, vector<128x128xbf16>, vector<128x128xf32> -> vector<128x128xf32>
    %c126_i32_72 = arith.constant 126 : i32
    %87 = tpu.dynamic_rotate %86 by %c126_i32_72 dim 0 : vector<128x128xf32>, i32 -> vector<128x128xf32>
    %88 = arith.addf %78, %87 : vector<128x128xf32>
    %89 = vector.shape_cast %88 : vector<128x128xf32> to vector<8x16x128xf32>
    %90 = vector.extract_strided_slice %89 {offsets = [0, 0, 0], sizes = [8, 8, 128], strides = [1, 1, 1]} : vector<8x16x128xf32> to vector<8x8x128xf32>
    %91 = vector.shape_cast %90 : vector<8x8x128xf32> to vector<1x8x8x128xf32>
    %92 = arith.truncf %91 : vector<1x8x8x128xf32> to vector<1x8x8x128xbf16>
    %c0_73 = arith.constant 0 : index
    %c0_74 = arith.constant 0 : index
    %c0_75 = arith.constant 0 : index
    %c0_76 = arith.constant 0 : index
    %93 = vector.load %arg5[%c0_73, %c0_74, %c0_75, %c0_76] : memref<1x8x8x128xbf16, #tpu.memory_space<vmem>>, vector<1x8x8x128xbf16>
    tpu.vector_store %arg5[%c0_73, %c0_74, %c0_75, %c0_76], %92 {strides = array<i32>} : memref<1x8x8x128xbf16, #tpu.memory_space<vmem>>, vector<1x8x8x128xbf16>,
    %cst_77 = arith.constant dense<0.000000e+00> : vector<128xf32>
    %94 = vector.multi_reduction <add>, %90, %cst_77 [0, 1] : vector<8x8x128xf32> to vector<128xf32>
    %95 = arith.mulf %90, %90 : vector<8x8x128xf32>
    %cst_78 = arith.constant dense<0.000000e+00> : vector<128xf32>
    %96 = vector.multi_reduction <add>, %95, %cst_78 [0, 1] : vector<8x8x128xf32> to vector<128xf32>
    %97 = vector.shape_cast %94 : vector<128xf32> to vector<1x128xf32>
    %98 = vector.shape_cast %96 : vector<128xf32> to vector<1x128xf32>
    %cst_79 = arith.constant 0.000000e+00 : f32
    %99 = vector.broadcast %cst_79 : f32 to vector<6x128xf32>
    %100 = tpu.concatenate %97, %98, %99 in 0 : vector<1x128xf32>, vector<1x128xf32>, vector<6x128xf32> -> vector<8x128xf32>
    %101 = vector.shape_cast %100 : vector<8x128xf32> to vector<1x8x128xf32>
    %c0_80 = arith.constant 0 : index
    %c0_81 = arith.constant 0 : index
    %c0_82 = arith.constant 0 : index
    %102 = vector.load %arg6[%c0_80, %c0_81, %c0_82] : memref<1x8x128xf32, #tpu.memory_space<vmem>>, vector<1x8x128xf32>
    tpu.vector_store %arg6[%c0_80, %c0_81, %c0_82], %101 {strides = array<i32>} : memref<1x8x128xf32, #tpu.memory_space<vmem>>, vector<1x8x128xf32>,
    return
  }
  func.func @transform_0(%arg0: i32, %arg1: i32, %arg2: i32) -> (i32, i32, i32, i32, i32) {
    %c0_i32 = arith.constant 0 : i32
    %c0_i32_0 = arith.constant 0 : i32
    %c0_i32_1 = arith.constant 0 : i32
    %c0_i32_2 = arith.constant 0 : i32
    %c0_i32_3 = arith.constant 0 : i32
    return %arg0, %c0_i32, %c0_i32_0, %c0_i32_1, %c0_i32_2 : i32, i32, i32, i32, i32
  }
  func.func @transform_1(%arg0: i32, %arg1: i32, %arg2: i32) -> (i32, i32, i32) {
    %c0_i32 = arith.constant 0 : i32
    %c0_i32_0 = arith.constant 0 : i32
    %c0_i32_1 = arith.constant 0 : i32
    return %c0_i32, %c0_i32_0, %arg1 : i32, i32, i32
  }
  func.func @transform_2(%arg0: i32, %arg1: i32, %arg2: i32) -> (i32, i32, i32, i32) {
    %c0_i32 = arith.constant 0 : i32
    %c0_i32_0 = arith.constant 0 : i32
    return %arg0, %arg2, %c0_i32, %arg1 : i32, i32, i32, i32
  }
  func.func @transform_3(%arg0: i32, %arg1: i32, %arg2: i32) -> (i32, i32, i32) {
    %c0_i32 = arith.constant 0 : i32
    return %arg0, %arg2, %arg1 : i32, i32, i32
  }
}

module attributes {stable_mosaic.version = 11 : i64} {
  func.func @_bn_tail_kernel(%arg0: i32, %arg1: memref<128x128xbf16, #tpu.memory_space<vmem>>, %arg2: memref<1x128xf32, #tpu.memory_space<vmem>>, %arg3: memref<1x128xf32, #tpu.memory_space<vmem>>, %arg4: memref<128x128xbf16, #tpu.memory_space<vmem>>, %arg5: memref<1x128xf32, #tpu.memory_space<vmem>>, %arg6: memref<1x128xf32, #tpu.memory_space<vmem>>, %arg7: memref<128x128xbf16, #tpu.memory_space<vmem>>) attributes {dimension_semantics = [#tpu.dimension_semantics<parallel>], iteration_bounds = array<i64: 1>, scalar_prefetch = 0 : i64, scratch_operands = 0 : i64, tpu.core_type = #tpu.core_type<tc>, window_params = [{transform_indices = @transform_0, window_bounds = array<i64: 128, 128>}, {pipeline_mode = #tpu.pipeline_mode<synchronous>, transform_indices = @transform_1, window_bounds = array<i64: 1, 128>}, {pipeline_mode = #tpu.pipeline_mode<synchronous>, transform_indices = @transform_2, window_bounds = array<i64: 1, 128>}, {transform_indices = @transform_3, window_bounds = array<i64: 128, 128>}, {pipeline_mode = #tpu.pipeline_mode<synchronous>, transform_indices = @transform_4, window_bounds = array<i64: 1, 128>}, {pipeline_mode = #tpu.pipeline_mode<synchronous>, transform_indices = @transform_5, window_bounds = array<i64: 1, 128>}, {transform_indices = @transform_6, window_bounds = array<i64: 128, 128>}]} {
    %c0 = arith.constant 0 : index
    %c0_0 = arith.constant 0 : index
    %0 = vector.load %arg1[%c0, %c0_0] : memref<128x128xbf16, #tpu.memory_space<vmem>>, vector<128x128xbf16>
    %1 = arith.extf %0 : vector<128x128xbf16> to vector<128x128xf32>
    %c0_1 = arith.constant 0 : index
    %c0_2 = arith.constant 0 : index
    %2 = vector.load %arg2[%c0_1, %c0_2] : memref<1x128xf32, #tpu.memory_space<vmem>>, vector<1x128xf32>
    %3 = vector.broadcast %2 : vector<1x128xf32> to vector<128x128xf32>
    %4 = arith.mulf %1, %3 : vector<128x128xf32>
    %c0_3 = arith.constant 0 : index
    %c0_4 = arith.constant 0 : index
    %5 = vector.load %arg3[%c0_3, %c0_4] : memref<1x128xf32, #tpu.memory_space<vmem>>, vector<1x128xf32>
    %6 = vector.broadcast %5 : vector<1x128xf32> to vector<128x128xf32>
    %7 = arith.addf %4, %6 : vector<128x128xf32>
    %cst = arith.constant 0.000000e+00 : f32
    %8 = vector.broadcast %cst : f32 to vector<128x128xf32>
    %9 = arith.maximumf %7, %8 : vector<128x128xf32>
    %c0_5 = arith.constant 0 : index
    %c0_6 = arith.constant 0 : index
    %10 = vector.load %arg4[%c0_5, %c0_6] : memref<128x128xbf16, #tpu.memory_space<vmem>>, vector<128x128xbf16>
    %11 = arith.extf %10 : vector<128x128xbf16> to vector<128x128xf32>
    %c0_7 = arith.constant 0 : index
    %c0_8 = arith.constant 0 : index
    %12 = vector.load %arg5[%c0_7, %c0_8] : memref<1x128xf32, #tpu.memory_space<vmem>>, vector<1x128xf32>
    %13 = vector.broadcast %12 : vector<1x128xf32> to vector<128x128xf32>
    %14 = arith.mulf %11, %13 : vector<128x128xf32>
    %c0_9 = arith.constant 0 : index
    %c0_10 = arith.constant 0 : index
    %15 = vector.load %arg6[%c0_9, %c0_10] : memref<1x128xf32, #tpu.memory_space<vmem>>, vector<1x128xf32>
    %16 = vector.broadcast %15 : vector<1x128xf32> to vector<128x128xf32>
    %17 = arith.addf %14, %16 : vector<128x128xf32>
    %18 = arith.addf %9, %17 : vector<128x128xf32>
    %cst_11 = arith.constant 0.000000e+00 : f32
    %19 = vector.broadcast %cst_11 : f32 to vector<128x128xf32>
    %20 = arith.maximumf %18, %19 : vector<128x128xf32>
    %21 = arith.truncf %20 : vector<128x128xf32> to vector<128x128xbf16>
    %c0_12 = arith.constant 0 : index
    %c0_13 = arith.constant 0 : index
    %22 = vector.load %arg7[%c0_12, %c0_13] : memref<128x128xbf16, #tpu.memory_space<vmem>>, vector<128x128xbf16>
    tpu.vector_store %arg7[%c0_12, %c0_13], %21 {strides = array<i32>} : memref<128x128xbf16, #tpu.memory_space<vmem>>, vector<128x128xbf16>,
    return
  }
  func.func @transform_0(%arg0: i32) -> (i32, i32) {
    %c0_i32 = arith.constant 0 : i32
    %c0_i32_0 = arith.constant 0 : i32
    return %arg0, %c0_i32 : i32, i32
  }
  func.func @transform_1(%arg0: i32) -> (i32, i32) {
    %c0_i32 = arith.constant 0 : i32
    %c0_i32_0 = arith.constant 0 : i32
    %c0_i32_1 = arith.constant 0 : i32
    return %c0_i32, %c0_i32_0 : i32, i32
  }
  func.func @transform_2(%arg0: i32) -> (i32, i32) {
    %c0_i32 = arith.constant 0 : i32
    %c0_i32_0 = arith.constant 0 : i32
    %c0_i32_1 = arith.constant 0 : i32
    return %c0_i32, %c0_i32_0 : i32, i32
  }
  func.func @transform_3(%arg0: i32) -> (i32, i32) {
    %c0_i32 = arith.constant 0 : i32
    %c0_i32_0 = arith.constant 0 : i32
    return %arg0, %c0_i32 : i32, i32
  }
  func.func @transform_4(%arg0: i32) -> (i32, i32) {
    %c0_i32 = arith.constant 0 : i32
    %c0_i32_0 = arith.constant 0 : i32
    %c0_i32_1 = arith.constant 0 : i32
    return %c0_i32, %c0_i32_0 : i32, i32
  }
  func.func @transform_5(%arg0: i32) -> (i32, i32) {
    %c0_i32 = arith.constant 0 : i32
    %c0_i32_0 = arith.constant 0 : i32
    %c0_i32_1 = arith.constant 0 : i32
    return %c0_i32, %c0_i32_0 : i32, i32
  }
  func.func @transform_6(%arg0: i32) -> (i32, i32) {
    %c0_i32 = arith.constant 0 : i32
    %c0_i32_0 = arith.constant 0 : i32
    return %arg0, %c0_i32 : i32, i32
  }
}

module attributes {stable_mosaic.version = 11 : i64} {
  func.func @_bn_tail_kernel(%arg0: i32, %arg1: memref<128x128xbf16, #tpu.memory_space<vmem>>, %arg2: memref<1x128xf32, #tpu.memory_space<vmem>>, %arg3: memref<1x128xf32, #tpu.memory_space<vmem>>, %arg4: memref<128x128xbf16, #tpu.memory_space<vmem>>, %arg5: memref<128x128xbf16, #tpu.memory_space<vmem>>) attributes {dimension_semantics = [#tpu.dimension_semantics<parallel>], iteration_bounds = array<i64: 1>, scalar_prefetch = 0 : i64, scratch_operands = 0 : i64, tpu.core_type = #tpu.core_type<tc>, window_params = [{transform_indices = @transform_0, window_bounds = array<i64: 128, 128>}, {pipeline_mode = #tpu.pipeline_mode<synchronous>, transform_indices = @transform_1, window_bounds = array<i64: 1, 128>}, {pipeline_mode = #tpu.pipeline_mode<synchronous>, transform_indices = @transform_2, window_bounds = array<i64: 1, 128>}, {transform_indices = @transform_3, window_bounds = array<i64: 128, 128>}, {transform_indices = @transform_4, window_bounds = array<i64: 128, 128>}]} {
    %c0 = arith.constant 0 : index
    %c0_0 = arith.constant 0 : index
    %0 = vector.load %arg1[%c0, %c0_0] : memref<128x128xbf16, #tpu.memory_space<vmem>>, vector<128x128xbf16>
    %1 = arith.extf %0 : vector<128x128xbf16> to vector<128x128xf32>
    %c0_1 = arith.constant 0 : index
    %c0_2 = arith.constant 0 : index
    %2 = vector.load %arg2[%c0_1, %c0_2] : memref<1x128xf32, #tpu.memory_space<vmem>>, vector<1x128xf32>
    %3 = vector.broadcast %2 : vector<1x128xf32> to vector<128x128xf32>
    %4 = arith.mulf %1, %3 : vector<128x128xf32>
    %c0_3 = arith.constant 0 : index
    %c0_4 = arith.constant 0 : index
    %5 = vector.load %arg3[%c0_3, %c0_4] : memref<1x128xf32, #tpu.memory_space<vmem>>, vector<1x128xf32>
    %6 = vector.broadcast %5 : vector<1x128xf32> to vector<128x128xf32>
    %7 = arith.addf %4, %6 : vector<128x128xf32>
    %cst = arith.constant 0.000000e+00 : f32
    %8 = vector.broadcast %cst : f32 to vector<128x128xf32>
    %9 = arith.maximumf %7, %8 : vector<128x128xf32>
    %c0_5 = arith.constant 0 : index
    %c0_6 = arith.constant 0 : index
    %10 = vector.load %arg4[%c0_5, %c0_6] : memref<128x128xbf16, #tpu.memory_space<vmem>>, vector<128x128xbf16>
    %11 = arith.extf %10 : vector<128x128xbf16> to vector<128x128xf32>
    %12 = arith.addf %9, %11 : vector<128x128xf32>
    %cst_7 = arith.constant 0.000000e+00 : f32
    %13 = vector.broadcast %cst_7 : f32 to vector<128x128xf32>
    %14 = arith.maximumf %12, %13 : vector<128x128xf32>
    %15 = arith.truncf %14 : vector<128x128xf32> to vector<128x128xbf16>
    %c0_8 = arith.constant 0 : index
    %c0_9 = arith.constant 0 : index
    %16 = vector.load %arg5[%c0_8, %c0_9] : memref<128x128xbf16, #tpu.memory_space<vmem>>, vector<128x128xbf16>
    tpu.vector_store %arg5[%c0_8, %c0_9], %15 {strides = array<i32>} : memref<128x128xbf16, #tpu.memory_space<vmem>>, vector<128x128xbf16>,
    return
  }
  func.func @transform_0(%arg0: i32) -> (i32, i32) {
    %c0_i32 = arith.constant 0 : i32
    %c0_i32_0 = arith.constant 0 : i32
    return %arg0, %c0_i32 : i32, i32
  }
  func.func @transform_1(%arg0: i32) -> (i32, i32) {
    %c0_i32 = arith.constant 0 : i32
    %c0_i32_0 = arith.constant 0 : i32
    %c0_i32_1 = arith.constant 0 : i32
    return %c0_i32, %c0_i32_0 : i32, i32
  }
  func.func @transform_2(%arg0: i32) -> (i32, i32) {
    %c0_i32 = arith.constant 0 : i32
    %c0_i32_0 = arith.constant 0 : i32
    %c0_i32_1 = arith.constant 0 : i32
    return %c0_i32, %c0_i32_0 : i32, i32
  }
  func.func @transform_3(%arg0: i32) -> (i32, i32) {
    %c0_i32 = arith.constant 0 : i32
    %c0_i32_0 = arith.constant 0 : i32
    return %arg0, %c0_i32 : i32, i32
  }
  func.func @transform_4(%arg0: i32) -> (i32, i32) {
    %c0_i32 = arith.constant 0 : i32
    %c0_i32_0 = arith.constant 0 : i32
    return %arg0, %c0_i32 : i32, i32
  }
}

</mosaic_0001>

<bundles_post_ra>
// kernel: forward.10
= control target key start
LH: loop header
LB: loop body
LE: loop exit
PB: predicated region body
PF: predicated region fallthrough
CT: control target
= control target key end

     0   :  { %s336_s0 = inlined_call_operand.vmem [shape: bf16[128,128], index: 0, kind: input, shape index: {}]   ;;  %s337_s1 = inlined_call_operand.vmem [shape: f32[1,128], index: 1, kind: input, shape index: {}]   ;;  %s338_s2 = inlined_call_operand.vmem [shape: f32[1,128], index: 2, kind: input, shape index: {}]   ;;  %s339_s3 = inlined_call_operand.vmem [shape: bf16[128,128], index: 3, kind: output, shape index: {}]  }
   0x1   :  { %v139_v0 = vld [vmem:[%s336_s0] sm:$0xff]   ;;  %v210_v5 = vld [vmem:[%s336_s0 + $0x8] sm:$0xff]   ;;  %v211_v8 = vld [vmem:[%s336_s0 + $0x10] sm:$0xff]  }
   0x2   :  { %v252_v1 = vld [vmem:[%s337_s1] ss:$0 sm:$0xff]  ;;  %v140_v2 = vunpack.c.l.bf16 %v139_v0  ;;  %v141_v3 = vunpack.c.h.bf16 %v139_v0  ;;  %v144_v6 = vunpack.c.l.bf16 %v210_v5  ;;  %v145_v7 = vunpack.c.h.bf16 %v210_v5  ;;  %v212_v9 = vld [vmem:[%s336_s0 + $0x18] sm:$0xff]   ;;  %v214_v35 = vld [vmem:[%s336_s0 + $0x28] sm:$0xff]  }
   0x3   :  { %v257_v4 = vld [vmem:[%s338_s2] ss:$0 sm:$0xff]  ;;  %v148_v12 = vunpack.c.l.bf16 %v211_v8  ;;  %v149_v13 = vunpack.c.h.bf16 %v211_v8  ;;  %v152_v16 = vunpack.c.l.bf16 %v212_v9  ;;  %v153_v17 = vunpack.c.h.bf16 %v212_v9  ;;  %v215_v40 = vld [vmem:[%s336_s0 + $0x30] sm:$0xff]   ;;  %v216_v45 = vld [vmem:[%s336_s0 + $0x38] sm:$0xff]  }
   0x4   :  { %v50_v10 = vmul.f32 %v252_v1, %v140_v2  ;;  %v51_v11 = vmul.f32 %v252_v1, %v141_v3  ;;  %v52_v14 = vmul.f32 %v252_v1, %v144_v6  ;;  %v53_v15 = vmul.f32 %v252_v1, %v145_v7  ;;  %v213_v26 = vld [vmem:[%s336_s0 + $0x20] sm:$0xff]  }
   0x5   :  { %v54_v20 = vmul.f32 %v252_v1, %v148_v12  ;;  %v55_v21 = vmul.f32 %v252_v1, %v149_v13  ;;  %v56_v24 = vmul.f32 %v252_v1, %v152_v16  ;;  %v57_v25 = vmul.f32 %v252_v1, %v153_v17 }
   0x6   :  { %v70_v18 = vadd.f32 %v257_v4, %v50_v10  ;;  %v71_v19 = vadd.f32 %v257_v4, %v51_v11  ;;  %v72_v22 = vadd.f32 %v257_v4, %v52_v14  ;;  %v73_v23 = vadd.f32 %v257_v4, %v53_v15 }
   0x7   :  { %v74_v29 = vadd.f32 %v257_v4, %v54_v20  ;;  %v75_v30 = vadd.f32 %v257_v4, %v55_v21  ;;  %v76_v33 = vadd.f32 %v257_v4, %v56_v24  ;;  %v77_v34 = vadd.f32 %v257_v4, %v57_v25 }
   0x8   :  { %v86_v27 = vmax.f32 %v70_v18, 0.0  ;;  %v87_v28 = vmax.f32 %v71_v19, 0.0  ;;  %v88_v31 = vmax.f32 %v72_v22, 0.0  ;;  %v89_v32 = vmax.f32 %v73_v23, 0.0 }
   0x9   :  { %v90_v37 = vmax.f32 %v74_v29, 0.0  ;;  %v91_v38 = vmax.f32 %v75_v30, 0.0  ;;  %v156_v39 = vunpack.c.l.bf16 %v213_v26  ;;  %v92_v42 = vmax.f32 %v76_v33, 0.0 }
   0xa   :  { %v173_v36 = vpack.c.bf16 %v87_v28, %v86_v27  ;;  %v178_v41 = vpack.c.bf16 %v89_v32, %v88_v31  ;;  %v93_v43 = vmax.f32 %v77_v34, 0.0  ;;  %v157_v44 = vunpack.c.h.bf16 %v213_v26 }
   0xb   :  { %v183_v46 = vpack.c.bf16 %v91_v38, %v90_v37  ;;  %v58_v47 = vmul.f32 %v252_v1, %v156_v39  ;;  %v160_v48 = vunpack.c.l.bf16 %v214_v35  ;;  %v161_v49 = vunpack.c.h.bf16 %v214_v35 }
   0xc   :  { %174 = vst [vmem:[%s339_s3] sm:$0xff] %v173_v36   ;;  %v188_v50 = vpack.c.bf16 %v93_v43, %v92_v42  ;;  %v59_v51 = vmul.f32 %v252_v1, %v157_v44  ;;  %v164_v52 = vunpack.c.l.bf16 %v215_v40  ;;  %v165_v53 = vunpack.c.h.bf16 %v215_v40 }
   0xd   :  { %217 = vst [vmem:[%s339_s3 + $0x8] sm:$0xff] %v178_v41   ;;  %v78_v54 = vadd.f32 %v257_v4, %v58_v47  ;;  %v60_v55 = vmul.f32 %v252_v1, %v160_v48  ;;  %v61_v56 = vmul.f32 %v252_v1, %v161_v49  ;;  %v168_v57 = vunpack.c.l.bf16 %v216_v45 }
   0xe   :  { %218 = vst [vmem:[%s339_s3 + $0x10] sm:$0xff] %v183_v46   ;;  %v79_v58 = vadd.f32 %v257_v4, %v59_v51  ;;  %v62_v59 = vmul.f32 %v252_v1, %v164_v52  ;;  %v63_v60 = vmul.f32 %v252_v1, %v165_v53  ;;  %v169_v61 = vunpack.c.h.bf16 %v216_v45 }
   0xf   :  { %219 = vst [vmem:[%s339_s3 + $0x18] sm:$0xff] %v188_v50   ;;  %v94_v62 = vmax.f32 %v78_v54, 0.0  ;;  %v80_v63 = vadd.f32 %v257_v4, %v60_v55  ;;  %v81_v0 = vadd.f32 %v257_v4, %v61_v56  ;;  %v64_v2 = vmul.f32 %v252_v1, %v168_v57 }
  0x10   :  { %v95_v3 = vmax.f32 %v79_v58, 0.0  ;;  %v82_v5 = vadd.f32 %v257_v4, %v62_v59  ;;  %v83_v6 = vadd.f32 %v257_v4, %v63_v60  ;;  %v65_v7 = vmul.f32 %v252_v1, %v169_v61 }
  0x11   :  { %v96_v8 = vmax.f32 %v80_v63, 0.0  ;;  %v97_v9 = vmax.f32 %v81_v0, 0.0  ;;  %v84_v10 = vadd.f32 %v257_v4, %v64_v2 }
  0x12   :  { %v193_v11 = vpack.c.bf16 %v95_v3, %v94_v62  ;;  %v98_v12 = vmax.f32 %v82_v5, 0.0  ;;  %v99_v13 = vmax.f32 %v83_v6, 0.0  ;;  %v85_v14 = vadd.f32 %v257_v4, %v65_v7 }
  0x13   :  { %v198_v15 = vpack.c.bf16 %v97_v9, %v96_v8  ;;  %v100_v16 = vmax.f32 %v84_v10, 0.0 }
  0x14   :  { %220 = vst [vmem:[%s339_s3 + $0x20] sm:$0xff] %v193_v11   ;;  %v203_v17 = vpack.c.bf16 %v99_v13, %v98_v12  ;;  %v101_v18 = vmax.f32 %v85_v14, 0.0 }
  0x15   :  { %221 = vst [vmem:[%s339_s3 + $0x28] sm:$0xff] %v198_v15  }
  0x16   :  { %222 = vst [vmem:[%s339_s3 + $0x30] sm:$0xff] %v203_v17   ;;  %v208_v1 = vpack.c.bf16 %v101_v18, %v100_v16 }
  0x18   :  { %223 = vst [vmem:[%s339_s3 + $0x38] sm:$0xff] %v208_v1  }

// kernel: forward.12
= control target key start
LH: loop header
LB: loop body
LE: loop exit
PB: predicated region body
PF: predicated region fallthrough
CT: control target
= control target key end

     0   :  { %s788_s12 = smov 0   ;;  %s790_s13 = smov 0   ;;  %s856_s0 = inlined_call_operand.vmem [shape: bf16[2,1,8,8,128], index: 0, kind: input, shape index: {}]   ;;  %s857_s1 = inlined_call_operand.vmem [shape: bf16[1,128,128], index: 1, kind: input, shape index: {}]   ;;  %s858_s2 = inlined_call_operand.vmem [shape: bf16[2,8,8,128], index: 2, kind: output, shape index: {0}]   ;;  %s859_s3 = inlined_call_operand.vmem [shape: f32[2,8,128], index: 3, kind: output, shape index: {1}]  }
   0x1   :  { %s792_s14 = smov 0  }
   0x2 LB: > { %s33_s15 = sadd.s32 1, %s762_s13  ;;  %p603_p0 = scmp.ge.s32.totalorder %s766_s14, 1  ;;  %s766_s14 = sphi %s792_s14, %s14_s14   ;;  %s762_s13 = sphi %s790_s13, %s861_s13   ;;  %s758_s12 = sphi %s788_s12, %s860_s12  }
   0x3   : > { %p35_p1 = scmp.ge.s32.totalorder %s33_s15, 2  ;;  %p176_p2 = scmp.lt.s32.totalorder %s766_s14, 3 }
   0x5   : > { %s863_s15 = smov (%p35_p1, %s33_s15), 0  ;;  %p177_p3 = pnand %p603_p0, %p176_p2 }
   0x6   : > { %p221_p4 = scmp.lt.s32.totalorder (!%p177_p3), %s758_s12, 1 }
   0x7   : > { %180 = sbr.rel (%p177_p3) target bundleno = 209 (0xd1), region = 28 }
   0xc   : > { %v672_v0 = vld [vmem:[%s857_s1 + $0x38] sm:$0xff]  ;;  %v671_v1 = vld [vmem:[%s857_s1 + $0x30] sm:$0xff]  ;;  %v670_v2 = vld [vmem:[%s857_s1 + $0x28] sm:$0xff]  ;;  %s865_s12 = smov (!%p221_p4, %s758_s12), 1  ;;  %vm431_vm0 = vcmask 1040384   ;;  %vm433_vm1 = vcmask 1041408  }
   0xd   : > { %352 = vmatpush.bf16.msra.mxu0 %v672_v0  ;;  %696 = vmatpush.bf16.msra.mxu1 %v672_v0  ;;  %v669_v3 = vld [vmem:[%s857_s1 + $0x20] sm:$0xff]  ;;  %v668_v4 = vld [vmem:[%s857_s1 + $0x18] sm:$0xff]  ;;  %v667_v5 = vld [vmem:[%s857_s1 + $0x10] sm:$0xff]  ;;  %s659_s30 = sshll.u32 %s865_s12, 5  ;;  %s608_s16 = sshll.u32 %s865_s12, 3 }
   0xe   : > { %697 = vmatpush.bf16.msra.mxu2 %v672_v0  ;;  %698 = vmatpush.bf16.msra.mxu3 %v672_v0  ;;  %v666_v6 = vld [vmem:[%s857_s1 + $0x8] sm:$0xff]  ;;  %v665_v7 = vld [vmem:[%s857_s1] sm:$0xff]  ;;  %s225_s8 = scalar_lea.vmem %s856_s0, %s659_s30  ;;  %s241_s11 = scalar_lea.vmem %s858_s2, %s659_s30 }
   0xf   : > { %v661_v8 = vld [vmem:[%s225_s8] sm:$0xff]  ;;  %v662_v9 = vld [vmem:[%s225_s8 + $0x8] sm:$0xff]  ;;  %v663_v10 = vld [vmem:[%s225_s8 + $0x10] sm:$0xff]  ;;  %s252_s19 = scalar_lea.vmem %s859_s3, %s608_s16 }
  0x10   : > { %v664_v11 = vld [vmem:[%s225_s8 + $0x18] sm:$0xff] }
  0x11   : > { %353 = vmatpush.bf16.msra.mxu0 %v671_v1  ;;  %699 = vmatpush.bf16.msra.mxu1 %v671_v1 }
  0x12   : > { %700 = vmatpush.bf16.msra.mxu2 %v671_v1  ;;  %701 = vmatpush.bf16.msra.mxu3 %v671_v1 }
  0x15   : > { %354 = vmatpush.bf16.msra.mxu0 %v670_v2  ;;  %702 = vmatpush.bf16.msra.mxu1 %v670_v2 }
  0x16   : > { %703 = vmatpush.bf16.msra.mxu2 %v670_v2  ;;  %704 = vmatpush.bf16.msra.mxu3 %v670_v2 }
  0x19   : > { %355 = vmatpush.bf16.msra.mxu0 %v669_v3  ;;  %705 = vmatpush.bf16.msra.mxu1 %v669_v3 }
  0x1a   : > { %706 = vmatpush.bf16.msra.mxu2 %v669_v3  ;;  %707 = vmatpush.bf16.msra.mxu3 %v669_v3 }
  0x1d   : > { %356 = vmatpush.bf16.msra.mxu0 %v668_v4  ;;  %708 = vmatpush.bf16.msra.mxu1 %v668_v4 }
  0x1e   : > { %709 = vmatpush.bf16.msra.mxu2 %v668_v4  ;;  %710 = vmatpush.bf16.msra.mxu3 %v668_v4 }
  0x21   : > { %357 = vmatpush.bf16.msra.mxu0 %v667_v5  ;;  %711 = vmatpush.bf16.msra.mxu1 %v667_v5 }
  0x22   : > { %712 = vmatpush.bf16.msra.mxu2 %v667_v5  ;;  %713 = vmatpush.bf16.msra.mxu3 %v667_v5 }
  0x25   : > { %358 = vmatpush.bf16.msra.mxu0 %v666_v6  ;;  %714 = vmatpush.bf16.msra.mxu1 %v666_v6 }
  0x26   : > { %715 = vmatpush.bf16.msra.mxu2 %v666_v6  ;;  %716 = vmatpush.bf16.msra.mxu3 %v666_v6 }
  0x29   : > { %359 = vmatpush.bf16.msra.mxu0 %v665_v7  ;;  %717 = vmatpush.bf16.msra.mxu1 %v665_v7 }
  0x2a   : > { %718 = vmatpush.bf16.msra.mxu2 %v665_v7  ;;  %719 = vmatpush.bf16.msra.mxu3 %v665_v7 }
  0x2c   : > { %360 = vmatmul.bf16.vlgmr.msra.gmra.mxu0 %v661_v8  ;;  %365 = vmatmul.bf16.vlgmr.msra.gmra.mxu1 %v662_v9 }
  0x2d   : > { %370 = vmatmul.bf16.vlgmr.msra.gmra.mxu2 %v663_v10  ;;  %375 = vmatmul.bf16.vlgmr.msra.gmra.mxu3 %v664_v11 }
  0xa9   : > { %v361_v12 = vpop.f32.mrf.mxu0  ;;  %v366_v13 = vpop.f32.mrf.mxu1 }
  0xaa   : > { %v410_v16 = vmul.f32 %v361_v12, %v361_v12  ;;  %v412_v23 = vmul.f32 %v366_v13, %v366_v13 }
  0xb0   : > { %v371_v14 = vpop.f32.mrf.mxu2  ;;  %v376_v15 = vpop.f32.mrf.mxu3 }
  0xb1   : > { %v363_v17 = vpop.f32.mrf.mxu0  ;;  %v368_v18 = vpop.f32.mrf.mxu1  ;;  %v414_v29 = vmul.f32 %v371_v14, %v371_v14  ;;  %v416_v39 = vmul.f32 %v376_v15, %v376_v15 }
  0xb2   : > { %v676_v19 = vpack.c.bf16 %v363_v17, %v361_v12  ;;  %v397_v20 = vadd.f32 %v363_v17, %v361_v12  ;;  %v411_v21 = vmul.f32 %v363_v17, %v363_v17  ;;  %v681_v22 = vpack.c.bf16 %v368_v18, %v366_v13 }
  0xb3   : > { %v413_v27 = vmul.f32 %v368_v18, %v368_v18 }
  0xb4   : > { %677 = vst [vmem:[%s241_s11] sm:$0xff] %v676_v19   ;;  %v418_v24 = vadd.f32 %v411_v21, %v410_v16  ;;  %v398_v25 = vadd.f32 %v397_v20, %v366_v13 }
  0xb5   : > { %693 = vst [vmem:[%s241_s11 + $0x8] sm:$0xff] %v681_v22  }
  0xb6   : > { %v399_v26 = vadd.f32 %v398_v25, %v368_v18  ;;  %v419_v28 = vadd.f32 %v418_v24, %v412_v23 }
  0xb8   : > { %v420_v30 = vadd.f32 %v419_v28, %v413_v27  ;;  %v373_v31 = vpop.f32.mrf.mxu2  ;;  %v400_v32 = vadd.f32 %v399_v26, %v371_v14  ;;  %v378_v33 = vpop.f32.mrf.mxu3 }
  0xb9   : > { %v686_v34 = vpack.c.bf16 %v373_v31, %v371_v14  ;;  %v691_v35 = vpack.c.bf16 %v378_v33, %v376_v15  ;;  %v415_v37 = vmul.f32 %v373_v31, %v373_v31  ;;  %v417_v43 = vmul.f32 %v378_v33, %v378_v33 }
  0xba   : > { %v401_v36 = vadd.f32 %v400_v32, %v373_v31  ;;  %v421_v38 = vadd.f32 %v420_v30, %v414_v29 }
  0xbb   : > { %694 = vst [vmem:[%s241_s11 + $0x10] sm:$0xff] %v686_v34  }
  0xbc   : > { %v422_v40 = vadd.f32 %v421_v38, %v415_v37  ;;  %695 = vst [vmem:[%s241_s11 + $0x18] sm:$0xff] %v691_v35   ;;  %v402_v41 = vadd.f32 %v401_v36, %v376_v15 }
  0xbe   : > { %v403_v42 = vadd.f32 %v402_v41, %v378_v33  ;;  %v423_v44 = vadd.f32 %v422_v40, %v416_v39 }
  0xc0   : > { %v404_v45 = vrot.slane %v403_v42, 4  ;;  %v424_v46 = vadd.f32 %v423_v44, %v417_v43 }
  0xc2   : > { %v405_v47 = vadd.f32 %v404_v45, %v403_v42  ;;  %v425_v48 = vrot.slane %v424_v46, 4 }
  0xc4   : > { %v406_v49 = vrot.slane %v405_v47, 2  ;;  %v426_v50 = vadd.f32 %v425_v48, %v424_v46 }
  0xc6   : > { %v407_v51 = vadd.f32 %v406_v49, %v405_v47  ;;  %v427_v52 = vrot.slane %v426_v50, 2 }
  0xc8   : > { %v408_v53 = vrot.slane %v407_v51, 1  ;;  %v428_v54 = vadd.f32 %v427_v52, %v426_v50 }
  0xca   : > { %v429_v55 = vrot.slane %v428_v54, 1  ;;  %v409_v56 = vadd.f32 %v408_v53, %v407_v51 }
  0xcc   : > { %v430_v57 = vadd.f32 %v429_v55, %v428_v54 }
  0xce   : > { %v432_v58 = vsel %vm431_vm0, %v409_v56, %v430_v57 }
  0xcf   : > { %v434_v59 = vsel %vm433_vm1, %v432_v58, 0.0 }
  0xd0   : > { %435 = vst [vmem:[%s252_s19] sm:$0xff] %v434_v59 }
  0xd1 PF: > { %s14_s14 = sadd.s32 1, %s766_s14   ;;  %s860_s12 = smov %s762_s13 }
  0xd2   : > { %p11_p5 = scmp.ge.s32.totalorder %s14_s14, 4   ;;  %s861_s13 = smov %s863_s15 }
  0xd4   :  { %13 = sbr.rel (!%p11_p5) target bundleno = 2 (0x2), region = 74 }

// kernel: forward.13
= control target key start
LH: loop header
LB: loop body
LE: loop exit
PB: predicated region body
PF: predicated region fallthrough
CT: control target
= control target key end

     0   :  { %s571_s0 = inlined_call_operand.vmem [shape: bf16[128,128], index: 0, kind: input, shape index: {}]   ;;  %s572_s1 = inlined_call_operand.vmem [shape: f32[1,128], index: 1, kind: input, shape index: {}]   ;;  %s573_s2 = inlined_call_operand.vmem [shape: f32[1,128], index: 2, kind: input, shape index: {}]   ;;  %s574_s3 = inlined_call_operand.vmem [shape: bf16[128,128], index: 3, kind: input, shape index: {}]   ;;  %s575_s4 = inlined_call_operand.vmem [shape: f32[1,128], index: 4, kind: input, shape index: {}]   ;;  %s576_s5 = inlined_call_operand.vmem [shape: f32[1,128], index: 5, kind: input, shape index: {}]   ;;  %s577_s6 = inlined_call_operand.vmem [shape: bf16[128,128], index: 6, kind: output, shape index: {}]  }
   0x1   :  { %v252_v0 = vld [vmem:[%s571_s0] sm:$0xff]   ;;  %v355_v12 = vld [vmem:[%s571_s0 + $0x8] sm:$0xff]   ;;  %v356_v22 = vld [vmem:[%s571_s0 + $0x10] sm:$0xff]  }
   0x2   :  { %v421_v1 = vld [vmem:[%s572_s1] ss:$0 sm:$0xff]  ;;  %v253_v2 = vunpack.c.l.bf16 %v252_v0  ;;  %v254_v3 = vunpack.c.h.bf16 %v252_v0  ;;  %v362_v13 = vld [vmem:[%s574_s3 + $0x8] sm:$0xff]   ;;  %v257_v16 = vunpack.c.l.bf16 %v355_v12  ;;  %v258_v17 = vunpack.c.h.bf16 %v355_v12  ;;  %v363_v35 = vld [vmem:[%s574_s3 + $0x10] sm:$0xff]  }
   0x3   :  { %v426_v4 = vld [vmem:[%s573_s2] ss:$0 sm:$0xff]  ;;  %v289_v20 = vunpack.c.l.bf16 %v362_v13  ;;  %v290_v21 = vunpack.c.h.bf16 %v362_v13  ;;  %v261_v33 = vunpack.c.l.bf16 %v356_v22  ;;  %v262_v34 = vunpack.c.h.bf16 %v356_v22  ;;  %v357_v44 = vld [vmem:[%s571_s0 + $0x18] sm:$0xff]  }
   0x4   :  { %v284_v5 = vld [vmem:[%s574_s3] sm:$0xff]   ;;  %v59_v9 = vmul.f32 %v421_v1, %v253_v2  ;;  %v60_v10 = vmul.f32 %v421_v1, %v254_v3  ;;  %v61_v25 = vmul.f32 %v421_v1, %v257_v16  ;;  %v62_v26 = vmul.f32 %v421_v1, %v258_v17  ;;  %v364_v57 = vld [vmem:[%s574_s3 + $0x18] sm:$0xff]  }
   0x5   :  { %v285_v6 = vunpack.c.l.bf16 %v284_v5  ;;  %v286_v7 = vunpack.c.h.bf16 %v284_v5  ;;  %v434_v8 = vld [vmem:[%s575_s4] ss:$0 sm:$0xff]  ;;  %v63_v42 = vmul.f32 %v421_v1, %v261_v33  ;;  %v64_v43 = vmul.f32 %v421_v1, %v262_v34  ;;  %v366_v33 = vld [vmem:[%s574_s3 + $0x28] sm:$0xff]  }
   0x6   :  { %v441_v11 = vld [vmem:[%s576_s5] ss:$0 sm:$0xff]  ;;  %v79_v18 = vadd.f32 %v426_v4, %v59_v9  ;;  %v80_v19 = vadd.f32 %v426_v4, %v60_v10  ;;  %v149_v29 = vmul.f32 %v434_v8, %v289_v20  ;;  %v150_v30 = vmul.f32 %v434_v8, %v290_v21 }
   0x7   :  { %v147_v14 = vmul.f32 %v434_v8, %v285_v6  ;;  %v148_v15 = vmul.f32 %v434_v8, %v286_v7  ;;  %v81_v31 = vadd.f32 %v426_v4, %v61_v25  ;;  %v82_v32 = vadd.f32 %v426_v4, %v62_v26  ;;  %v358_v58 = vld [vmem:[%s571_s0 + $0x20] sm:$0xff]  }
   0x8   :  { %v95_v27 = vmax.f32 %v79_v18, 0.0  ;;  %v96_v28 = vmax.f32 %v80_v19, 0.0  ;;  %v169_v38 = vadd.f32 %v441_v11, %v149_v29  ;;  %v170_v39 = vadd.f32 %v441_v11, %v150_v30  ;;  %v365_v19 = vld [vmem:[%s574_s3 + $0x20] sm:$0xff]  }
   0x9   :  { %v167_v23 = vadd.f32 %v441_v11, %v147_v14  ;;  %v168_v24 = vadd.f32 %v441_v11, %v148_v15  ;;  %v97_v40 = vmax.f32 %v81_v31, 0.0  ;;  %v98_v41 = vmax.f32 %v82_v32, 0.0 }
   0xa   :  { %v293_v47 = vunpack.c.l.bf16 %v363_v35  ;;  %v294_v48 = vunpack.c.h.bf16 %v363_v35  ;;  %v83_v51 = vadd.f32 %v426_v4, %v63_v42  ;;  %v84_v52 = vadd.f32 %v426_v4, %v64_v43  ;;  %v360_v42 = vld [vmem:[%s571_s0 + $0x30] sm:$0xff]  }
   0xb   :  { %v183_v36 = vadd.f32 %v167_v23, %v95_v27  ;;  %v184_v37 = vadd.f32 %v168_v24, %v96_v28  ;;  %v185_v49 = vadd.f32 %v169_v38, %v97_v40  ;;  %v186_v50 = vadd.f32 %v170_v39, %v98_v41  ;;  %v359_v24 = vld [vmem:[%s571_s0 + $0x28] sm:$0xff]  }
   0xc   :  { %v151_v54 = vmul.f32 %v434_v8, %v293_v47  ;;  %v152_v55 = vmul.f32 %v434_v8, %v294_v48  ;;  %v265_v56 = vunpack.c.l.bf16 %v357_v44  ;;  %v99_v61 = vmax.f32 %v83_v51, 0.0 }
   0xd   :  { %v199_v45 = vmax.f32 %v183_v36, 0.0  ;;  %v200_v46 = vmax.f32 %v184_v37, 0.0  ;;  %v201_v59 = vmax.f32 %v185_v49, 0.0  ;;  %v202_v60 = vmax.f32 %v186_v50, 0.0 }
   0xe   :  { %v100_v62 = vmax.f32 %v84_v52, 0.0  ;;  %v171_v63 = vadd.f32 %v441_v11, %v151_v54  ;;  %v172_v0 = vadd.f32 %v441_v11, %v152_v55  ;;  %v266_v2 = vunpack.c.h.bf16 %v357_v44 }
   0xf   :  { %v318_v53 = vpack.c.bf16 %v200_v46, %v199_v45  ;;  %v65_v3 = vmul.f32 %v421_v1, %v265_v56  ;;  %v323_v5 = vpack.c.bf16 %v202_v60, %v201_v59  ;;  %v297_v6 = vunpack.c.l.bf16 %v364_v57  ;;  %v367_v59 = vld [vmem:[%s574_s3 + $0x30] sm:$0xff]  }
  0x10   :  { %v298_v7 = vunpack.c.h.bf16 %v364_v57  ;;  %v269_v9 = vunpack.c.l.bf16 %v358_v58  ;;  %v187_v10 = vadd.f32 %v171_v63, %v99_v61  ;;  %v188_v12 = vadd.f32 %v172_v0, %v100_v62  ;;  %v361_v0 = vld [vmem:[%s571_s0 + $0x38] sm:$0xff]  }
  0x11   :  { %319 = vst [vmem:[%s577_s6] sm:$0xff] %v318_v53   ;;  %v66_v13 = vmul.f32 %v421_v1, %v266_v2  ;;  %v85_v14 = vadd.f32 %v426_v4, %v65_v3  ;;  %v153_v15 = vmul.f32 %v434_v8, %v297_v6  ;;  %v270_v17 = vunpack.c.h.bf16 %v358_v58 }
  0x12   :  { %369 = vst [vmem:[%s577_s6 + $0x8] sm:$0xff] %v323_v5   ;;  %v154_v16 = vmul.f32 %v434_v8, %v298_v7  ;;  %v67_v18 = vmul.f32 %v421_v1, %v269_v9  ;;  %v203_v20 = vmax.f32 %v187_v10, 0.0  ;;  %v204_v21 = vmax.f32 %v188_v12, 0.0 }
  0x13   :  { %v86_v22 = vadd.f32 %v426_v4, %v66_v13  ;;  %v101_v23 = vmax.f32 %v85_v14, 0.0  ;;  %v173_v25 = vadd.f32 %v441_v11, %v153_v15  ;;  %v68_v27 = vmul.f32 %v421_v1, %v270_v17  ;;  %v368_v17 = vld [vmem:[%s574_s3 + $0x38] sm:$0xff]  }
  0x14   :  { %v174_v26 = vadd.f32 %v441_v11, %v154_v16  ;;  %v87_v28 = vadd.f32 %v426_v4, %v67_v18  ;;  %v328_v29 = vpack.c.bf16 %v204_v21, %v203_v20  ;;  %v301_v31 = vunpack.c.l.bf16 %v365_v19 }
  0x15   :  { %v102_v30 = vmax.f32 %v86_v22, 0.0  ;;  %v302_v32 = vunpack.c.h.bf16 %v365_v19  ;;  %v189_v34 = vadd.f32 %v173_v25, %v101_v23  ;;  %v88_v35 = vadd.f32 %v426_v4, %v68_v27 }
  0x16   :  { %v103_v36 = vmax.f32 %v87_v28, 0.0  ;;  %v273_v37 = vunpack.c.l.bf16 %v359_v24  ;;  %370 = vst [vmem:[%s577_s6 + $0x10] sm:$0xff] %v328_v29   ;;  %v155_v39 = vmul.f32 %v434_v8, %v301_v31  ;;  %v274_v41 = vunpack.c.h.bf16 %v359_v24 }
  0x17   :  { %v190_v38 = vadd.f32 %v174_v26, %v102_v30  ;;  %v156_v40 = vmul.f32 %v434_v8, %v302_v32  ;;  %v205_v43 = vmax.f32 %v189_v34, 0.0  ;;  %v104_v44 = vmax.f32 %v88_v35, 0.0 }
  0x18   :  { %v69_v45 = vmul.f32 %v421_v1, %v273_v37  ;;  %v305_v46 = vunpack.c.l.bf16 %v366_v33  ;;  %v175_v48 = vadd.f32 %v441_v11, %v155_v39  ;;  %v70_v50 = vmul.f32 %v421_v1, %v274_v41 }
  0x19   :  { %v206_v47 = vmax.f32 %v190_v38, 0.0  ;;  %v176_v49 = vadd.f32 %v441_v11, %v156_v40  ;;  %v306_v52 = vunpack.c.h.bf16 %v366_v33  ;;  %v277_v54 = vunpack.c.l.bf16 %v360_v42 }
  0x1a   :  { %v89_v51 = vadd.f32 %v426_v4, %v69_v45  ;;  %v157_v53 = vmul.f32 %v434_v8, %v305_v46  ;;  %v191_v56 = vadd.f32 %v175_v48, %v103_v36  ;;  %v90_v58 = vadd.f32 %v426_v4, %v70_v50 }
  0x1b   :  { %v333_v55 = vpack.c.bf16 %v206_v47, %v205_v43  ;;  %v192_v57 = vadd.f32 %v176_v49, %v104_v44  ;;  %v158_v61 = vmul.f32 %v434_v8, %v306_v52  ;;  %v278_v63 = vunpack.c.h.bf16 %v360_v42 }
  0x1c   :  { %v105_v60 = vmax.f32 %v89_v51, 0.0  ;;  %v177_v62 = vadd.f32 %v441_v11, %v157_v53  ;;  %v207_v2 = vmax.f32 %v191_v56, 0.0  ;;  %v106_v5 = vmax.f32 %v90_v58, 0.0 }
  0x1d   :  { %371 = vst [vmem:[%s577_s6 + $0x18] sm:$0xff] %v333_v55   ;;  %v208_v3 = vmax.f32 %v192_v57, 0.0  ;;  %v71_v6 = vmul.f32 %v421_v1, %v277_v54  ;;  %v178_v7 = vadd.f32 %v441_v11, %v158_v61  ;;  %v72_v10 = vmul.f32 %v421_v1, %v278_v63 }
  0x1e   :  { %v193_v9 = vadd.f32 %v177_v62, %v105_v60  ;;  %v309_v12 = vunpack.c.l.bf16 %v367_v59  ;;  %v310_v15 = vunpack.c.h.bf16 %v367_v59  ;;  %v281_v16 = vunpack.c.l.bf16 %v361_v0 }
  0x1f   :  { %v338_v13 = vpack.c.bf16 %v208_v3, %v207_v2  ;;  %v91_v14 = vadd.f32 %v426_v4, %v71_v6  ;;  %v194_v18 = vadd.f32 %v178_v7, %v106_v5  ;;  %v92_v20 = vadd.f32 %v426_v4, %v72_v10 }
  0x20   :  { %v209_v19 = vmax.f32 %v193_v9, 0.0  ;;  %v159_v21 = vmul.f32 %v434_v8, %v309_v12  ;;  %v160_v23 = vmul.f32 %v434_v8, %v310_v15  ;;  %v282_v24 = vunpack.c.h.bf16 %v361_v0 }
  0x21   :  { %372 = vst [vmem:[%s577_s6 + $0x20] sm:$0xff] %v338_v13   ;;  %v107_v22 = vmax.f32 %v91_v14, 0.0  ;;  %v73_v25 = vmul.f32 %v421_v1, %v281_v16  ;;  %v210_v26 = vmax.f32 %v194_v18, 0.0  ;;  %v108_v27 = vmax.f32 %v92_v20, 0.0 }
  0x22   :  { %v179_v28 = vadd.f32 %v441_v11, %v159_v21  ;;  %v313_v29 = vunpack.c.l.bf16 %v368_v17  ;;  %v180_v30 = vadd.f32 %v441_v11, %v160_v23  ;;  %v74_v31 = vmul.f32 %v421_v1, %v282_v24 }
  0x23   :  { %v93_v32 = vadd.f32 %v426_v4, %v73_v25  ;;  %v314_v33 = vunpack.c.h.bf16 %v368_v17  ;;  %v343_v34 = vpack.c.bf16 %v210_v26, %v209_v19 }
  0x24   :  { %v195_v35 = vadd.f32 %v179_v28, %v107_v22  ;;  %v161_v36 = vmul.f32 %v434_v8, %v313_v29  ;;  %v196_v37 = vadd.f32 %v180_v30, %v108_v27  ;;  %v94_v38 = vadd.f32 %v426_v4, %v74_v31 }
  0x25   :  { %v109_v39 = vmax.f32 %v93_v32, 0.0  ;;  %v162_v40 = vmul.f32 %v434_v8, %v314_v33  ;;  %373 = vst [vmem:[%s577_s6 + $0x28] sm:$0xff] %v343_v34  }
  0x26   :  { %v211_v41 = vmax.f32 %v195_v35, 0.0  ;;  %v181_v1 = vadd.f32 %v441_v11, %v161_v36  ;;  %v212_v42 = vmax.f32 %v196_v37, 0.0  ;;  %v110_v43 = vmax.f32 %v94_v38, 0.0 }
  0x27   :  { %v182_v44 = vadd.f32 %v441_v11, %v162_v40 }
  0x28   :  { %v197_v45 = vadd.f32 %v181_v1, %v109_v39  ;;  %v348_v46 = vpack.c.bf16 %v212_v42, %v211_v41 }
  0x29   :  { %v198_v47 = vadd.f32 %v182_v44, %v110_v43 }
  0x2a   :  { %v213_v48 = vmax.f32 %v197_v45, 0.0  ;;  %374 = vst [vmem:[%s577_s6 + $0x30] sm:$0xff] %v348_v46  }
  0x2b   :  { %v214_v4 = vmax.f32 %v198_v47, 0.0 }
  0x2d   :  { %v353_v8 = vpack.c.bf16 %v214_v4, %v213_v48 }
  0x2f   :  { %375 = vst [vmem:[%s577_s6 + $0x38] sm:$0xff] %v353_v8  }

// kernel: forward.17
= control target key start
LH: loop header
LB: loop body
LE: loop exit
PB: predicated region body
PF: predicated region fallthrough
CT: control target
= control target key end

     0   :  { %s497_s0 = inlined_call_operand.vmem [shape: bf16[128,128], index: 0, kind: input, shape index: {}]   ;;  %s498_s1 = inlined_call_operand.vmem [shape: f32[1,128], index: 1, kind: input, shape index: {}]   ;;  %s499_s2 = inlined_call_operand.vmem [shape: f32[1,128], index: 2, kind: input, shape index: {}]   ;;  %s500_s3 = inlined_call_operand.vmem [shape: bf16[128,128], index: 3, kind: input, shape index: {}]   ;;  %s501_s4 = inlined_call_operand.hbm [shape: bf16[128,128], index: 4, kind: output, shape index: {}]  }
   0x1   :  { %v221_v0 = vld [vmem:[%s497_s0] sm:$0xff]   ;;  %v324_v8 = vld [vmem:[%s497_s0 + $0x8] sm:$0xff]   ;;  %v325_v10 = vld [vmem:[%s497_s0 + $0x10] sm:$0xff]  }
   0x2   :  { %v410_v1 = vld [vmem:[%s498_s1] ss:$0 sm:$0xff]  ;;  %v222_v2 = vunpack.c.l.bf16 %v221_v0  ;;  %v223_v3 = vunpack.c.h.bf16 %v221_v0  ;;  %v331_v9 = vld [vmem:[%s500_s3 + $0x8] sm:$0xff]   ;;  %v226_v13 = vunpack.c.l.bf16 %v324_v8  ;;  %v227_v14 = vunpack.c.h.bf16 %v324_v8  ;;  %v332_v15 = vld [vmem:[%s500_s3 + $0x10] sm:$0xff]  }
   0x3   :  { %v415_v4 = vld [vmem:[%s499_s2] ss:$0 sm:$0xff]  ;;  %v258_v16 = vunpack.c.l.bf16 %v331_v9  ;;  %v259_v17 = vunpack.c.h.bf16 %v331_v9  ;;  %v230_v18 = vunpack.c.l.bf16 %v325_v10  ;;  %v231_v19 = vunpack.c.h.bf16 %v325_v10  ;;  %v326_v24 = vld [vmem:[%s497_s0 + $0x18] sm:$0xff]  }
   0x4   :  { %v253_v5 = vld [vmem:[%s500_s3] sm:$0xff]   ;;  %v54_v11 = vmul.f32 %v410_v1, %v222_v2  ;;  %v55_v12 = vmul.f32 %v410_v1, %v223_v3  ;;  %v56_v22 = vmul.f32 %v410_v1, %v226_v13  ;;  %v57_v23 = vmul.f32 %v410_v1, %v227_v14 }
   0x5   :  { %v254_v6 = vunpack.c.l.bf16 %v253_v5  ;;  %v255_v7 = vunpack.c.h.bf16 %v253_v5  ;;  %v58_v25 = vmul.f32 %v410_v1, %v230_v18  ;;  %v59_v26 = vmul.f32 %v410_v1, %v231_v19 }
   0x6   :  { %v74_v20 = vadd.f32 %v415_v4, %v54_v11  ;;  %v75_v21 = vadd.f32 %v415_v4, %v55_v12  ;;  %v262_v27 = vunpack.c.l.bf16 %v332_v15  ;;  %v263_v28 = vunpack.c.h.bf16 %v332_v15 }
   0x7   :  { %9 = vsyncpa [#allocation3], 0  ;;  %v76_v31 = vadd.f32 %v415_v4, %v56_v22  ;;  %v77_v32 = vadd.f32 %v415_v4, %v57_v23  ;;  %v78_v33 = vadd.f32 %v415_v4, %v58_v25  ;;  %v79_v34 = vadd.f32 %v415_v4, %v59_v26  ;;  %v333_v45 = vld [vmem:[%s500_s3 + $0x18] sm:$0xff]   ;;  %v327_v54 = vld [vmem:[%s497_s0 + $0x20] sm:$0xff]   ;;  %s208_s25 = sshll.u32 %s501_s4, 4  ;;  %s377_s1 = smov 64   ;;  %s209_s25 = int_to_ptr.hbm [resolvable:$true] %s208_s25 }
   0x8   :  { %v90_v29 = vmax.f32 %v74_v20, 0.0  ;;  %v91_v30 = vmax.f32 %v75_v21, 0.0  ;;  %v234_v35 = vunpack.c.l.bf16 %v326_v24  ;;  %v235_v36 = vunpack.c.h.bf16 %v326_v24  ;;  %v334_v59 = vld [vmem:[%s500_s3 + $0x20] sm:$0xff]   ;;  %v328_v0 = vld [vmem:[%s497_s0 + $0x28] sm:$0xff]   ;;  %s378_s26 = smov 4  }
   0x9   :  { %v92_v39 = vmax.f32 %v76_v31, 0.0  ;;  %v93_v40 = vmax.f32 %v77_v32, 0.0  ;;  %v94_v41 = vmax.f32 %v78_v33, 0.0  ;;  %v95_v42 = vmax.f32 %v79_v34, 0.0 }
   0xa   :  { %v138_v37 = vadd.f32 %v254_v6, %v90_v29  ;;  %v139_v38 = vadd.f32 %v255_v7, %v91_v30  ;;  %v60_v43 = vmul.f32 %v410_v1, %v234_v35  ;;  %v61_v44 = vmul.f32 %v410_v1, %v235_v36  ;;  %v335_v7 = vld [vmem:[%s500_s3 + $0x28] sm:$0xff]   ;;  %v330_v30 = vld [vmem:[%s497_s0 + $0x38] sm:$0xff]  }
   0xb   :  { %v140_v48 = vadd.f32 %v258_v16, %v92_v39  ;;  %v141_v49 = vadd.f32 %v259_v17, %v93_v40  ;;  %v142_v50 = vadd.f32 %v262_v27, %v94_v41  ;;  %v143_v51 = vadd.f32 %v263_v28, %v95_v42  ;;  %v329_v16 = vld [vmem:[%s497_s0 + $0x30] sm:$0xff]  }
   0xc   :  { %v154_v46 = vmax.f32 %v138_v37, 0.0  ;;  %v155_v47 = vmax.f32 %v139_v38, 0.0  ;;  %v80_v52 = vadd.f32 %v415_v4, %v60_v43  ;;  %v81_v53 = vadd.f32 %v415_v4, %v61_v44  ;;  %v336_v17 = vld [vmem:[%s500_s3 + $0x30] sm:$0xff]  }
   0xd   :  { %v156_v56 = vmax.f32 %v140_v48, 0.0  ;;  %v157_v57 = vmax.f32 %v141_v49, 0.0  ;;  %v266_v58 = vunpack.c.l.bf16 %v333_v45  ;;  %v158_v60 = vmax.f32 %v142_v50, 0.0 }
   0xe   :  { %v287_v55 = vpack.c.bf16 %v155_v47, %v154_v46  ;;  %v159_v61 = vmax.f32 %v143_v51, 0.0  ;;  %v96_v62 = vmax.f32 %v80_v52, 0.0  ;;  %v97_v63 = vmax.f32 %v81_v53, 0.0  ;;  %v337_v47 = vld [vmem:[%s500_s3 + $0x38] sm:$0xff]   ;;  %s376_s3 = smov [#allocation2]  }
   0xf   :  { %v292_v2 = vpack.c.bf16 %v157_v57, %v156_v56  ;;  %v267_v3 = vunpack.c.h.bf16 %v333_v45  ;;  %v238_v5 = vunpack.c.l.bf16 %v327_v54  ;;  %v239_v6 = vunpack.c.h.bf16 %v327_v54  ;;  %s206_s22 = sshll.u32 %s376_s3, 4  ;;  %s207_s22 = int_to_ptr.vmem [resolvable:$true] %s206_s22 }
  0x10   :  { %288 = vst [vmem:[#allocation2] sm:$0xff] %v287_v55   ;;  %v297_v8 = vpack.c.bf16 %v159_v61, %v158_v60  ;;  %v144_v9 = vadd.f32 %v266_v58, %v96_v62  ;;  %v270_v10 = vunpack.c.l.bf16 %v334_v59  ;;  %v271_v11 = vunpack.c.h.bf16 %v334_v59 }
  0x11   :  { %338 = vst [vmem:[#allocation2 + $0x8] sm:$0xff] %v292_v2   ;;  %v145_v12 = vadd.f32 %v267_v3, %v97_v63  ;;  %v62_v13 = vmul.f32 %v410_v1, %v238_v5  ;;  %v63_v14 = vmul.f32 %v410_v1, %v239_v6  ;;  %v242_v15 = vunpack.c.l.bf16 %v328_v0 }
  0x12   :  { %339 = vst [vmem:[#allocation2 + $0x10] sm:$0xff] %v297_v8   ;;  %v160_v18 = vmax.f32 %v144_v9, 0.0  ;;  %v243_v19 = vunpack.c.h.bf16 %v328_v0  ;;  %v274_v20 = vunpack.c.l.bf16 %v335_v7  ;;  %v275_v21 = vunpack.c.h.bf16 %v335_v7 }
  0x13   :  { %v161_v22 = vmax.f32 %v145_v12, 0.0  ;;  %v82_v23 = vadd.f32 %v415_v4, %v62_v13  ;;  %v83_v24 = vadd.f32 %v415_v4, %v63_v14  ;;  %v64_v25 = vmul.f32 %v410_v1, %v242_v15 }
  0x14   :  { %v65_v26 = vmul.f32 %v410_v1, %v243_v19  ;;  %v246_v27 = vunpack.c.l.bf16 %v329_v16  ;;  %v247_v28 = vunpack.c.h.bf16 %v329_v16  ;;  %v278_v29 = vunpack.c.l.bf16 %v336_v17 }
  0x15   :  { %v302_v31 = vpack.c.bf16 %v161_v22, %v160_v18  ;;  %v98_v32 = vmax.f32 %v82_v23, 0.0  ;;  %v99_v33 = vmax.f32 %v83_v24, 0.0  ;;  %v84_v34 = vadd.f32 %v415_v4, %v64_v25 }
  0x16   :  { %v85_v35 = vadd.f32 %v415_v4, %v65_v26  ;;  %v66_v36 = vmul.f32 %v410_v1, %v246_v27  ;;  %v67_v37 = vmul.f32 %v410_v1, %v247_v28  ;;  %v279_v38 = vunpack.c.h.bf16 %v336_v17 }
  0x17   :  { %340 = vst [vmem:[#allocation2 + $0x18] sm:$0xff] %v302_v31   ;;  %v146_v39 = vadd.f32 %v270_v10, %v98_v32  ;;  %v147_v40 = vadd.f32 %v271_v11, %v99_v33  ;;  %v100_v41 = vmax.f32 %v84_v34, 0.0  ;;  %v250_v42 = vunpack.c.l.bf16 %v330_v30 }
  0x18   :  { %v101_v43 = vmax.f32 %v85_v35, 0.0  ;;  %v86_v44 = vadd.f32 %v415_v4, %v66_v36  ;;  %v87_v45 = vadd.f32 %v415_v4, %v67_v37  ;;  %v251_v46 = vunpack.c.h.bf16 %v330_v30 }
  0x19   :  { %v162_v48 = vmax.f32 %v146_v39, 0.0  ;;  %v163_v49 = vmax.f32 %v147_v40, 0.0  ;;  %v148_v50 = vadd.f32 %v274_v20, %v100_v41  ;;  %v68_v51 = vmul.f32 %v410_v1, %v250_v42 }
  0x1a   :  { %v149_v52 = vadd.f32 %v275_v21, %v101_v43  ;;  %v102_v53 = vmax.f32 %v86_v44, 0.0  ;;  %v103_v54 = vmax.f32 %v87_v45, 0.0  ;;  %v69_v55 = vmul.f32 %v410_v1, %v251_v46 }
  0x1b   :  { %v307_v56 = vpack.c.bf16 %v163_v49, %v162_v48  ;;  %v164_v57 = vmax.f32 %v148_v50, 0.0  ;;  %v88_v58 = vadd.f32 %v415_v4, %v68_v51  ;;  %v282_v59 = vunpack.c.l.bf16 %v337_v47 }
  0x1c   :  { %v165_v60 = vmax.f32 %v149_v52, 0.0  ;;  %v150_v61 = vadd.f32 %v278_v29, %v102_v53  ;;  %v151_v62 = vadd.f32 %v279_v38, %v103_v54  ;;  %v89_v63 = vadd.f32 %v415_v4, %v69_v55 }
  0x1d   :  { %341 = vst [vmem:[#allocation2 + $0x20] sm:$0xff] %v307_v56   ;;  %v104_v0 = vmax.f32 %v88_v58, 0.0  ;;  %v283_v2 = vunpack.c.h.bf16 %v337_v47 }
  0x1e   :  { %v312_v3 = vpack.c.bf16 %v165_v60, %v164_v57  ;;  %v166_v5 = vmax.f32 %v150_v61, 0.0  ;;  %v167_v6 = vmax.f32 %v151_v62, 0.0  ;;  %v105_v7 = vmax.f32 %v89_v63, 0.0 }
  0x1f   :  { %v152_v8 = vadd.f32 %v282_v59, %v104_v0 }
  0x20   :  { %342 = vst [vmem:[#allocation2 + $0x28] sm:$0xff] %v312_v3   ;;  %v317_v1 = vpack.c.bf16 %v167_v6, %v166_v5  ;;  %v153_v9 = vadd.f32 %v283_v2, %v105_v7 }
  0x21   :  { %v168_v10 = vmax.f32 %v152_v8, 0.0 }
  0x22   :  { %343 = vst [vmem:[#allocation2 + $0x30] sm:$0xff] %v317_v1   ;;  %v169_v4 = vmax.f32 %v153_v9, 0.0 }
  0x24   :  { %v322_v11 = vpack.c.bf16 %v169_v4, %v168_v10 }
  0x26   :  { %344 = vst [vmem:[#allocation2 + $0x38] sm:$0xff] %v322_v11  }
  0x27   :  { %214 = dma.vmem_to_hbm [thread:$0]  %s207_s22, 1024, %s209_s25, [#allocation3], %s377_s1, %s377_s1, %s378_s26  }
  0x28   :  { %374 = dma.done.wait [#allocation3], 1024  }
  0x29   :  { %375 = vsyncadd [#allocation3], 4294966272 }
  0x2a   :  { %219 = vsyncpa [#allocation3], 1 }

// kernel: forward.11
= control target key start
LH: loop header
LB: loop body
LE: loop exit
PB: predicated region body
PF: predicated region fallthrough
CT: control target
= control target key end

     0   :  { %s2656_s12 = smov 0   ;;  %s2658_s13 = smov 0   ;;  %s3171_s0 = inlined_call_operand.vmem [shape: bf16[2,1,10,16,128], index: 0, kind: input, shape index: {}]   ;;  %s3172_s1 = inlined_call_operand.vmem [shape: bf16[9,128,128], index: 1, kind: input, shape index: {}]   ;;  %s3173_s2 = inlined_call_operand.vmem [shape: bf16[2,8,8,128], index: 2, kind: output, shape index: {0}]   ;;  %s3174_s3 = inlined_call_operand.vmem [shape: f32[2,8,128], index: 3, kind: output, shape index: {1}]  }
   0x1   :  { %s2660_s14 = smov 0  }
   0x2 LB: > { %s33_s15 = sadd.s32 1, %s2630_s13  ;;  %p1892_p0 = scmp.ge.s32.totalorder %s2634_s14, 1  ;;  %s2634_s14 = sphi %s2660_s14, %s14_s14   ;;  %s2630_s13 = sphi %s2658_s13, %s3176_s13   ;;  %s2626_s12 = sphi %s2656_s12, %s3175_s12  }
   0x3   : > { %p35_p1 = scmp.ge.s32.totalorder %s33_s15, 2  ;;  %p176_p2 = scmp.lt.s32.totalorder %s2634_s14, 3 }
   0x5   : > { %s3178_s15 = smov (%p35_p1, %s33_s15), 0  ;;  %p177_p3 = pnand %p1892_p0, %p176_p2 }
   0x6   : > { %p221_p4 = scmp.lt.s32.totalorder (!%p177_p3), %s2626_s12, 1 }
   0x7   : > { %180 = sbr.rel (%p177_p3) target bundleno = 485 (0x1e5), region = 28 }
   0xc   : > { %v2467_v0 = vld [vmem:[%s3172_s1 + $0x78] sm:$0xff]  ;;  %v2466_v1 = vld [vmem:[%s3172_s1 + $0x70] sm:$0xff]  ;;  %v2465_v2 = vld [vmem:[%s3172_s1 + $0x68] sm:$0xff]  ;;  %s3180_s12 = smov (!%p221_p4, %s2626_s12), 1  ;;  %vm1712_vm2 = vcmask 1040384   ;;  %vm1714_vm3 = vcmask 1041408  }
   0xd   : > { %402 = vmatpush.bf16.msra.mxu0 %v2467_v0  ;;  %2563 = vmatpush.bf16.msra.mxu1 %v2467_v0  ;;  %v2464_v3 = vld [vmem:[%s3172_s1 + $0x60] sm:$0xff]  ;;  %v2463_v4 = vld [vmem:[%s3172_s1 + $0x58] sm:$0xff]  ;;  %v2462_v5 = vld [vmem:[%s3172_s1 + $0x50] sm:$0xff]  ;;  %s2587_s30 = smul.u32 80, %s3180_s12  ;;  %s1896_s7 = sshll.u32 %s3180_s12, 3 }
   0xe   : > { %2564 = vmatpush.bf16.msra.mxu2 %v2467_v0  ;;  %2565 = vmatpush.bf16.msra.mxu3 %v2467_v0  ;;  %v2461_v6 = vld [vmem:[%s3172_s1 + $0x48] sm:$0xff]  ;;  %v2460_v7 = vld [vmem:[%s3172_s1 + $0x40] sm:$0xff]  ;;  %v2491_v8 = vld [vmem:[%s3172_s1 + $0xf8] sm:$0xff]  ;;  %s252_s11 = scalar_lea.vmem %s3174_s3, %s1896_s7 }
   0xf   : > { %s2708_s8 = scalar_lea.vmem %s3171_s0, %s2587_s30  ;;  %v2459_v9 = vld [vmem:[%s3172_s1 + $0x38] sm:$0xff]  ;;  %v2490_v16 = vld [vmem:[%s3172_s1 + $0xf0] sm:$0xff]  ;;  %v2489_v20 = vld [vmem:[%s3172_s1 + $0xe8] sm:$0xff] }
  0x10   : > { %v2717_v10 = vld [vmem:[%s2708_s8] sm:$0xff]  ;;  %v2720_v11 = vld [vmem:[%s2708_s8 + $0x10] sm:$0xff]  ;;  %v2475_v14 = vld [vmem:[%s3172_s1 + $0xb8] sm:$0xff] }
  0x11   : > { %403 = vmatpush.bf16.msra.mxu0 %v2466_v1  ;;  %2566 = vmatpush.bf16.msra.mxu1 %v2466_v1  ;;  %v2723_v12 = vld [vmem:[%s2708_s8 + $0x20] sm:$0xff]  ;;  %v2726_v13 = vld [vmem:[%s2708_s8 + $0x30] sm:$0xff]  ;;  %v2499_v15 = vld [vmem:[%s3172_s1 + $0x138] sm:$0xff] }
  0x12   : > { %2567 = vmatpush.bf16.msra.mxu2 %v2466_v1  ;;  %2568 = vmatpush.bf16.msra.mxu3 %v2466_v1  ;;  %v2458_v17 = vld [vmem:[%s3172_s1 + $0x30] sm:$0xff]  ;;  %v2457_v21 = vld [vmem:[%s3172_s1 + $0x28] sm:$0xff]  ;;  %v2488_v24 = vld [vmem:[%s3172_s1 + $0xe0] sm:$0xff] }
  0x13   : > { %v2474_v18 = vld [vmem:[%s3172_s1 + $0xb0] sm:$0xff]  ;;  %v2473_v22 = vld [vmem:[%s3172_s1 + $0xa8] sm:$0xff]  ;;  %v2456_v25 = vld [vmem:[%s3172_s1 + $0x20] sm:$0xff] }
  0x14   : > { %v2498_v19 = vld [vmem:[%s3172_s1 + $0x130] sm:$0xff]  ;;  %v2497_v23 = vld [vmem:[%s3172_s1 + $0x128] sm:$0xff]  ;;  %v2472_v26 = vld [vmem:[%s3172_s1 + $0xa0] sm:$0xff] }
  0x15   : > { %404 = vmatpush.bf16.msra.mxu0 %v2465_v2  ;;  %2569 = vmatpush.bf16.msra.mxu1 %v2465_v2  ;;  %v2496_v27 = vld [vmem:[%s3172_s1 + $0x120] sm:$0xff]  ;;  %v2487_v28 = vld [vmem:[%s3172_s1 + $0xd8] sm:$0xff]  ;;  %v2781_v30 = vld [vmem:[%s2708_s8 + $0x8] sm:$0xff] }
  0x16   : > { %2570 = vmatpush.bf16.msra.mxu2 %v2465_v2  ;;  %2571 = vmatpush.bf16.msra.mxu3 %v2465_v2  ;;  %v2455_v29 = vld [vmem:[%s3172_s1 + $0x18] sm:$0xff]  ;;  %v2787_v32 = vld [vmem:[%s2708_s8 + $0x28] sm:$0xff]  ;;  %v2486_v36 = vld [vmem:[%s3172_s1 + $0xd0] sm:$0xff] }
  0x17   : > { %v2784_v31 = vld [vmem:[%s2708_s8 + $0x18] sm:$0xff]  ;;  %v2454_v37 = vld [vmem:[%s3172_s1 + $0x10] sm:$0xff]  ;;  %v2485_v40 = vld [vmem:[%s3172_s1 + $0xc8] sm:$0xff] }
  0x18   : > { %v2790_v33 = vld [vmem:[%s2708_s8 + $0x38] sm:$0xff]  ;;  %v2470_v38 = vld [vmem:[%s3172_s1 + $0x90] sm:$0xff]  ;;  %v2453_v41 = vld [vmem:[%s3172_s1 + $0x8] sm:$0xff] }
  0x19   : > { %405 = vmatpush.bf16.msra.mxu0 %v2464_v3  ;;  %2572 = vmatpush.bf16.msra.mxu1 %v2464_v3  ;;  %v2471_v34 = vld [vmem:[%s3172_s1 + $0x98] sm:$0xff]  ;;  %v2494_v39 = vld [vmem:[%s3172_s1 + $0x110] sm:$0xff]  ;;  %v2469_v42 = vld [vmem:[%s3172_s1 + $0x88] sm:$0xff] }
  0x1a   : > { %2573 = vmatpush.bf16.msra.mxu2 %v2464_v3  ;;  %2574 = vmatpush.bf16.msra.mxu3 %v2464_v3  ;;  %v2495_v35 = vld [vmem:[%s3172_s1 + $0x118] sm:$0xff]  ;;  %v2493_v43 = vld [vmem:[%s3172_s1 + $0x108] sm:$0xff]  ;;  %v2484_v44 = vld [vmem:[%s3172_s1 + $0xc0] sm:$0xff] }
  0x1b   : > { %v2452_v45 = vld [vmem:[%s3172_s1] sm:$0xff]  ;;  %v2531_v46 = vld [vmem:[%s3172_s1 + $0x1f8] sm:$0xff]  ;;  %v2530_v52 = vld [vmem:[%s3172_s1 + $0x1f0] sm:$0xff] }
  0x1c   : > { %v2507_v47 = vld [vmem:[%s3172_s1 + $0x178] sm:$0xff]  ;;  %v2468_v48 = vld [vmem:[%s3172_s1 + $0x80] sm:$0xff]  ;;  %v2854_v53 = vld [vmem:[%s2708_s8 + $0x8] sm:$0xff] }
  0x1d   : > { %406 = vmatpush.bf16.msra.mxu0 %v2463_v4  ;;  %2575 = vmatpush.bf16.msra.mxu1 %v2463_v4  ;;  %v2492_v49 = vld [vmem:[%s3172_s1 + $0x100] sm:$0xff]  ;;  %v2539_v50 = vld [vmem:[%s3172_s1 + $0x238] sm:$0xff]  ;;  %v2506_v54 = vld [vmem:[%s3172_s1 + $0x170] sm:$0xff] }
  0x1e   : > { %2576 = vmatpush.bf16.msra.mxu2 %v2463_v4  ;;  %2577 = vmatpush.bf16.msra.mxu3 %v2463_v4  ;;  %v2523_v51 = vld [vmem:[%s3172_s1 + $0x1b8] sm:$0xff]  ;;  %v2538_v55 = vld [vmem:[%s3172_s1 + $0x230] sm:$0xff]  ;;  %v2529_v57 = vld [vmem:[%s3172_s1 + $0x1e8] sm:$0xff] }
  0x1f   : > { %v2522_v56 = vld [vmem:[%s3172_s1 + $0x1b0] sm:$0xff]  ;;  %v2505_v58 = vld [vmem:[%s3172_s1 + $0x168] sm:$0xff]  ;;  %v2528_v62 = vld [vmem:[%s3172_s1 + $0x1e0] sm:$0xff] }
  0x20   : > { %v2537_v59 = vld [vmem:[%s3172_s1 + $0x228] sm:$0xff]  ;;  %v2882_v61 = vld [vmem:[%s2708_s8 + $0x10] sm:$0xff]  ;;  %v2504_v63 = vld [vmem:[%s3172_s1 + $0x160] sm:$0xff] }
  0x21   : > { %407 = vmatpush.bf16.msra.mxu0 %v2462_v5  ;;  %2578 = vmatpush.bf16.msra.mxu1 %v2462_v5  ;;  %v2521_v60 = vld [vmem:[%s3172_s1 + $0x1a8] sm:$0xff]  ;;  %v2536_v0 = vld [vmem:[%s3172_s1 + $0x220] sm:$0xff]  ;;  %v2901_v2 = vld [vmem:[%s2708_s8 + $0x18] sm:$0xff] }
  0x22   : > { %2579 = vmatpush.bf16.msra.mxu2 %v2462_v5  ;;  %2580 = vmatpush.bf16.msra.mxu3 %v2462_v5  ;;  %v2520_v1 = vld [vmem:[%s3172_s1 + $0x1a0] sm:$0xff]  ;;  %v2527_v3 = vld [vmem:[%s3172_s1 + $0x1d8] sm:$0xff] }
  0x23   : > { %v2503_v4 = vld [vmem:[%s3172_s1 + $0x158] sm:$0xff] }
  0x24   : > { %v2535_v5 = vld [vmem:[%s3172_s1 + $0x218] sm:$0xff] }
  0x25   : > { %408 = vmatpush.bf16.msra.mxu0 %v2461_v6  ;;  %2581 = vmatpush.bf16.msra.mxu1 %v2461_v6 }
  0x26   : > { %2582 = vmatpush.bf16.msra.mxu2 %v2461_v6  ;;  %2583 = vmatpush.bf16.msra.mxu3 %v2461_v6  ;;  %v2519_v6 = vld [vmem:[%s3172_s1 + $0x198] sm:$0xff] }
  0x29   : > { %409 = vmatpush.bf16.msra.mxu0 %v2460_v7  ;;  %2584 = vmatpush.bf16.msra.mxu1 %v2460_v7 }
  0x2a   : > { %2585 = vmatpush.bf16.msra.mxu2 %v2460_v7  ;;  %2586 = vmatpush.bf16.msra.mxu3 %v2460_v7  ;;  %v2920_v7 = vld [vmem:[%s2708_s8 + $0x20] sm:$0xff] }
  0x2c   : > { %410 = vmatmul.bf16.vlgmr.msra.gmra.mxu0 %v2717_v10  ;;  %420 = vmatmul.bf16.vlgmr.msra.gmra.mxu1 %v2720_v11 }
  0x2d   : > { %526 = vmatpush.bf16.msrb.mxu1 %v2459_v9  ;;  %430 = vmatmul.bf16.vlgmr.msra.gmra.mxu2 %v2723_v12  ;;  %v2502_v9 = vld [vmem:[%s3172_s1 + $0x150] sm:$0xff] }
  0x2e   : > { %847 = vmatpush.bf16.msrb.mxu3 %v2491_v8  ;;  %632 = vmatpush.bf16.msrb.mxu2 %v2475_v14  ;;  %v2526_v8 = vld [vmem:[%s3172_s1 + $0x1d0] sm:$0xff]  ;;  %v2939_v14 = vld [vmem:[%s2708_s8 + $0x28] sm:$0xff] }
  0x2f   : > { %440 = vmatmul.bf16.vlgmr.msra.gmra.mxu3 %v2726_v13  ;;  %961 = vmatpush.bf16.msrb.mxu0 %v2499_v15  ;;  %v2525_v15 = vld [vmem:[%s3172_s1 + $0x1c8] sm:$0xff] }
  0x31   : > { %527 = vmatpush.bf16.msrb.mxu1 %v2458_v17  ;;  %v2533_v17 = vld [vmem:[%s3172_s1 + $0x208] sm:$0xff] }
  0x32   : > { %848 = vmatpush.bf16.msrb.mxu3 %v2490_v16  ;;  %633 = vmatpush.bf16.msrb.mxu2 %v2474_v18  ;;  %v2501_v16 = vld [vmem:[%s3172_s1 + $0x148] sm:$0xff]  ;;  %v2958_v18 = vld [vmem:[%s2708_s8 + $0x30] sm:$0xff] }
  0x33   : > { %962 = vmatpush.bf16.msrb.mxu0 %v2498_v19  ;;  %v2524_v19 = vld [vmem:[%s3172_s1 + $0x1c0] sm:$0xff] }
  0x35   : > { %528 = vmatpush.bf16.msrb.mxu1 %v2457_v21  ;;  %v2532_v21 = vld [vmem:[%s3172_s1 + $0x200] sm:$0xff] }
  0x36   : > { %849 = vmatpush.bf16.msrb.mxu3 %v2489_v20  ;;  %634 = vmatpush.bf16.msrb.mxu2 %v2473_v22  ;;  %v2500_v20 = vld [vmem:[%s3172_s1 + $0x140] sm:$0xff] }
  0x37   : > { %963 = vmatpush.bf16.msrb.mxu0 %v2497_v23  ;;  %v2516_v22 = vld [vmem:[%s3172_s1 + $0x180] sm:$0xff] }
  0x39   : > { %529 = vmatpush.bf16.msrb.mxu1 %v2456_v25  ;;  %v2977_v25 = vld [vmem:[%s2708_s8 + $0x38] sm:$0xff] }
  0x3a   : > { %850 = vmatpush.bf16.msrb.mxu3 %v2488_v24  ;;  %635 = vmatpush.bf16.msrb.mxu2 %v2472_v26  ;;  %v467_v26 = vlaneseq }
  0x3b   : > { %964 = vmatpush.bf16.msrb.mxu0 %v2496_v27 }
  0x3c   : > { %415 = vmatmul.bf16.gmra.mxu0 %v2781_v30  ;;  %425 = vmatmul.bf16.gmra.mxu1 %v2784_v31  ;;  %v2982_v27 = vshrl.u32 %v467_v26, 7 }
  0x3d   : > { %530 = vmatpush.bf16.msrb.mxu1 %v2455_v29  ;;  %435 = vmatmul.bf16.gmra.mxu2 %v2787_v32 }
  0x3e   : > { %851 = vmatpush.bf16.msrb.mxu3 %v2487_v28  ;;  %636 = vmatpush.bf16.msrb.mxu2 %v2471_v34  ;;  %vm469_vm0 = vcmp.lt.s32.totalorder %v2982_v27, 7  ;;  %vm697_vm1 = vcmp.lt.s32.totalorder %v2982_v27, 6 }
  0x3f   : > { %445 = vmatmul.bf16.gmra.mxu3 %v2790_v33  ;;  %965 = vmatpush.bf16.msrb.mxu0 %v2495_v35 }
  0x41   : > { %531 = vmatpush.bf16.msrb.mxu1 %v2454_v37 }
  0x42   : > { %852 = vmatpush.bf16.msrb.mxu3 %v2486_v36  ;;  %637 = vmatpush.bf16.msrb.mxu2 %v2470_v38 }
  0x43   : > { %966 = vmatpush.bf16.msrb.mxu0 %v2494_v39 }
  0x45   : > { %532 = vmatpush.bf16.msrb.mxu1 %v2453_v41 }
  0x46   : > { %853 = vmatpush.bf16.msrb.mxu3 %v2485_v40  ;;  %638 = vmatpush.bf16.msrb.mxu2 %v2469_v42 }
  0x47   : > { %967 = vmatpush.bf16.msrb.mxu0 %v2493_v43 }
  0x49   : > { %533 = vmatpush.bf16.msrb.mxu1 %v2452_v45 }
  0x4a   : > { %854 = vmatpush.bf16.msrb.mxu3 %v2484_v44  ;;  %639 = vmatpush.bf16.msrb.mxu2 %v2468_v48 }
  0x4b   : > { %968 = vmatpush.bf16.msrb.mxu0 %v2492_v49 }
  0x4c   : > { %534 = vmatmul.bf16.vlgmr.msrb.gmra.mxu1 %v2717_v10 }
  0x4d   : > { %1107 = vmatpush.bf16.msra.mxu1 %v2507_v47  ;;  %640 = vmatmul.bf16.vlgmr.msrb.gmra.mxu2 %v2717_v10  ;;  %v2534_v10 = vld [vmem:[%s3172_s1 + $0x210] sm:$0xff] }
  0x4e   : > { %1435 = vmatpush.bf16.msra.mxu3 %v2531_v46  ;;  %1321 = vmatpush.bf16.msra.mxu2 %v2523_v51  ;;  %v2993_v46 = vld [vmem:[%s2708_s8 + $0x40] sm:$0xff] }
  0x4f   : > { %1581 = vmatpush.bf16.msra.mxu0 %v2539_v50  ;;  %855 = vmatmul.bf16.vlgmr.msrb.gmra.mxu3 %v2854_v53 }
  0x50   : > { %969 = vmatmul.bf16.vlgmr.msrb.gmra.mxu0 %v2854_v53 }
  0x51   : > { %1108 = vmatpush.bf16.msra.mxu1 %v2506_v54 }
  0x52   : > { %1436 = vmatpush.bf16.msra.mxu3 %v2530_v52  ;;  %1322 = vmatpush.bf16.msra.mxu2 %v2522_v56 }
  0x53   : > { %1582 = vmatpush.bf16.msra.mxu0 %v2538_v55 }
  0x55   : > { %1109 = vmatpush.bf16.msra.mxu1 %v2505_v58 }
  0x56   : > { %1437 = vmatpush.bf16.msra.mxu3 %v2529_v57  ;;  %1323 = vmatpush.bf16.msra.mxu2 %v2521_v60 }
  0x57   : > { %1583 = vmatpush.bf16.msra.mxu0 %v2537_v59 }
  0x59   : > { %1110 = vmatpush.bf16.msra.mxu1 %v2504_v63 }
  0x5a   : > { %1438 = vmatpush.bf16.msra.mxu3 %v2528_v62  ;;  %1324 = vmatpush.bf16.msra.mxu2 %v2520_v1 }
  0x5b   : > { %1584 = vmatpush.bf16.msra.mxu0 %v2536_v0 }
  0x5c   : > { %538 = vmatmul.bf16.gmra.mxu1 %v2781_v30 }
  0x5d   : > { %645 = vmatmul.bf16.gmra.mxu2 %v2781_v30  ;;  %1111 = vmatpush.bf16.msra.mxu1 %v2503_v4  ;;  %v2508_v4 = vld [vmem:[%s2708_s8 + $0x10] sm:$0xff] }
  0x5e   : > { %1439 = vmatpush.bf16.msra.mxu3 %v2527_v3  ;;  %1325 = vmatpush.bf16.msra.mxu2 %v2519_v6 }
  0x5f   : > { %859 = vmatmul.bf16.gmra.mxu3 %v2882_v61  ;;  %1585 = vmatpush.bf16.msra.mxu0 %v2535_v5 }
  0x60   : > { %974 = vmatmul.bf16.gmra.mxu0 %v2882_v61 }
  0x61   : > { %1112 = vmatpush.bf16.msra.mxu1 %v2502_v9 }
  0x62   : > { %1440 = vmatpush.bf16.msra.mxu3 %v2526_v8 }
  0x63   : > { %1586 = vmatpush.bf16.msra.mxu0 %v2534_v10 }
  0x65   : > { %1113 = vmatpush.bf16.msra.mxu1 %v2501_v16 }
  0x66   : > { %1441 = vmatpush.bf16.msra.mxu3 %v2525_v15 }
  0x67   : > { %1587 = vmatpush.bf16.msra.mxu0 %v2533_v17 }
  0x69   : > { %1114 = vmatpush.bf16.msra.mxu1 %v2500_v20 }
  0x6a   : > { %1442 = vmatpush.bf16.msra.mxu3 %v2524_v19 }
  0x6b   : > { %1588 = vmatpush.bf16.msra.mxu0 %v2532_v21 }
  0x6c   : > { %542 = vmatmul.bf16.gmra.mxu1 %v2720_v11 }
  0x6d   : > { %650 = vmatmul.bf16.gmra.mxu2 %v2720_v11  ;;  %v2518_v11 = vld [vmem:[%s3172_s1 + $0x190] sm:$0xff] }
  0x6e   : > { %1326 = vmatpush.bf16.msra.mxu2 %v2518_v11 }
  0x6f   : > { %863 = vmatmul.bf16.gmra.mxu3 %v2901_v2 }
  0x70   : > { %979 = vmatmul.bf16.gmra.mxu0 %v2901_v2 }
  0x7c   : > { %546 = vmatmul.bf16.gmra.mxu1 %v2784_v31 }
  0x7d   : > { %655 = vmatmul.bf16.gmra.mxu2 %v2784_v31 }
  0x7f   : > { %867 = vmatmul.bf16.gmra.mxu3 %v2920_v7 }
  0x80   : > { %984 = vmatmul.bf16.gmra.mxu0 %v2920_v7 }
  0x8c   : > { %550 = vmatmul.bf16.gmra.mxu1 %v2723_v12 }
  0x8d   : > { %660 = vmatmul.bf16.gmra.mxu2 %v2723_v12  ;;  %v2517_v12 = vld [vmem:[%s3172_s1 + $0x188] sm:$0xff] }
  0x8e   : > { %1327 = vmatpush.bf16.msra.mxu2 %v2517_v12 }
  0x8f   : > { %871 = vmatmul.bf16.gmra.mxu3 %v2939_v14 }
  0x90   : > { %989 = vmatmul.bf16.gmra.mxu0 %v2939_v14 }
  0x92   : > { %1328 = vmatpush.bf16.msra.mxu2 %v2516_v22 }
  0x9c   : > { %554 = vmatmul.bf16.gmra.mxu1 %v2787_v32 }
  0x9d   : > { %665 = vmatmul.bf16.gmra.mxu2 %v2787_v32 }
  0x9f   : > { %875 = vmatmul.bf16.gmra.mxu3 %v2958_v18 }
  0xa0   : > { %994 = vmatmul.bf16.gmra.mxu0 %v2958_v18 }
  0xa9   : > { %v411_v23 = vpop.f32.mrf.mxu0  ;;  %v421_v24 = vpop.f32.mrf.mxu1 }
  0xaa   : > { %v451_v28 = vrot.slane %v411_v23, 1  ;;  %v455_v34 = vrot.slane %v421_v24, 1  ;;  %v2509_v24 = vld [vmem:[%s2708_s8 + $0x18] sm:$0xff] }
  0xac   : > { %558 = vmatmul.bf16.gmra.mxu1 %v2726_v13 }
  0xad   : > { %670 = vmatmul.bf16.gmra.mxu2 %v2726_v13 }
  0xaf   : > { %879 = vmatmul.bf16.gmra.mxu3 %v2977_v25 }
  0xb0   : > { %999 = vmatmul.bf16.gmra.mxu0 %v2977_v25  ;;  %v431_v29 = vpop.f32.mrf.mxu2 }
  0xb1   : > { %v413_v31 = vpop.f32.mrf.mxu0  ;;  %v423_v32 = vpop.f32.mrf.mxu1  ;;  %v459_v38 = vrot.slane %v431_v29, 1 }
  0xb2   : > { %v441_v30 = vpop.f32.mrf.mxu3  ;;  %v452_v35 = vrot.slane %v413_v31, 1  ;;  %v456_v36 = vrot.slane %v423_v32, 1 }
  0xb3   : > { %v463_v41 = vrot.slane %v441_v30, 1 }
  0xb4   : > { %v477_v13 = vsel %vm469_vm0, %v451_v28, %v452_v35  ;;  %v2990_v37 = vsel %vm469_vm0, %v455_v34, %v456_v36 }
  0xb8   : > { %v433_v39 = vpop.f32.mrf.mxu2 }
  0xb9   : > { %v460_v42 = vrot.slane %v433_v39, 1  ;;  %v416_v44 = vpop.f32.mrf.mxu0  ;;  %v426_v45 = vpop.f32.mrf.mxu1 }
  0xba   : > { %v443_v40 = vpop.f32.mrf.mxu3  ;;  %v453_v49 = vrot.slane %v416_v44, 1  ;;  %v457_v55 = vrot.slane %v426_v45, 1  ;;  %v2510_v45 = vld [vmem:[%s2708_s8 + $0x20] sm:$0xff] }
  0xbb   : > { %v464_v43 = vrot.slane %v443_v40, 1  ;;  %v2997_v47 = vsel %vm469_vm0, %v459_v38, %v460_v42 }
  0xbc   : > { %562 = vmatmul.bf16.gmra.mxu1 %v2790_v33 }
  0xbd   : > { %v3001_v48 = vsel %vm469_vm0, %v463_v41, %v464_v43  ;;  %675 = vmatmul.bf16.gmra.mxu2 %v2790_v33 }
  0xbf   : > { %883 = vmatmul.bf16.gmra.mxu3 %v2993_v46 }
  0xc0   : > { %1004 = vmatmul.bf16.gmra.mxu0 %v2993_v46  ;;  %v436_v50 = vpop.f32.mrf.mxu2 }
  0xc1   : > { %v418_v52 = vpop.f32.mrf.mxu0  ;;  %v428_v54 = vpop.f32.mrf.mxu1  ;;  %v461_v33 = vrot.slane %v436_v50, 1 }
  0xc2   : > { %v446_v51 = vpop.f32.mrf.mxu3  ;;  %v454_v56 = vrot.slane %v418_v52, 1  ;;  %v458_v57 = vrot.slane %v428_v54, 1 }
  0xc3   : > { %v465_v63 = vrot.slane %v446_v51, 1 }
  0xc4   : > { %v476_v58 = vsel %vm469_vm0, %v453_v49, %v454_v56  ;;  %v3011_v59 = vsel %vm469_vm0, %v457_v55, %v458_v57 }
  0xc8   : > { %v438_v60 = vpop.f32.mrf.mxu2 }
  0xc9   : > { %v462_v0 = vrot.slane %v438_v60, 1  ;;  %v535_v3 = vpop.f32.mrf.mxu1 }
  0xca   : > { %v448_v62 = vpop.f32.mrf.mxu3  ;;  %v536_v5 = vadd.f32 %v535_v3, %v477_v13 }
  0xcb   : > { %v466_v1 = vrot.slane %v448_v62, 1  ;;  %v3016_v8 = vsel %vm469_vm0, %v461_v33, %v462_v0 }
  0xcc   : > { %1115 = vmatmul.bf16.vlgmr.msra.gmra.mxu1 %v2854_v53 }
  0xcd   : > { %v970_v6 = vpop.f32.mrf.mxu0  ;;  %v3020_v9 = vsel %vm469_vm0, %v465_v63, %v466_v1  ;;  %1329 = vmatmul.bf16.vlgmr.msra.gmra.mxu2 %v2508_v4 }
  0xce   : > { %v1010_v16 = vrot.slane %v970_v6, 1 }
  0xcf   : > { %1443 = vmatmul.bf16.vlgmr.msra.gmra.mxu3 %v2508_v4 }
  0xd0   : > { %1589 = vmatmul.bf16.vlgmr.msra.gmra.mxu0 %v2508_v4  ;;  %v641_v10 = vpop.f32.mrf.mxu2  ;;  %v2511_v4 = vld [vmem:[%s2708_s8 + $0x28] sm:$0xff] }
  0xd1   : > { %v537_v15 = vpop.f32.mrf.mxu1  ;;  %v681_v20 = vrot.slane %v641_v10, 2 }
  0xd2   : > { %v856_v11 = vpop.f32.mrf.mxu3 }
  0xd5   : > { %v972_v17 = vpop.f32.mrf.mxu0 }
  0xd6   : > { %v1011_v12 = vrot.slane %v972_v17, 1 }
  0xd8   : > { %v1033_v19 = vsel %vm469_vm0, %v1010_v16, %v1011_v12  ;;  %v643_v21 = vpop.f32.mrf.mxu2 }
  0xd9   : > { %v682_v23 = vrot.slane %v643_v21, 2  ;;  %v539_v53 = vpop.f32.mrf.mxu1 }
  0xda   : > { %v858_v22 = vpop.f32.mrf.mxu3  ;;  %v540_v26 = vadd.f32 %v539_v53, %v476_v58 }
  0xdb   : > { %v705_v28 = vsel %vm697_vm1, %v681_v20, %v682_v23 }
  0xdc   : > { %v706_v30 = vadd.f32 %v705_v28, %v536_v5  ;;  %1120 = vmatmul.bf16.gmra.mxu1 %v2882_v61  ;;  %v2512_v28 = vld [vmem:[%s2708_s8 + $0x30] sm:$0xff] }
  0xdd   : > { %v975_v29 = vpop.f32.mrf.mxu0  ;;  %1333 = vmatmul.bf16.gmra.mxu2 %v2509_v24 }
  0xde   : > { %v888_v31 = vadd.f32 %v856_v11, %v706_v30  ;;  %v1012_v13 = vrot.slane %v975_v29, 1 }
  0xdf   : > { %1448 = vmatmul.bf16.gmra.mxu3 %v2509_v24 }
  0xe0   : > { %1594 = vmatmul.bf16.gmra.mxu0 %v2509_v24  ;;  %v646_v32 = vpop.f32.mrf.mxu2  ;;  %v3030_v35 = vadd.f32 %v1033_v19, %v888_v31 }
  0xe1   : > { %v541_v36 = vpop.f32.mrf.mxu1  ;;  %v683_v41 = vrot.slane %v646_v32, 2 }
  0xe2   : > { %v860_v34 = vpop.f32.mrf.mxu3 }
  0xe5   : > { %v977_v38 = vpop.f32.mrf.mxu0 }
  0xe6   : > { %v1013_v39 = vrot.slane %v977_v38, 1 }
  0xe8   : > { %v1032_v40 = vsel %vm469_vm0, %v1012_v13, %v1013_v39  ;;  %v648_v42 = vpop.f32.mrf.mxu2 }
  0xe9   : > { %v684_v61 = vrot.slane %v648_v42, 2  ;;  %v543_v44 = vpop.f32.mrf.mxu1 }
  0xea   : > { %v862_v43 = vpop.f32.mrf.mxu3  ;;  %v544_v49 = vadd.f32 %v543_v44, %v2990_v37 }
  0xeb   : > { %v704_v50 = vsel %vm697_vm1, %v683_v41, %v684_v61 }
  0xec   : > { %v707_v52 = vadd.f32 %v704_v50, %v540_v26  ;;  %1125 = vmatmul.bf16.gmra.mxu1 %v2901_v2 }
  0xed   : > { %v980_v51 = vpop.f32.mrf.mxu0  ;;  %1337 = vmatmul.bf16.gmra.mxu2 %v2510_v45 }
  0xee   : > { %v889_v54 = vadd.f32 %v860_v34, %v707_v52  ;;  %v1014_v33 = vrot.slane %v980_v51, 1 }
  0xef   : > { %1453 = vmatmul.bf16.gmra.mxu3 %v2510_v45 }
  0xf0   : > { %1599 = vmatmul.bf16.gmra.mxu0 %v2510_v45  ;;  %v651_v55 = vpop.f32.mrf.mxu2  ;;  %v3039_v57 = vadd.f32 %v1032_v40, %v889_v54 }
  0xf1   : > { %v545_v58 = vpop.f32.mrf.mxu1  ;;  %v685_v63 = vrot.slane %v651_v55, 2 }
  0xf2   : > { %v864_v56 = vpop.f32.mrf.mxu3 }
  0xf5   : > { %v982_v60 = vpop.f32.mrf.mxu0 }
  0xf6   : > { %v1015_v37 = vrot.slane %v982_v60, 1 }
  0xf8   : > { %v1031_v62 = vsel %vm469_vm0, %v1014_v33, %v1015_v37  ;;  %v653_v0 = vpop.f32.mrf.mxu2 }
  0xf9   : > { %v686_v2 = vrot.slane %v653_v0, 2  ;;  %v547_v3 = vpop.f32.mrf.mxu1 }
  0xfa   : > { %v866_v1 = vpop.f32.mrf.mxu3  ;;  %v548_v5 = vadd.f32 %v547_v3, %v3011_v59 }
  0xfb   : > { %v703_v6 = vsel %vm697_vm1, %v685_v63, %v686_v2 }
  0xfc   : > { %v708_v11 = vadd.f32 %v703_v6, %v544_v49  ;;  %1130 = vmatmul.bf16.gmra.mxu1 %v2920_v7  ;;  %v2513_v49 = vld [vmem:[%s2708_s8 + $0x38] sm:$0xff] }
  0xfd   : > { %v985_v10 = vpop.f32.mrf.mxu0  ;;  %1341 = vmatmul.bf16.gmra.mxu2 %v2511_v4 }
  0xfe   : > { %v890_v15 = vadd.f32 %v864_v56, %v708_v11  ;;  %v1016_v20 = vrot.slane %v985_v10, 1 }
  0xff   : > { %1458 = vmatmul.bf16.gmra.mxu3 %v2511_v4 }
 0x100   : > { %1604 = vmatmul.bf16.gmra.mxu0 %v2511_v4  ;;  %v656_v16 = vpop.f32.mrf.mxu2  ;;  %v3048_v12 = vadd.f32 %v1031_v62, %v890_v15  ;;  %v2514_v4 = vld [vmem:[%s2708_s8 + $0x40] sm:$0xff] }
 0x101   : > { %v549_v19 = vpop.f32.mrf.mxu1  ;;  %v687_v23 = vrot.slane %v656_v16, 2 }
 0x102   : > { %v868_v17 = vpop.f32.mrf.mxu3 }
 0x105   : > { %v987_v21 = vpop.f32.mrf.mxu0 }
 0x106   : > { %v1017_v59 = vrot.slane %v987_v21, 1 }
 0x108   : > { %v1030_v22 = vsel %vm469_vm0, %v1016_v20, %v1017_v59  ;;  %v658_v53 = vpop.f32.mrf.mxu2 }
 0x109   : > { %v688_v7 = vrot.slane %v658_v53, 2  ;;  %v551_v26 = vpop.f32.mrf.mxu1 }
 0x10a   : > { %v870_v24 = vpop.f32.mrf.mxu3  ;;  %v552_v29 = vadd.f32 %v551_v26, %v2997_v47  ;;  %v2515_v26 = vld [vmem:[%s2708_s8 + $0x48] sm:$0xff]  ;;  %s2443_s8 = sshll.u32 %s3180_s12, 5 }
 0x10b   : > { %v702_v30 = vsel %vm697_vm1, %v687_v23, %v688_v7  ;;  %s3110_s6 = scalar_lea.vmem %s3173_s2, %s2443_s8 }
 0x10c   : > { %v709_v32 = vadd.f32 %v702_v30, %v548_v5  ;;  %1135 = vmatmul.bf16.gmra.mxu1 %v2939_v14 }
 0x10d   : > { %v990_v31 = vpop.f32.mrf.mxu0  ;;  %1345 = vmatmul.bf16.gmra.mxu2 %v2512_v28 }
 0x10e   : > { %v891_v34 = vadd.f32 %v868_v17, %v709_v32  ;;  %v1018_v40 = vrot.slane %v990_v31, 1 }
 0x10f   : > { %1463 = vmatmul.bf16.gmra.mxu3 %v2512_v28 }
 0x110   : > { %1609 = vmatmul.bf16.gmra.mxu0 %v2512_v28  ;;  %v661_v36 = vpop.f32.mrf.mxu2  ;;  %v3057_v38 = vadd.f32 %v1030_v22, %v891_v34 }
 0x111   : > { %v553_v39 = vpop.f32.mrf.mxu1  ;;  %v689_v43 = vrot.slane %v661_v36, 2 }
 0x112   : > { %v872_v13 = vpop.f32.mrf.mxu3 }
 0x115   : > { %v992_v41 = vpop.f32.mrf.mxu0 }
 0x116   : > { %v1019_v47 = vrot.slane %v992_v41, 1 }
 0x118   : > { %v1029_v42 = vsel %vm469_vm0, %v1018_v40, %v1019_v47  ;;  %v663_v61 = vpop.f32.mrf.mxu2 }
 0x119   : > { %v690_v14 = vrot.slane %v663_v61, 2  ;;  %v555_v45 = vpop.f32.mrf.mxu1 }
 0x11a   : > { %v874_v44 = vpop.f32.mrf.mxu3  ;;  %v556_v50 = vadd.f32 %v555_v45, %v3016_v8 }
 0x11b   : > { %v701_v51 = vsel %vm697_vm1, %v689_v43, %v690_v14 }
 0x11c   : > { %v710_v54 = vadd.f32 %v701_v51, %v552_v29  ;;  %1140 = vmatmul.bf16.gmra.mxu1 %v2958_v18 }
 0x11d   : > { %v995_v52 = vpop.f32.mrf.mxu0  ;;  %1349 = vmatmul.bf16.gmra.mxu2 %v2513_v49 }
 0x11e   : > { %v892_v55 = vadd.f32 %v872_v13, %v710_v54  ;;  %v1020_v37 = vrot.slane %v995_v52, 1 }
 0x11f   : > { %1468 = vmatmul.bf16.gmra.mxu3 %v2513_v49 }
 0x120   : > { %1614 = vmatmul.bf16.gmra.mxu0 %v2513_v49  ;;  %v666_v56 = vpop.f32.mrf.mxu2  ;;  %v3066_v33 = vadd.f32 %v1029_v42, %v892_v55 }
 0x121   : > { %v557_v60 = vpop.f32.mrf.mxu1  ;;  %v691_v0 = vrot.slane %v666_v56, 2 }
 0x122   : > { %v876_v58 = vpop.f32.mrf.mxu3 }
 0x125   : > { %v997_v62 = vpop.f32.mrf.mxu0 }
 0x126   : > { %v1021_v8 = vrot.slane %v997_v62, 1 }
 0x128   : > { %v1028_v63 = vsel %vm469_vm0, %v1020_v37, %v1021_v8  ;;  %v668_v1 = vpop.f32.mrf.mxu2 }
 0x129   : > { %v692_v18 = vrot.slane %v668_v1, 2  ;;  %v559_v3 = vpop.f32.mrf.mxu1 }
 0x12a   : > { %v878_v2 = vpop.f32.mrf.mxu3  ;;  %v560_v5 = vadd.f32 %v559_v3, %v3001_v48 }
 0x12b   : > { %v700_v6 = vsel %vm697_vm1, %v691_v0, %v692_v18 }
 0x12c   : > { %v711_v11 = vadd.f32 %v700_v6, %v556_v50  ;;  %1145 = vmatmul.bf16.gmra.mxu1 %v2977_v25 }
 0x12d   : > { %v1000_v10 = vpop.f32.mrf.mxu0  ;;  %1353 = vmatmul.bf16.gmra.mxu2 %v2514_v4 }
 0x12e   : > { %v893_v15 = vadd.f32 %v876_v58, %v711_v11  ;;  %v1022_v21 = vrot.slane %v1000_v10, 1 }
 0x12f   : > { %1473 = vmatmul.bf16.gmra.mxu3 %v2514_v4 }
 0x130   : > { %1619 = vmatmul.bf16.gmra.mxu0 %v2514_v4  ;;  %v671_v16 = vpop.f32.mrf.mxu2  ;;  %v3075_v19 = vadd.f32 %v1028_v63, %v893_v15 }
 0x131   : > { %v561_v20 = vpop.f32.mrf.mxu1  ;;  %v693_v23 = vrot.slane %v671_v16, 2 }
 0x132   : > { %v880_v17 = vpop.f32.mrf.mxu3 }
 0x135   : > { %v1002_v59 = vpop.f32.mrf.mxu0 }
 0x136   : > { %v1023_v48 = vrot.slane %v1002_v59, 1 }
 0x138   : > { %v1027_v22 = vsel %vm469_vm0, %v1022_v21, %v1023_v48  ;;  %v673_v53 = vpop.f32.mrf.mxu2 }
 0x139   : > { %v694_v25 = vrot.slane %v673_v53, 2  ;;  %v563_v7 = vpop.f32.mrf.mxu1 }
 0x13a   : > { %v882_v24 = vpop.f32.mrf.mxu3  ;;  %v564_v28 = vadd.f32 %v563_v7, %v3020_v9 }
 0x13b   : > { %v699_v29 = vsel %vm697_vm1, %v693_v23, %v694_v25 }
 0x13c   : > { %v712_v31 = vadd.f32 %v699_v29, %v560_v5  ;;  %1150 = vmatmul.bf16.gmra.mxu1 %v2993_v46 }
 0x13d   : > { %v1005_v30 = vpop.f32.mrf.mxu0  ;;  %1357 = vmatmul.bf16.gmra.mxu2 %v2515_v26 }
 0x13e   : > { %v894_v32 = vadd.f32 %v880_v17, %v712_v31  ;;  %v1024_v40 = vrot.slane %v1005_v30, 1 }
 0x13f   : > { %1478 = vmatmul.bf16.gmra.mxu3 %v2515_v26 }
 0x140   : > { %1624 = vmatmul.bf16.gmra.mxu0 %v2515_v26  ;;  %v676_v34 = vpop.f32.mrf.mxu2  ;;  %v3084_v13 = vadd.f32 %v1027_v22, %v894_v32 }
 0x141   : > { %v565_v39 = vpop.f32.mrf.mxu1  ;;  %v695_v42 = vrot.slane %v676_v34, 2 }
 0x142   : > { %v884_v36 = vpop.f32.mrf.mxu3 }
 0x145   : > { %v1007_v41 = vpop.f32.mrf.mxu0 }
 0x146   : > { %v1025_v47 = vrot.slane %v1007_v41, 1 }
 0x148   : > { %v1026_v9 = vsel %vm469_vm0, %v1024_v40, %v1025_v47  ;;  %v678_v43 = vpop.f32.mrf.mxu2 }
 0x149   : > { %v696_v44 = vrot.slane %v678_v43, 2  ;;  %v1116_v46 = vpop.f32.mrf.mxu1 }
 0x14a   : > { %v886_v61 = vpop.f32.mrf.mxu3  ;;  %v1156_v63 = vrot.slane %v1116_v46, 2 }
 0x14b   : > { %v698_v14 = vsel %vm697_vm1, %v695_v42, %v696_v44 }
 0x14c   : > { %v713_v49 = vadd.f32 %v698_v14, %v564_v28 }
 0x14d   : > { %v1590_v45 = vpop.f32.mrf.mxu0 }
 0x14e   : > { %v895_v50 = vadd.f32 %v884_v36, %v713_v49  ;;  %v1630_v21 = vrot.slane %v1590_v45, 2 }
 0x150   : > { %v1330_v52 = vpop.f32.mrf.mxu2  ;;  %v3090_v54 = vadd.f32 %v1026_v9, %v895_v50 }
 0x151   : > { %v1118_v55 = vpop.f32.mrf.mxu1 }
 0x152   : > { %v1444_v51 = vpop.f32.mrf.mxu3  ;;  %v1157_v62 = vrot.slane %v1118_v55, 2 }
 0x153   : > { %v1484_v10 = vrot.slane %v1444_v51, 1 }
 0x154   : > { %v1179_v0 = vsel %vm697_vm1, %v1156_v63, %v1157_v62 }
 0x155   : > { %v1592_v56 = vpop.f32.mrf.mxu0  ;;  %v1180_v4 = vadd.f32 %v1179_v0, %v3030_v35 }
 0x156   : > { %v1631_v59 = vrot.slane %v1592_v56, 2 }
 0x157   : > { %v1362_v17 = vadd.f32 %v1330_v52, %v1180_v4 }
 0x158   : > { %v1332_v60 = vpop.f32.mrf.mxu2  ;;  %v1653_v28 = vsel %vm697_vm1, %v1630_v21, %v1631_v59 }
 0x159   : > { %v1121_v37 = vpop.f32.mrf.mxu1 }
 0x15a   : > { %v1446_v58 = vpop.f32.mrf.mxu3  ;;  %v1158_v5 = vrot.slane %v1121_v37, 2 }
 0x15b   : > { %v1485_v18 = vrot.slane %v1446_v58, 1 }
 0x15d   : > { %v1595_v8 = vpop.f32.mrf.mxu0  ;;  %v1507_v16 = vsel %vm469_vm0, %v1484_v10, %v1485_v18 }
 0x15e   : > { %v1508_v48 = vadd.f32 %v1507_v16, %v1362_v17  ;;  %v1632_v35 = vrot.slane %v1595_v8, 2 }
 0x160   : > { %v1334_v2 = vpop.f32.mrf.mxu2 }
 0x161   : > { %v1123_v3 = vpop.f32.mrf.mxu1 }
 0x162   : > { %v1449_v1 = vpop.f32.mrf.mxu3  ;;  %v1159_v6 = vrot.slane %v1123_v3, 2 }
 0x163   : > { %v1486_v53 = vrot.slane %v1449_v1, 1 }
 0x164   : > { %v1178_v15 = vsel %vm697_vm1, %v1158_v5, %v1159_v6 }
 0x165   : > { %v1597_v11 = vpop.f32.mrf.mxu0  ;;  %v1181_v20 = vadd.f32 %v1178_v15, %v3039_v57  ;;  %v1654_v57 = vadd.f32 %v1653_v28, %v1508_v48 }
 0x166   : > { %v1633_v24 = vrot.slane %v1597_v11, 2 }
 0x167   : > { %v1363_v26 = vadd.f32 %v1334_v2, %v1181_v20  ;;  %v1691_v36 = vmul.f32 %v1654_v57, %v1654_v57 }
 0x168   : > { %v1336_v23 = vpop.f32.mrf.mxu2  ;;  %v1652_v32 = vsel %vm697_vm1, %v1632_v35, %v1633_v24 }
 0x169   : > { %v1126_v7 = vpop.f32.mrf.mxu1 }
 0x16a   : > { %v1451_v22 = vpop.f32.mrf.mxu3  ;;  %v1160_v61 = vrot.slane %v1126_v7, 2 }
 0x16b   : > { %v1487_v25 = vrot.slane %v1451_v22, 1 }
 0x16d   : > { %v1506_v29 = vsel %vm469_vm0, %v1486_v53, %v1487_v25  ;;  %v1600_v30 = vpop.f32.mrf.mxu0 }
 0x16e   : > { %v1509_v31 = vadd.f32 %v1506_v29, %v1363_v26  ;;  %v1634_v51 = vrot.slane %v1600_v30, 2 }
 0x170   : > { %v1655_v34 = vadd.f32 %v1652_v32, %v1509_v31  ;;  %v1338_v9 = vpop.f32.mrf.mxu2 }
 0x171   : > { %v1128_v42 = vpop.f32.mrf.mxu1 }
 0x172   : > { %v2543_v39 = vpack.c.bf16 %v1655_v34, %v1654_v57  ;;  %v1678_v40 = vadd.f32 %v1655_v34, %v1654_v57  ;;  %v1692_v41 = vmul.f32 %v1655_v34, %v1655_v34  ;;  %v1454_v47 = vpop.f32.mrf.mxu3  ;;  %v1161_v44 = vrot.slane %v1128_v42, 2 }
 0x173   : > { %v1488_v52 = vrot.slane %v1454_v47, 1 }
 0x174   : > { %2544 = vst [vmem:[%s3110_s6] sm:$0xff] %v2543_v39   ;;  %v1699_v43 = vadd.f32 %v1692_v41, %v1691_v36  ;;  %v1177_v14 = vsel %vm697_vm1, %v1160_v61, %v1161_v44 }
 0x175   : > { %v1602_v46 = vpop.f32.mrf.mxu0  ;;  %v1182_v45 = vadd.f32 %v1177_v14, %v3048_v12 }
 0x176   : > { %v1635_v55 = vrot.slane %v1602_v46, 2 }
 0x177   : > { %v1364_v60 = vadd.f32 %v1338_v9, %v1182_v45 }
 0x178   : > { %v1340_v50 = vpop.f32.mrf.mxu2  ;;  %v1651_v63 = vsel %vm697_vm1, %v1634_v51, %v1635_v55 }
 0x179   : > { %v1131_v58 = vpop.f32.mrf.mxu1 }
 0x17a   : > { %v1456_v49 = vpop.f32.mrf.mxu3  ;;  %v1162_v5 = vrot.slane %v1131_v58, 2 }
 0x17b   : > { %v1489_v56 = vrot.slane %v1456_v49, 1 }
 0x17d   : > { %v1505_v37 = vsel %vm469_vm0, %v1488_v52, %v1489_v56  ;;  %v1605_v62 = vpop.f32.mrf.mxu0 }
 0x17e   : > { %v1510_v8 = vadd.f32 %v1505_v37, %v1364_v60  ;;  %v1636_v20 = vrot.slane %v1605_v62, 2 }
 0x180   : > { %v1656_v0 = vadd.f32 %v1651_v63, %v1510_v8  ;;  %v1342_v18 = vpop.f32.mrf.mxu2 }
 0x181   : > { %v1133_v3 = vpop.f32.mrf.mxu1 }
 0x182   : > { %v1679_v1 = vadd.f32 %v1678_v40, %v1656_v0  ;;  %v1693_v2 = vmul.f32 %v1656_v0, %v1656_v0  ;;  %v1459_v12 = vpop.f32.mrf.mxu3  ;;  %v1163_v6 = vrot.slane %v1133_v3, 2 }
 0x183   : > { %v1490_v21 = vrot.slane %v1459_v12, 1 }
 0x184   : > { %v1700_v4 = vadd.f32 %v1699_v43, %v1693_v2  ;;  %v1176_v11 = vsel %vm697_vm1, %v1162_v5, %v1163_v6 }
 0x185   : > { %v1607_v10 = vpop.f32.mrf.mxu0  ;;  %v1183_v15 = vadd.f32 %v1176_v11, %v3057_v38 }
 0x186   : > { %v1637_v59 = vrot.slane %v1607_v10, 2 }
 0x187   : > { %v1365_v23 = vadd.f32 %v1342_v18, %v1183_v15 }
 0x188   : > { %v1344_v17 = vpop.f32.mrf.mxu2  ;;  %v1650_v25 = vsel %vm697_vm1, %v1636_v20, %v1637_v59 }
 0x189   : > { %v1136_v22 = vpop.f32.mrf.mxu1 }
 0x18a   : > { %v1461_v16 = vpop.f32.mrf.mxu3  ;;  %v1164_v32 = vrot.slane %v1136_v22, 2 }
 0x18b   : > { %v1491_v48 = vrot.slane %v1461_v16, 1 }
 0x18d   : > { %v1504_v35 = vsel %vm469_vm0, %v1490_v21, %v1491_v48  ;;  %v1610_v53 = vpop.f32.mrf.mxu0 }
 0x18e   : > { %v1511_v24 = vadd.f32 %v1504_v35, %v1365_v23  ;;  %v1638_v9 = vrot.slane %v1610_v53, 2 }
 0x190   : > { %v1657_v7 = vadd.f32 %v1650_v25, %v1511_v24  ;;  %v1346_v30 = vpop.f32.mrf.mxu2 }
 0x191   : > { %v1138_v57 = vpop.f32.mrf.mxu1 }
 0x192   : > { %v2548_v26 = vpack.c.bf16 %v1657_v7, %v1656_v0  ;;  %v1680_v38 = vadd.f32 %v1679_v1, %v1657_v7  ;;  %v1694_v28 = vmul.f32 %v1657_v7, %v1657_v7  ;;  %v1464_v29 = vpop.f32.mrf.mxu3  ;;  %v1165_v34 = vrot.slane %v1138_v57, 2 }
 0x193   : > { %v1492_v42 = vrot.slane %v1464_v29, 1 }
 0x194   : > { %2560 = vst [vmem:[%s3110_s6 + $0x8] sm:$0xff] %v2548_v26   ;;  %v1701_v31 = vadd.f32 %v1700_v4, %v1694_v28  ;;  %v1175_v39 = vsel %vm697_vm1, %v1164_v32, %v1165_v34 }
 0x195   : > { %v1612_v36 = vpop.f32.mrf.mxu0  ;;  %v1184_v40 = vadd.f32 %v1175_v39, %v3066_v33 }
 0x196   : > { %v1639_v43 = vrot.slane %v1612_v36, 2 }
 0x197   : > { %v1366_v46 = vadd.f32 %v1346_v30, %v1184_v40 }
 0x198   : > { %v1348_v47 = vpop.f32.mrf.mxu2  ;;  %v1649_v50 = vsel %vm697_vm1, %v1638_v9, %v1639_v43 }
 0x199   : > { %v1141_v44 = vpop.f32.mrf.mxu1 }
 0x19a   : > { %v1466_v41 = vpop.f32.mrf.mxu3  ;;  %v1166_v37 = vrot.slane %v1141_v44, 2 }
 0x19b   : > { %v1493_v61 = vrot.slane %v1466_v41, 1 }
 0x19d   : > { %v1503_v14 = vsel %vm469_vm0, %v1492_v42, %v1493_v61  ;;  %v1615_v45 = vpop.f32.mrf.mxu0 }
 0x19e   : > { %v1512_v49 = vadd.f32 %v1503_v14, %v1366_v46  ;;  %v1640_v12 = vrot.slane %v1615_v45, 2 }
 0x1a0   : > { %v1658_v51 = vadd.f32 %v1649_v50, %v1512_v49  ;;  %v1350_v56 = vpop.f32.mrf.mxu2 }
 0x1a1   : > { %v1143_v58 = vpop.f32.mrf.mxu1 }
 0x1a2   : > { %v1681_v52 = vadd.f32 %v1680_v38, %v1658_v51  ;;  %v1695_v55 = vmul.f32 %v1658_v51, %v1658_v51  ;;  %v1469_v33 = vpop.f32.mrf.mxu3  ;;  %v1167_v62 = vrot.slane %v1143_v58, 2 }
 0x1a3   : > { %v1494_v18 = vrot.slane %v1469_v33, 1 }
 0x1a4   : > { %v1702_v60 = vadd.f32 %v1701_v31, %v1695_v55  ;;  %v1174_v63 = vsel %vm697_vm1, %v1166_v37, %v1167_v62 }
 0x1a5   : > { %v1617_v8 = vpop.f32.mrf.mxu0  ;;  %v1185_v0 = vadd.f32 %v1174_v63, %v3075_v19 }
 0x1a6   : > { %v1641_v3 = vrot.slane %v1617_v8, 2 }
 0x1a7   : > { %v1367_v6 = vadd.f32 %v1350_v56, %v1185_v0 }
 0x1a8   : > { %v1352_v2 = vpop.f32.mrf.mxu2  ;;  %v1648_v16 = vsel %vm697_vm1, %v1640_v12, %v1641_v3 }
 0x1a9   : > { %v1146_v5 = vpop.f32.mrf.mxu1 }
 0x1aa   : > { %v1471_v1 = vpop.f32.mrf.mxu3  ;;  %v1168_v35 = vrot.slane %v1146_v5, 2 }
 0x1ab   : > { %v1495_v4 = vrot.slane %v1471_v1, 1 }
 0x1ad   : > { %v1502_v10 = vsel %vm469_vm0, %v1494_v18, %v1495_v4  ;;  %v1620_v11 = vpop.f32.mrf.mxu0 }
 0x1ae   : > { %v1513_v15 = vadd.f32 %v1502_v10, %v1367_v6  ;;  %v1642_v28 = vrot.slane %v1620_v11, 2 }
 0x1b0   : > { %v1659_v17 = vadd.f32 %v1648_v16, %v1513_v15  ;;  %v1354_v48 = vpop.f32.mrf.mxu2 }
 0x1b1   : > { %v1148_v22 = vpop.f32.mrf.mxu1 }
 0x1b2   : > { %v2553_v20 = vpack.c.bf16 %v1659_v17, %v1658_v51  ;;  %v1682_v19 = vadd.f32 %v1681_v52, %v1659_v17  ;;  %v1696_v21 = vmul.f32 %v1659_v17, %v1659_v17  ;;  %v1474_v59 = vpop.f32.mrf.mxu3  ;;  %v1169_v53 = vrot.slane %v1148_v22, 2 }
 0x1b3   : > { %v1496_v29 = vrot.slane %v1474_v59, 1 }
 0x1b4   : > { %2561 = vst [vmem:[%s3110_s6 + $0x10] sm:$0xff] %v2553_v20   ;;  %v1703_v23 = vadd.f32 %v1702_v60, %v1696_v21  ;;  %v1173_v25 = vsel %vm697_vm1, %v1168_v35, %v1169_v53 }
 0x1b5   : > { %v1622_v24 = vpop.f32.mrf.mxu0  ;;  %v1186_v7 = vadd.f32 %v1173_v25, %v3084_v13 }
 0x1b6   : > { %v1643_v30 = vrot.slane %v1622_v24, 2 }
 0x1b7   : > { %v1368_v32 = vadd.f32 %v1354_v48, %v1186_v7 }
 0x1b8   : > { %v1356_v38 = vpop.f32.mrf.mxu2  ;;  %v1647_v40 = vsel %vm697_vm1, %v1642_v28, %v1643_v30 }
 0x1b9   : > { %v1151_v31 = vpop.f32.mrf.mxu1 }
 0x1ba   : > { %v1476_v26 = vpop.f32.mrf.mxu3  ;;  %v1170_v44 = vrot.slane %v1151_v31, 2 }
 0x1bb   : > { %v1497_v57 = vrot.slane %v1476_v26, 1 }
 0x1bd   : > { %v1501_v34 = vsel %vm469_vm0, %v1496_v29, %v1497_v57  ;;  %v1625_v39 = vpop.f32.mrf.mxu0 }
 0x1be   : > { %v1514_v36 = vadd.f32 %v1501_v34, %v1368_v32  ;;  %v1644_v52 = vrot.slane %v1625_v39, 2 }
 0x1c0   : > { %v1660_v41 = vadd.f32 %v1647_v40, %v1514_v36  ;;  %v1358_v42 = vpop.f32.mrf.mxu2 }
 0x1c1   : > { %v1153_v43 = vpop.f32.mrf.mxu1 }
 0x1c2   : > { %v1683_v47 = vadd.f32 %v1682_v19, %v1660_v41  ;;  %v1697_v9 = vmul.f32 %v1660_v41, %v1660_v41  ;;  %v1479_v13 = vpop.f32.mrf.mxu3  ;;  %v1171_v46 = vrot.slane %v1153_v43, 2 }
 0x1c3   : > { %v1498_v55 = vrot.slane %v1479_v13, 1 }
 0x1c4   : > { %v1704_v61 = vadd.f32 %v1703_v23, %v1697_v9  ;;  %v1172_v14 = vsel %vm697_vm1, %v1170_v44, %v1171_v46 }
 0x1c5   : > { %v1187_v45 = vadd.f32 %v1172_v14, %v3090_v54  ;;  %v1627_v49 = vpop.f32.mrf.mxu0 }
 0x1c6   : > { %v1645_v33 = vrot.slane %v1627_v49, 2 }
 0x1c7   : > { %v1369_v58 = vadd.f32 %v1358_v42, %v1187_v45 }
 0x1c8   : > { %v1360_v51 = vpop.f32.mrf.mxu2  ;;  %v1646_v62 = vsel %vm697_vm1, %v1644_v52, %v1645_v33 }
 0x1ca   : > { %v1481_v50 = vpop.f32.mrf.mxu3 }
 0x1cb   : > { %v1499_v56 = vrot.slane %v1481_v50, 1 }
 0x1cd   : > { %v1500_v60 = vsel %vm469_vm0, %v1498_v55, %v1499_v56 }
 0x1ce   : > { %v1515_v37 = vadd.f32 %v1500_v60, %v1369_v58 }
 0x1d0   : > { %v1661_v8 = vadd.f32 %v1646_v62, %v1515_v37 }
 0x1d2   : > { %v2558_v63 = vpack.c.bf16 %v1661_v8, %v1660_v41  ;;  %v1684_v54 = vadd.f32 %v1683_v47, %v1661_v8  ;;  %v1698_v0 = vmul.f32 %v1661_v8, %v1661_v8 }
 0x1d4   : > { %2562 = vst [vmem:[%s3110_s6 + $0x18] sm:$0xff] %v2558_v63   ;;  %v1685_v1 = vrot.slane %v1684_v54, 4  ;;  %v1705_v2 = vadd.f32 %v1704_v61, %v1698_v0 }
 0x1d6   : > { %v1686_v12 = vadd.f32 %v1685_v1, %v1684_v54  ;;  %v1706_v18 = vrot.slane %v1705_v2, 4 }
 0x1d8   : > { %v1687_v3 = vrot.slane %v1686_v12, 2  ;;  %v1707_v4 = vadd.f32 %v1706_v18, %v1705_v2 }
 0x1da   : > { %v1688_v5 = vadd.f32 %v1687_v3, %v1686_v12  ;;  %v1708_v6 = vrot.slane %v1707_v4, 2 }
 0x1dc   : > { %v1689_v10 = vrot.slane %v1688_v5, 1  ;;  %v1709_v11 = vadd.f32 %v1708_v6, %v1707_v4 }
 0x1de   : > { %v1710_v15 = vrot.slane %v1709_v11, 1  ;;  %v1690_v27 = vadd.f32 %v1689_v10, %v1688_v5 }
 0x1e0   : > { %v1711_v16 = vadd.f32 %v1710_v15, %v1709_v11 }
 0x1e2   : > { %v1713_v17 = vsel %vm1712_vm2, %v1690_v27, %v1711_v16 }
 0x1e3   : > { %v1715_v20 = vsel %vm1714_vm3, %v1713_v17, 0.0 }
 0x1e4   : > { %1716 = vst [vmem:[%s252_s11] sm:$0xff] %v1715_v20 }
 0x1e5 PF: > { %s14_s14 = sadd.s32 1, %s2634_s14   ;;  %s3175_s12 = smov %s2630_s13 }
 0x1e6   : > { %p11_p5 = scmp.ge.s32.totalorder %s14_s14, 4   ;;  %s3176_s13 = smov %s3178_s15 }
 0x1e8   :  { %13 = sbr.rel (!%p11_p5) target bundleno = 2 (0x2), region = 84 }

// kernel: forward.9
= control target key start
LH: loop header
LB: loop body
LE: loop exit
PB: predicated region body
PF: predicated region fallthrough
CT: control target
= control target key end

     0   :  { %s2940_s12 = smov 0   ;;  %s2942_s13 = smov 0   ;;  %s3382_s0 = inlined_call_operand.vmem [shape: bf16[2,4,9,16,128], index: 0, kind: input, shape index: {}]   ;;  %s3383_s1 = inlined_call_operand.vmem [shape: bf16[9,128,128], index: 1, kind: input, shape index: {}]   ;;  %s3384_s2 = inlined_call_operand.vmem [shape: bf16[2,8,8,128], index: 2, kind: output, shape index: {0}]   ;;  %s3385_s3 = inlined_call_operand.vmem [shape: f32[2,8,128], index: 3, kind: output, shape index: {1}]  }
   0x1   :  { %s2944_s14 = smov 0  }
   0x2 LB: > { %s33_s15 = sadd.s32 1, %s2914_s13  ;;  %p2008_p0 = scmp.ge.s32.totalorder %s2918_s14, 1  ;;  %s2918_s14 = sphi %s2944_s14, %s14_s14   ;;  %s2914_s13 = sphi %s2942_s13, %s3387_s13   ;;  %s2910_s12 = sphi %s2940_s12, %s3386_s12  }
   0x3   : > { %p35_p1 = scmp.ge.s32.totalorder %s33_s15, 2  ;;  %p176_p2 = scmp.lt.s32.totalorder %s2918_s14, 3 }
   0x5   : > { %s3389_s15 = smov (%p35_p1, %s33_s15), 0  ;;  %p177_p3 = pnand %p2008_p0, %p176_p2 }
   0x6   : > { %p221_p4 = scmp.lt.s32.totalorder (!%p177_p3), %s2910_s12, 1 }
   0x7   : > { %180 = sbr.rel (%p177_p3) target bundleno = 481 (0x1e1), region = 28 }
   0xc   : > { %v2735_v0 = vld [vmem:[%s3383_s1 + $0x78] sm:$0xff]  ;;  %v2734_v1 = vld [vmem:[%s3383_s1 + $0x70] sm:$0xff]  ;;  %v2733_v2 = vld [vmem:[%s3383_s1 + $0x68] sm:$0xff]  ;;  %s3391_s12 = smov (!%p221_p4, %s2910_s12), 1  ;;  %vm1815_vm1 = vcmask 1040384   ;;  %vm1817_vm2 = vcmask 1041408  }
   0xd   : > { %421 = vmatpush.bf16.msra.mxu0 %v2735_v0  ;;  %2847 = vmatpush.bf16.msra.mxu1 %v2735_v0  ;;  %v2732_v3 = vld [vmem:[%s3383_s1 + $0x60] sm:$0xff]  ;;  %v2731_v4 = vld [vmem:[%s3383_s1 + $0x58] sm:$0xff]  ;;  %v2730_v5 = vld [vmem:[%s3383_s1 + $0x50] sm:$0xff]  ;;  %s2871_s30 = smul.u32 288, %s3391_s12  ;;  %s2012_s7 = sshll.u32 %s3391_s12, 3 }
   0xe   : > { %2848 = vmatpush.bf16.msra.mxu2 %v2735_v0  ;;  %2849 = vmatpush.bf16.msra.mxu3 %v2735_v0  ;;  %v2729_v6 = vld [vmem:[%s3383_s1 + $0x48] sm:$0xff]  ;;  %v2728_v7 = vld [vmem:[%s3383_s1 + $0x40] sm:$0xff]  ;;  %v2719_v8 = vld [vmem:[%s3383_s1 + $0x38] sm:$0xff]  ;;  %s252_s11 = scalar_lea.vmem %s3385_s3, %s2012_s7 }
   0xf   : > { %s2992_s8 = scalar_lea.vmem %s3382_s0, %s2871_s30  ;;  %v2743_v9 = vld [vmem:[%s3383_s1 + $0xb8] sm:$0xff]  ;;  %v2718_v16 = vld [vmem:[%s3383_s1 + $0x30] sm:$0xff]  ;;  %v2717_v20 = vld [vmem:[%s3383_s1 + $0x28] sm:$0xff] }
  0x10   : > { %v2720_v10 = vld [vmem:[%s2992_s8 + $0x48] sm:$0xff]  ;;  %v2722_v11 = vld [vmem:[%s2992_s8 + $0x58] sm:$0xff]  ;;  %v2742_v17 = vld [vmem:[%s3383_s1 + $0xb0] sm:$0xff] }
  0x11   : > { %422 = vmatpush.bf16.msra.mxu0 %v2734_v1  ;;  %2850 = vmatpush.bf16.msra.mxu1 %v2734_v1  ;;  %v2724_v12 = vld [vmem:[%s2992_s8 + $0x68] sm:$0xff]  ;;  %v2726_v13 = vld [vmem:[%s2992_s8 + $0x78] sm:$0xff]  ;;  %v2774_v18 = vld [vmem:[%s3383_s1 + $0x130] sm:$0xff] }
  0x12   : > { %2851 = vmatpush.bf16.msra.mxu2 %v2734_v1  ;;  %2852 = vmatpush.bf16.msra.mxu3 %v2734_v1  ;;  %v2775_v14 = vld [vmem:[%s3383_s1 + $0x138] sm:$0xff]  ;;  %v2758_v19 = vld [vmem:[%s3383_s1 + $0xf0] sm:$0xff]  ;;  %v2741_v21 = vld [vmem:[%s3383_s1 + $0xa8] sm:$0xff] }
  0x13   : > { %v2759_v15 = vld [vmem:[%s3383_s1 + $0xf8] sm:$0xff]  ;;  %v2773_v22 = vld [vmem:[%s3383_s1 + $0x128] sm:$0xff]  ;;  %v2716_v24 = vld [vmem:[%s3383_s1 + $0x20] sm:$0xff] }
  0x14   : > { %v2757_v23 = vld [vmem:[%s3383_s1 + $0xe8] sm:$0xff]  ;;  %v2740_v25 = vld [vmem:[%s3383_s1 + $0xa0] sm:$0xff]  ;;  %v2715_v28 = vld [vmem:[%s3383_s1 + $0x18] sm:$0xff] }
  0x15   : > { %423 = vmatpush.bf16.msra.mxu0 %v2733_v2  ;;  %2853 = vmatpush.bf16.msra.mxu1 %v2733_v2  ;;  %v2772_v26 = vld [vmem:[%s3383_s1 + $0x120] sm:$0xff]  ;;  %v2739_v29 = vld [vmem:[%s3383_s1 + $0x98] sm:$0xff]  ;;  %v2721_v30 = vld [vmem:[%s2992_s8 + $0x50] sm:$0xff] }
  0x16   : > { %2854 = vmatpush.bf16.msra.mxu2 %v2733_v2  ;;  %2855 = vmatpush.bf16.msra.mxu3 %v2733_v2  ;;  %v2756_v27 = vld [vmem:[%s3383_s1 + $0xe0] sm:$0xff]  ;;  %v2725_v32 = vld [vmem:[%s2992_s8 + $0x70] sm:$0xff]  ;;  %v2771_v34 = vld [vmem:[%s3383_s1 + $0x118] sm:$0xff] }
  0x17   : > { %v2723_v31 = vld [vmem:[%s2992_s8 + $0x60] sm:$0xff]  ;;  %v2755_v35 = vld [vmem:[%s3383_s1 + $0xd8] sm:$0xff]  ;;  %v2714_v36 = vld [vmem:[%s3383_s1 + $0x10] sm:$0xff] }
  0x18   : > { %v2727_v33 = vld [vmem:[%s2992_s8 + $0x80] sm:$0xff]  ;;  %v2738_v37 = vld [vmem:[%s3383_s1 + $0x90] sm:$0xff]  ;;  %v2713_v40 = vld [vmem:[%s3383_s1 + $0x8] sm:$0xff] }
  0x19   : > { %424 = vmatpush.bf16.msra.mxu0 %v2732_v3  ;;  %2856 = vmatpush.bf16.msra.mxu1 %v2732_v3  ;;  %v2770_v38 = vld [vmem:[%s3383_s1 + $0x110] sm:$0xff]  ;;  %v2737_v41 = vld [vmem:[%s3383_s1 + $0x88] sm:$0xff]  ;;  %v2712_v44 = vld [vmem:[%s3383_s1] sm:$0xff] }
  0x1a   : > { %2857 = vmatpush.bf16.msra.mxu2 %v2732_v3  ;;  %2858 = vmatpush.bf16.msra.mxu3 %v2732_v3  ;;  %v2754_v39 = vld [vmem:[%s3383_s1 + $0xd0] sm:$0xff]  ;;  %v2769_v42 = vld [vmem:[%s3383_s1 + $0x108] sm:$0xff]  ;;  %v2736_v45 = vld [vmem:[%s3383_s1 + $0x80] sm:$0xff] }
  0x1b   : > { %v2753_v43 = vld [vmem:[%s3383_s1 + $0xc8] sm:$0xff]  ;;  %v2783_v46 = vld [vmem:[%s3383_s1 + $0x178] sm:$0xff]  ;;  %v2768_v48 = vld [vmem:[%s3383_s1 + $0x100] sm:$0xff] }
  0x1c   : > { %v2799_v47 = vld [vmem:[%s3383_s1 + $0x1b8] sm:$0xff]  ;;  %v2752_v49 = vld [vmem:[%s3383_s1 + $0xc0] sm:$0xff]  ;;  %v2798_v53 = vld [vmem:[%s3383_s1 + $0x1b0] sm:$0xff] }
  0x1d   : > { %425 = vmatpush.bf16.msra.mxu0 %v2731_v4  ;;  %2859 = vmatpush.bf16.msra.mxu1 %v2731_v4  ;;  %v2823_v50 = vld [vmem:[%s3383_s1 + $0x238] sm:$0xff]  ;;  %v2704_v52 = vld [vmem:[%s2992_s8] sm:$0xff]  ;;  %v3116_v55 = vld [vmem:[%s2992_s8 + $0x90] sm:$0xff] }
  0x1e   : > { %2860 = vmatpush.bf16.msra.mxu2 %v2731_v4  ;;  %2861 = vmatpush.bf16.msra.mxu3 %v2731_v4  ;;  %v2815_v51 = vld [vmem:[%s3383_s1 + $0x1f8] sm:$0xff]  ;;  %v2782_v56 = vld [vmem:[%s3383_s1 + $0x170] sm:$0xff]  ;;  %v2781_v59 = vld [vmem:[%s3383_s1 + $0x168] sm:$0xff] }
  0x1f   : > { %v2760_v54 = vld [vmem:[%s2992_s8 + $0xd8] sm:$0xff]  ;;  %v2822_v57 = vld [vmem:[%s3383_s1 + $0x230] sm:$0xff]  ;;  %v2797_v60 = vld [vmem:[%s3383_s1 + $0x1a8] sm:$0xff] }
  0x20   : > { %v2814_v58 = vld [vmem:[%s3383_s1 + $0x1f0] sm:$0xff]  ;;  %v2821_v61 = vld [vmem:[%s3383_s1 + $0x228] sm:$0xff]  ;;  %v2761_v0 = vld [vmem:[%s2992_s8 + $0xe0] sm:$0xff] }
  0x21   : > { %426 = vmatpush.bf16.msra.mxu0 %v2730_v5  ;;  %2862 = vmatpush.bf16.msra.mxu1 %v2730_v5  ;;  %v2813_v62 = vld [vmem:[%s3383_s1 + $0x1e8] sm:$0xff]  ;;  %v3143_v1 = vld [vmem:[%s2992_s8 + $0x98] sm:$0xff]  ;;  %v2780_v2 = vld [vmem:[%s3383_s1 + $0x160] sm:$0xff] }
  0x22   : > { %2863 = vmatpush.bf16.msra.mxu2 %v2730_v5  ;;  %2864 = vmatpush.bf16.msra.mxu3 %v2730_v5  ;;  %v2705_v63 = vld [vmem:[%s2992_s8 + $0x8] sm:$0xff]  ;;  %v2820_v3 = vld [vmem:[%s3383_s1 + $0x220] sm:$0xff] }
  0x23   : > { %v2796_v4 = vld [vmem:[%s3383_s1 + $0x1a0] sm:$0xff] }
  0x24   : > { %v2812_v5 = vld [vmem:[%s3383_s1 + $0x1e0] sm:$0xff] }
  0x25   : > { %427 = vmatpush.bf16.msra.mxu0 %v2729_v6  ;;  %2865 = vmatpush.bf16.msra.mxu1 %v2729_v6 }
  0x26   : > { %2866 = vmatpush.bf16.msra.mxu2 %v2729_v6  ;;  %2867 = vmatpush.bf16.msra.mxu3 %v2729_v6  ;;  %v2706_v6 = vld [vmem:[%s2992_s8 + $0x10] sm:$0xff] }
  0x29   : > { %428 = vmatpush.bf16.msra.mxu0 %v2728_v7  ;;  %2868 = vmatpush.bf16.msra.mxu1 %v2728_v7 }
  0x2a   : > { %2869 = vmatpush.bf16.msra.mxu2 %v2728_v7  ;;  %2870 = vmatpush.bf16.msra.mxu3 %v2728_v7  ;;  %v2762_v7 = vld [vmem:[%s2992_s8 + $0xe8] sm:$0xff] }
  0x2c   : > { %429 = vmatmul.bf16.vlgmr.msra.gmra.mxu0 %v2720_v10  ;;  %437 = vmatmul.bf16.vlgmr.msra.gmra.mxu1 %v2722_v11  ;;  %v2819_v10 = vld [vmem:[%s3383_s1 + $0x218] sm:$0xff] }
  0x2d   : > { %558 = vmatpush.bf16.msrb.mxu1 %v2719_v8  ;;  %445 = vmatmul.bf16.vlgmr.msra.gmra.mxu2 %v2724_v12  ;;  %v3161_v8 = vld [vmem:[%s2992_s8 + $0xa0] sm:$0xff]  ;;  %v2795_v11 = vld [vmem:[%s3383_s1 + $0x198] sm:$0xff] }
  0x2e   : > { %664 = vmatpush.bf16.msrb.mxu2 %v2743_v9  ;;  %453 = vmatmul.bf16.vlgmr.msra.gmra.mxu3 %v2726_v13  ;;  %v2779_v9 = vld [vmem:[%s3383_s1 + $0x158] sm:$0xff] }
  0x2f   : > { %1061 = vmatpush.bf16.msrb.mxu0 %v2775_v14  ;;  %880 = vmatpush.bf16.msrb.mxu3 %v2759_v15  ;;  %v2811_v12 = vld [vmem:[%s3383_s1 + $0x1d8] sm:$0xff]  ;;  %v2763_v14 = vld [vmem:[%s2992_s8 + $0xf0] sm:$0xff]  ;;  %v3179_v15 = vld [vmem:[%s2992_s8 + $0xa8] sm:$0xff] }
  0x30   : > { %v2707_v13 = vld [vmem:[%s2992_s8 + $0x18] sm:$0xff] }
  0x31   : > { %559 = vmatpush.bf16.msrb.mxu1 %v2718_v16  ;;  %v2778_v16 = vld [vmem:[%s3383_s1 + $0x150] sm:$0xff] }
  0x32   : > { %665 = vmatpush.bf16.msrb.mxu2 %v2742_v17  ;;  %v2818_v17 = vld [vmem:[%s3383_s1 + $0x210] sm:$0xff] }
  0x33   : > { %1062 = vmatpush.bf16.msrb.mxu0 %v2774_v18  ;;  %881 = vmatpush.bf16.msrb.mxu3 %v2758_v19  ;;  %v2794_v18 = vld [vmem:[%s3383_s1 + $0x190] sm:$0xff] }
  0x34   : > { %v2810_v19 = vld [vmem:[%s3383_s1 + $0x1d0] sm:$0xff] }
  0x35   : > { %560 = vmatpush.bf16.msrb.mxu1 %v2717_v20  ;;  %v2708_v20 = vld [vmem:[%s2992_s8 + $0x20] sm:$0xff] }
  0x36   : > { %666 = vmatpush.bf16.msrb.mxu2 %v2741_v21  ;;  %v2764_v21 = vld [vmem:[%s2992_s8 + $0xf8] sm:$0xff] }
  0x37   : > { %1063 = vmatpush.bf16.msrb.mxu0 %v2773_v22  ;;  %882 = vmatpush.bf16.msrb.mxu3 %v2757_v23  ;;  %v3197_v22 = vld [vmem:[%s2992_s8 + $0xb0] sm:$0xff]  ;;  %v2777_v23 = vld [vmem:[%s3383_s1 + $0x148] sm:$0xff] }
  0x39   : > { %561 = vmatpush.bf16.msrb.mxu1 %v2716_v24  ;;  %v2817_v24 = vld [vmem:[%s3383_s1 + $0x208] sm:$0xff] }
  0x3a   : > { %667 = vmatpush.bf16.msrb.mxu2 %v2740_v25  ;;  %v2793_v25 = vld [vmem:[%s3383_s1 + $0x188] sm:$0xff] }
  0x3b   : > { %1064 = vmatpush.bf16.msrb.mxu0 %v2772_v26  ;;  %883 = vmatpush.bf16.msrb.mxu3 %v2756_v27  ;;  %v2809_v26 = vld [vmem:[%s3383_s1 + $0x1c8] sm:$0xff] }
  0x3c   : > { %433 = vmatmul.bf16.gmra.mxu0 %v2721_v30  ;;  %441 = vmatmul.bf16.gmra.mxu1 %v2723_v31  ;;  %v2709_v27 = vld [vmem:[%s2992_s8 + $0x28] sm:$0xff]  ;;  %v2776_v30 = vld [vmem:[%s3383_s1 + $0x140] sm:$0xff] }
  0x3d   : > { %562 = vmatpush.bf16.msrb.mxu1 %v2715_v28  ;;  %449 = vmatmul.bf16.gmra.mxu2 %v2725_v32  ;;  %v2765_v28 = vld [vmem:[%s2992_s8 + $0x100] sm:$0xff] }
  0x3e   : > { %668 = vmatpush.bf16.msrb.mxu2 %v2739_v29  ;;  %457 = vmatmul.bf16.gmra.mxu3 %v2727_v33  ;;  %v3215_v29 = vld [vmem:[%s2992_s8 + $0xb8] sm:$0xff]  ;;  %v2816_v31 = vld [vmem:[%s3383_s1 + $0x200] sm:$0xff] }
  0x3f   : > { %1065 = vmatpush.bf16.msrb.mxu0 %v2771_v34  ;;  %884 = vmatpush.bf16.msrb.mxu3 %v2755_v35  ;;  %v2792_v32 = vld [vmem:[%s3383_s1 + $0x180] sm:$0xff]  ;;  %v2710_v34 = vld [vmem:[%s2992_s8 + $0x30] sm:$0xff] }
  0x40   : > { %v2808_v33 = vld [vmem:[%s3383_s1 + $0x1c0] sm:$0xff] }
  0x41   : > { %563 = vmatpush.bf16.msrb.mxu1 %v2714_v36 }
  0x42   : > { %669 = vmatpush.bf16.msrb.mxu2 %v2738_v37  ;;  %v2766_v37 = vld [vmem:[%s2992_s8 + $0x108] sm:$0xff] }
  0x43   : > { %1066 = vmatpush.bf16.msrb.mxu0 %v2770_v38  ;;  %885 = vmatpush.bf16.msrb.mxu3 %v2754_v39  ;;  %v3235_v38 = vld [vmem:[%s2992_s8 + $0xc0] sm:$0xff] }
  0x45   : > { %564 = vmatpush.bf16.msrb.mxu1 %v2713_v40 }
  0x46   : > { %670 = vmatpush.bf16.msrb.mxu2 %v2737_v41 }
  0x47   : > { %1067 = vmatpush.bf16.msrb.mxu0 %v2769_v42  ;;  %886 = vmatpush.bf16.msrb.mxu3 %v2753_v43 }
  0x49   : > { %565 = vmatpush.bf16.msrb.mxu1 %v2712_v44 }
  0x4a   : > { %671 = vmatpush.bf16.msrb.mxu2 %v2736_v45  ;;  %v2711_v45 = vld [vmem:[%s2992_s8 + $0x38] sm:$0xff] }
  0x4b   : > { %1068 = vmatpush.bf16.msrb.mxu0 %v2768_v48  ;;  %887 = vmatpush.bf16.msrb.mxu3 %v2752_v49  ;;  %v2767_v48 = vld [vmem:[%s2992_s8 + $0x110] sm:$0xff]  ;;  %v3247_v49 = vld [vmem:[%s2992_s8 + $0xc8] sm:$0xff] }
  0x4c   : > { %566 = vmatmul.bf16.vlgmr.msrb.gmra.mxu1 %v2704_v52 }
  0x4d   : > { %1175 = vmatpush.bf16.msra.mxu1 %v2783_v46  ;;  %672 = vmatmul.bf16.vlgmr.msrb.gmra.mxu2 %v2704_v52 }
  0x4e   : > { %1389 = vmatpush.bf16.msra.mxu2 %v2799_v47  ;;  %1069 = vmatmul.bf16.vlgmr.msrb.gmra.mxu0 %v2760_v54 }
  0x4f   : > { %1684 = vmatpush.bf16.msra.mxu0 %v2823_v50  ;;  %1570 = vmatpush.bf16.msra.mxu3 %v2815_v51 }
  0x50   : > { %888 = vmatmul.bf16.vlgmr.msrb.gmra.mxu3 %v3116_v55 }
  0x51   : > { %1176 = vmatpush.bf16.msra.mxu1 %v2782_v56 }
  0x52   : > { %1390 = vmatpush.bf16.msra.mxu2 %v2798_v53 }
  0x53   : > { %1685 = vmatpush.bf16.msra.mxu0 %v2822_v57  ;;  %1571 = vmatpush.bf16.msra.mxu3 %v2814_v58  ;;  %v2784_v58 = vld [vmem:[%s2992_s8 + $0x8] sm:$0xff] }
  0x55   : > { %1177 = vmatpush.bf16.msra.mxu1 %v2781_v59 }
  0x56   : > { %1391 = vmatpush.bf16.msra.mxu2 %v2797_v60 }
  0x57   : > { %1686 = vmatpush.bf16.msra.mxu0 %v2821_v61  ;;  %1572 = vmatpush.bf16.msra.mxu3 %v2813_v62  ;;  %v2800_v61 = vld [vmem:[%s2992_s8 + $0x50] sm:$0xff] }
  0x59   : > { %1178 = vmatpush.bf16.msra.mxu1 %v2780_v2 }
  0x5a   : > { %1392 = vmatpush.bf16.msra.mxu2 %v2796_v4 }
  0x5b   : > { %1687 = vmatpush.bf16.msra.mxu0 %v2820_v3  ;;  %1573 = vmatpush.bf16.msra.mxu3 %v2812_v5 }
  0x5c   : > { %570 = vmatmul.bf16.gmra.mxu1 %v2705_v63 }
  0x5d   : > { %677 = vmatmul.bf16.gmra.mxu2 %v2705_v63  ;;  %1179 = vmatpush.bf16.msra.mxu1 %v2779_v9  ;;  %v729_v63 = vlaneseq }
  0x5e   : > { %1073 = vmatmul.bf16.gmra.mxu0 %v2761_v0  ;;  %1393 = vmatpush.bf16.msra.mxu2 %v2795_v11 }
  0x5f   : > { %1688 = vmatpush.bf16.msra.mxu0 %v2819_v10  ;;  %1574 = vmatpush.bf16.msra.mxu3 %v2811_v12  ;;  %v3257_v4 = vshrl.u32 %v729_v63, 7 }
  0x60   : > { %892 = vmatmul.bf16.gmra.mxu3 %v3143_v1 }
  0x61   : > { %1180 = vmatpush.bf16.msra.mxu1 %v2778_v16  ;;  %vm731_vm0 = vcmp.lt.s32.totalorder %v3257_v4, 7 }
  0x62   : > { %1394 = vmatpush.bf16.msra.mxu2 %v2794_v18 }
  0x63   : > { %1689 = vmatpush.bf16.msra.mxu0 %v2818_v17  ;;  %1575 = vmatpush.bf16.msra.mxu3 %v2810_v19 }
  0x65   : > { %1181 = vmatpush.bf16.msra.mxu1 %v2777_v23 }
  0x66   : > { %1395 = vmatpush.bf16.msra.mxu2 %v2793_v25 }
  0x67   : > { %1690 = vmatpush.bf16.msra.mxu0 %v2817_v24  ;;  %1576 = vmatpush.bf16.msra.mxu3 %v2809_v26 }
  0x69   : > { %1182 = vmatpush.bf16.msra.mxu1 %v2776_v30  ;;  %v2786_v30 = vld [vmem:[%s2992_s8 + $0x18] sm:$0xff] }
  0x6a   : > { %1396 = vmatpush.bf16.msra.mxu2 %v2792_v32  ;;  %v2802_v32 = vld [vmem:[%s2992_s8 + $0x60] sm:$0xff] }
  0x6b   : > { %1691 = vmatpush.bf16.msra.mxu0 %v2816_v31  ;;  %1577 = vmatpush.bf16.msra.mxu3 %v2808_v33 }
  0x6c   : > { %574 = vmatmul.bf16.gmra.mxu1 %v2706_v6 }
  0x6d   : > { %682 = vmatmul.bf16.gmra.mxu2 %v2706_v6 }
  0x6e   : > { %1077 = vmatmul.bf16.gmra.mxu0 %v2762_v7 }
  0x70   : > { %896 = vmatmul.bf16.gmra.mxu3 %v3161_v8 }
  0x7c   : > { %578 = vmatmul.bf16.gmra.mxu1 %v2707_v13 }
  0x7d   : > { %687 = vmatmul.bf16.gmra.mxu2 %v2707_v13  ;;  %v2801_v13 = vld [vmem:[%s2992_s8 + $0x58] sm:$0xff] }
  0x7e   : > { %1081 = vmatmul.bf16.gmra.mxu0 %v2763_v14 }
  0x80   : > { %900 = vmatmul.bf16.gmra.mxu3 %v3179_v15 }
  0x8c   : > { %582 = vmatmul.bf16.gmra.mxu1 %v2708_v20 }
  0x8d   : > { %692 = vmatmul.bf16.gmra.mxu2 %v2708_v20 }
  0x8e   : > { %1085 = vmatmul.bf16.gmra.mxu0 %v2764_v21 }
  0x90   : > { %904 = vmatmul.bf16.gmra.mxu3 %v3197_v22 }
  0x9c   : > { %586 = vmatmul.bf16.gmra.mxu1 %v2709_v27 }
  0x9d   : > { %697 = vmatmul.bf16.gmra.mxu2 %v2709_v27 }
  0x9e   : > { %1089 = vmatmul.bf16.gmra.mxu0 %v2765_v28 }
  0xa0   : > { %908 = vmatmul.bf16.gmra.mxu3 %v3215_v29 }
  0xa9   : > { %v430_v35 = vpop.f32.mrf.mxu0  ;;  %v3231_v36 = vpop.f32.mrf.mxu1 }
  0xac   : > { %590 = vmatmul.bf16.gmra.mxu1 %v2710_v34 }
  0xad   : > { %702 = vmatmul.bf16.gmra.mxu2 %v2710_v34 }
  0xae   : > { %1093 = vmatmul.bf16.gmra.mxu0 %v2766_v37 }
  0xb0   : > { %912 = vmatmul.bf16.gmra.mxu3 %v3235_v38  ;;  %v3238_v39 = vpop.f32.mrf.mxu2 }
  0xb1   : > { %v3240_v40 = vpop.f32.mrf.mxu3  ;;  %v432_v41 = vpop.f32.mrf.mxu0 }
  0xb2   : > { %v440_v42 = vpop.f32.mrf.mxu1 }
  0xb8   : > { %v448_v43 = vpop.f32.mrf.mxu2 }
  0xb9   : > { %v456_v44 = vpop.f32.mrf.mxu3  ;;  %v434_v46 = vpop.f32.mrf.mxu0 }
  0xba   : > { %v3243_v47 = vpop.f32.mrf.mxu1 }
  0xbc   : > { %594 = vmatmul.bf16.gmra.mxu1 %v2711_v45 }
  0xbd   : > { %707 = vmatmul.bf16.gmra.mxu2 %v2711_v45 }
  0xbe   : > { %1097 = vmatmul.bf16.gmra.mxu0 %v2767_v48 }
  0xc0   : > { %916 = vmatmul.bf16.gmra.mxu3 %v3247_v49  ;;  %v3250_v50 = vpop.f32.mrf.mxu2 }
  0xc1   : > { %v3252_v51 = vpop.f32.mrf.mxu3  ;;  %v436_v52 = vpop.f32.mrf.mxu0 }
  0xc2   : > { %v444_v53 = vpop.f32.mrf.mxu1 }
  0xc3   : > { %v2787_v53 = vld [vmem:[%s2992_s8 + $0x20] sm:$0xff] }
  0xc8   : > { %v452_v54 = vpop.f32.mrf.mxu2 }
  0xc9   : > { %v460_v56 = vpop.f32.mrf.mxu3 }
  0xca   : > { %v567_v57 = vpop.f32.mrf.mxu1  ;;  %v2803_v56 = vld [vmem:[%s2992_s8 + $0x68] sm:$0xff] }
  0xcb   : > { %v568_v59 = vadd.f32 %v567_v57, %v430_v35  ;;  %v1070_v60 = vpop.f32.mrf.mxu0 }
  0xcc   : > { %1183 = vmatmul.bf16.vlgmr.msra.gmra.mxu1 %v3116_v55  ;;  %v2785_v55 = vld [vmem:[%s2992_s8 + $0x10] sm:$0xff] }
  0xcd   : > { %1397 = vmatmul.bf16.vlgmr.msra.gmra.mxu2 %v2784_v58 }
  0xce   : > { %1692 = vmatmul.bf16.vlgmr.msra.gmra.mxu0 %v2784_v58 }
  0xd0   : > { %1578 = vmatmul.bf16.vlgmr.msra.gmra.mxu3 %v2800_v61  ;;  %v673_v62 = vpop.f32.mrf.mxu2 }
  0xd1   : > { %v713_v5 = vrot.slane %v673_v62, 1 }
  0xd2   : > { %v569_v2 = vpop.f32.mrf.mxu1 }
  0xd3   : > { %v889_v0 = vpop.f32.mrf.mxu3  ;;  %v1072_v3 = vpop.f32.mrf.mxu0 }
  0xd8   : > { %v675_v6 = vpop.f32.mrf.mxu2 }
  0xd9   : > { %v714_v7 = vrot.slane %v675_v6, 1 }
  0xda   : > { %v571_v10 = vpop.f32.mrf.mxu1 }
  0xdb   : > { %v891_v9 = vpop.f32.mrf.mxu3  ;;  %v572_v11 = vadd.f32 %v571_v10, %v434_v46  ;;  %v1074_v12 = vpop.f32.mrf.mxu0  ;;  %v739_v14 = vsel %vm731_vm0, %v713_v5, %v714_v7  ;;  %v2788_v7 = vld [vmem:[%s2992_s8 + $0x28] sm:$0xff]  ;;  %v2804_v10 = vld [vmem:[%s2992_s8 + $0x70] sm:$0xff] }
  0xdc   : > { %v740_v16 = vadd.f32 %v739_v14, %v568_v59  ;;  %1188 = vmatmul.bf16.gmra.mxu1 %v3143_v1 }
  0xdd   : > { %1401 = vmatmul.bf16.gmra.mxu2 %v2785_v55 }
  0xde   : > { %1697 = vmatmul.bf16.gmra.mxu0 %v2785_v55  ;;  %v921_v17 = vadd.f32 %v889_v0, %v740_v16 }
  0xe0   : > { %1582 = vmatmul.bf16.gmra.mxu3 %v2801_v13  ;;  %v678_v18 = vpop.f32.mrf.mxu2  ;;  %v3265_v19 = vadd.f32 %v1070_v60, %v921_v17 }
  0xe1   : > { %v715_v24 = vrot.slane %v678_v18, 1 }
  0xe2   : > { %v573_v21 = vpop.f32.mrf.mxu1 }
  0xe3   : > { %v893_v20 = vpop.f32.mrf.mxu3  ;;  %v1076_v23 = vpop.f32.mrf.mxu0 }
  0xe8   : > { %v680_v25 = vpop.f32.mrf.mxu2 }
  0xe9   : > { %v716_v26 = vrot.slane %v680_v25, 1  ;;  %v2789_v25 = vld [vmem:[%s2992_s8 + $0x30] sm:$0xff] }
  0xea   : > { %v575_v28 = vpop.f32.mrf.mxu1 }
  0xeb   : > { %v895_v27 = vpop.f32.mrf.mxu3  ;;  %v576_v31 = vadd.f32 %v575_v28, %v3231_v36  ;;  %v1078_v1 = vpop.f32.mrf.mxu0  ;;  %v738_v33 = vsel %vm731_vm0, %v715_v24, %v716_v26 }
  0xec   : > { %v741_v34 = vadd.f32 %v738_v33, %v572_v11  ;;  %1193 = vmatmul.bf16.gmra.mxu1 %v3161_v8  ;;  %v2805_v27 = vld [vmem:[%s2992_s8 + $0x78] sm:$0xff] }
  0xed   : > { %1405 = vmatmul.bf16.gmra.mxu2 %v2786_v30 }
  0xee   : > { %1702 = vmatmul.bf16.gmra.mxu0 %v2786_v30  ;;  %v922_v35 = vadd.f32 %v893_v20, %v741_v34 }
  0xf0   : > { %1586 = vmatmul.bf16.gmra.mxu3 %v2802_v32  ;;  %v683_v37 = vpop.f32.mrf.mxu2  ;;  %v3273_v41 = vadd.f32 %v1074_v12, %v922_v35 }
  0xf1   : > { %v717_v44 = vrot.slane %v683_v37, 1 }
  0xf2   : > { %v577_v43 = vpop.f32.mrf.mxu1 }
  0xf3   : > { %v897_v42 = vpop.f32.mrf.mxu3  ;;  %v1080_v36 = vpop.f32.mrf.mxu0 }
  0xf8   : > { %v685_v45 = vpop.f32.mrf.mxu2 }
  0xf9   : > { %v718_v46 = vrot.slane %v685_v45, 1 }
  0xfa   : > { %v579_v52 = vpop.f32.mrf.mxu1 }
  0xfb   : > { %v899_v48 = vpop.f32.mrf.mxu3  ;;  %v580_v54 = vadd.f32 %v579_v52, %v3243_v47  ;;  %v1082_v8 = vpop.f32.mrf.mxu0  ;;  %v737_v57 = vsel %vm731_vm0, %v717_v44, %v718_v46  ;;  %v2790_v44 = vld [vmem:[%s2992_s8 + $0x38] sm:$0xff]  ;;  %v2806_v46 = vld [vmem:[%s2992_s8 + $0x80] sm:$0xff] }
  0xfc   : > { %v742_v58 = vadd.f32 %v737_v57, %v576_v31  ;;  %1198 = vmatmul.bf16.gmra.mxu1 %v3179_v15 }
  0xfd   : > { %1409 = vmatmul.bf16.gmra.mxu2 %v2787_v53 }
  0xfe   : > { %1707 = vmatmul.bf16.gmra.mxu0 %v2787_v53  ;;  %v923_v59 = vadd.f32 %v897_v42, %v742_v58 }
 0x100   : > { %1590 = vmatmul.bf16.gmra.mxu3 %v2803_v56  ;;  %v688_v60 = vpop.f32.mrf.mxu2  ;;  %v3281_v61 = vadd.f32 %v1078_v1, %v923_v59 }
 0x101   : > { %v719_v0 = vrot.slane %v688_v60, 1 }
 0x102   : > { %v581_v63 = vpop.f32.mrf.mxu1 }
 0x103   : > { %v901_v62 = vpop.f32.mrf.mxu3  ;;  %v1084_v47 = vpop.f32.mrf.mxu0 }
 0x104   : > { %v2791_v47 = vld [vmem:[%s2992_s8 + $0x40] sm:$0xff] }
 0x108   : > { %v690_v2 = vpop.f32.mrf.mxu2 }
 0x109   : > { %v720_v3 = vrot.slane %v690_v2, 1  ;;  %v2807_v2 = vld [vmem:[%s2992_s8 + $0x88] sm:$0xff]  ;;  %s2703_s8 = sshll.u32 %s3391_s12, 5 }
 0x10a   : > { %v583_v6 = vpop.f32.mrf.mxu1  ;;  %s3333_s6 = scalar_lea.vmem %s3384_s2, %s2703_s8 }
 0x10b   : > { %v903_v5 = vpop.f32.mrf.mxu3  ;;  %v1086_v9 = vpop.f32.mrf.mxu0  ;;  %v736_v15 = vsel %vm731_vm0, %v719_v0, %v720_v3  ;;  %v584_v26 = vadd.f32 %v583_v6, %v3238_v39 }
 0x10c   : > { %v743_v55 = vadd.f32 %v736_v15, %v580_v54  ;;  %1203 = vmatmul.bf16.gmra.mxu1 %v3197_v22 }
 0x10d   : > { %1413 = vmatmul.bf16.gmra.mxu2 %v2788_v7 }
 0x10e   : > { %1712 = vmatmul.bf16.gmra.mxu0 %v2788_v7  ;;  %v924_v11 = vadd.f32 %v901_v62, %v743_v55 }
 0x110   : > { %1594 = vmatmul.bf16.gmra.mxu3 %v2804_v10  ;;  %v693_v12 = vpop.f32.mrf.mxu2  ;;  %v3288_v13 = vadd.f32 %v1082_v8, %v924_v11 }
 0x111   : > { %v721_v18 = vrot.slane %v693_v12, 1 }
 0x112   : > { %v585_v16 = vpop.f32.mrf.mxu1 }
 0x113   : > { %v905_v14 = vpop.f32.mrf.mxu3  ;;  %v1088_v17 = vpop.f32.mrf.mxu0 }
 0x118   : > { %v695_v20 = vpop.f32.mrf.mxu2 }
 0x119   : > { %v722_v21 = vrot.slane %v695_v20, 1 }
 0x11a   : > { %v587_v24 = vpop.f32.mrf.mxu1 }
 0x11b   : > { %v907_v23 = vpop.f32.mrf.mxu3  ;;  %v1090_v22 = vpop.f32.mrf.mxu0  ;;  %v735_v28 = vsel %vm731_vm0, %v721_v18, %v722_v21  ;;  %v588_v45 = vadd.f32 %v587_v24, %v3250_v50 }
 0x11c   : > { %v744_v30 = vadd.f32 %v735_v28, %v584_v26  ;;  %1208 = vmatmul.bf16.gmra.mxu1 %v3215_v29 }
 0x11d   : > { %1417 = vmatmul.bf16.gmra.mxu2 %v2789_v25 }
 0x11e   : > { %1717 = vmatmul.bf16.gmra.mxu0 %v2789_v25  ;;  %v925_v31 = vadd.f32 %v905_v14, %v744_v30 }
 0x120   : > { %1598 = vmatmul.bf16.gmra.mxu3 %v2805_v27  ;;  %v698_v1 = vpop.f32.mrf.mxu2  ;;  %v3296_v32 = vadd.f32 %v1086_v9, %v925_v31 }
 0x121   : > { %v723_v35 = vrot.slane %v698_v1, 1 }
 0x122   : > { %v589_v34 = vpop.f32.mrf.mxu1 }
 0x123   : > { %v909_v33 = vpop.f32.mrf.mxu3  ;;  %v1092_v39 = vpop.f32.mrf.mxu0 }
 0x128   : > { %v700_v37 = vpop.f32.mrf.mxu2 }
 0x129   : > { %v724_v42 = vrot.slane %v700_v37, 1 }
 0x12a   : > { %v591_v36 = vpop.f32.mrf.mxu1 }
 0x12b   : > { %v911_v43 = vpop.f32.mrf.mxu3  ;;  %v1094_v29 = vpop.f32.mrf.mxu0  ;;  %v734_v48 = vsel %vm731_vm0, %v723_v35, %v724_v42  ;;  %v592_v0 = vadd.f32 %v591_v36, %v3240_v40 }
 0x12c   : > { %v745_v52 = vadd.f32 %v734_v48, %v588_v45  ;;  %1213 = vmatmul.bf16.gmra.mxu1 %v3235_v38 }
 0x12d   : > { %1421 = vmatmul.bf16.gmra.mxu2 %v2790_v44 }
 0x12e   : > { %1722 = vmatmul.bf16.gmra.mxu0 %v2790_v44  ;;  %v926_v53 = vadd.f32 %v909_v33, %v745_v52 }
 0x130   : > { %1602 = vmatmul.bf16.gmra.mxu3 %v2806_v46  ;;  %v703_v54 = vpop.f32.mrf.mxu2  ;;  %v3304_v8 = vadd.f32 %v1090_v22, %v926_v53 }
 0x131   : > { %v725_v58 = vrot.slane %v703_v54, 1 }
 0x132   : > { %v593_v57 = vpop.f32.mrf.mxu1 }
 0x133   : > { %v913_v56 = vpop.f32.mrf.mxu3  ;;  %v1096_v50 = vpop.f32.mrf.mxu0 }
 0x138   : > { %v705_v59 = vpop.f32.mrf.mxu2 }
 0x139   : > { %v726_v60 = vrot.slane %v705_v59, 1 }
 0x13a   : > { %v595_v63 = vpop.f32.mrf.mxu1 }
 0x13b   : > { %v915_v62 = vpop.f32.mrf.mxu3  ;;  %v1098_v38 = vpop.f32.mrf.mxu0  ;;  %v733_v3 = vsel %vm731_vm0, %v725_v58, %v726_v60  ;;  %v596_v17 = vadd.f32 %v595_v63, %v3252_v51 }
 0x13c   : > { %v746_v5 = vadd.f32 %v733_v3, %v592_v0  ;;  %1218 = vmatmul.bf16.gmra.mxu1 %v3247_v49 }
 0x13d   : > { %1425 = vmatmul.bf16.gmra.mxu2 %v2791_v47 }
 0x13e   : > { %1727 = vmatmul.bf16.gmra.mxu0 %v2791_v47  ;;  %v927_v6 = vadd.f32 %v913_v56, %v746_v5 }
 0x140   : > { %1606 = vmatmul.bf16.gmra.mxu3 %v2807_v2  ;;  %v708_v7 = vpop.f32.mrf.mxu2  ;;  %v3312_v9 = vadd.f32 %v1094_v29, %v927_v6 }
 0x141   : > { %v727_v11 = vrot.slane %v708_v7, 1 }
 0x142   : > { %v597_v15 = vpop.f32.mrf.mxu1 }
 0x143   : > { %v917_v10 = vpop.f32.mrf.mxu3  ;;  %v1100_v55 = vpop.f32.mrf.mxu0 }
 0x148   : > { %v710_v40 = vpop.f32.mrf.mxu2 }
 0x149   : > { %v728_v12 = vrot.slane %v710_v40, 1 }
 0x14a   : > { %v1184_v16 = vpop.f32.mrf.mxu1 }
 0x14b   : > { %v919_v14 = vpop.f32.mrf.mxu3  ;;  %v1693_v18 = vpop.f32.mrf.mxu0  ;;  %v732_v49 = vsel %vm731_vm0, %v727_v11, %v728_v12  ;;  %v1224_v28 = vrot.slane %v1184_v16, 1 }
 0x14c   : > { %v747_v20 = vadd.f32 %v732_v49, %v596_v17  ;;  %v1733_v52 = vrot.slane %v1693_v18, 1 }
 0x14e   : > { %v928_v21 = vadd.f32 %v917_v10, %v747_v20 }
 0x150   : > { %v1398_v23 = vpop.f32.mrf.mxu2  ;;  %v3317_v24 = vadd.f32 %v1098_v38, %v928_v21 }
 0x152   : > { %v1186_v26 = vpop.f32.mrf.mxu1 }
 0x153   : > { %v1579_v25 = vpop.f32.mrf.mxu3  ;;  %v1695_v22 = vpop.f32.mrf.mxu0  ;;  %v1225_v27 = vrot.slane %v1186_v26, 1 }
 0x154   : > { %v1734_v45 = vrot.slane %v1695_v22, 1 }
 0x155   : > { %v1247_v51 = vsel %vm731_vm0, %v1224_v28, %v1225_v27 }
 0x156   : > { %v1248_v34 = vadd.f32 %v1247_v51, %v3265_v19  ;;  %v1756_v19 = vsel %vm731_vm0, %v1733_v52, %v1734_v45 }
 0x158   : > { %v1400_v30 = vpop.f32.mrf.mxu2  ;;  %v1430_v35 = vadd.f32 %v1398_v23, %v1248_v34 }
 0x15a   : > { %v1189_v1 = vpop.f32.mrf.mxu1  ;;  %v1611_v46 = vadd.f32 %v1579_v25, %v1430_v35 }
 0x15b   : > { %v1581_v31 = vpop.f32.mrf.mxu3  ;;  %v1698_v33 = vpop.f32.mrf.mxu0  ;;  %v1226_v43 = vrot.slane %v1189_v1, 1 }
 0x15c   : > { %v1735_v56 = vrot.slane %v1698_v33, 1  ;;  %v1757_v50 = vadd.f32 %v1756_v19, %v1611_v46 }
 0x160   : > { %v1402_v39 = vpop.f32.mrf.mxu2 }
 0x162   : > { %v1191_v42 = vpop.f32.mrf.mxu1 }
 0x163   : > { %v1583_v37 = vpop.f32.mrf.mxu3  ;;  %v1227_v36 = vrot.slane %v1191_v42, 1  ;;  %v1700_v44 = vpop.f32.mrf.mxu0 }
 0x164   : > { %v1736_v53 = vrot.slane %v1700_v44, 1 }
 0x165   : > { %v1246_v29 = vsel %vm731_vm0, %v1226_v43, %v1227_v36 }
 0x166   : > { %v1249_v48 = vadd.f32 %v1246_v29, %v3273_v41  ;;  %v1755_v62 = vsel %vm731_vm0, %v1735_v56, %v1736_v53  ;;  %v1794_v41 = vmul.f32 %v1757_v50, %v1757_v50 }
 0x168   : > { %v1431_v54 = vadd.f32 %v1402_v39, %v1249_v48  ;;  %v1404_v57 = vpop.f32.mrf.mxu2 }
 0x16a   : > { %v1612_v58 = vadd.f32 %v1583_v37, %v1431_v54  ;;  %v1194_v60 = vpop.f32.mrf.mxu1 }
 0x16b   : > { %v1585_v59 = vpop.f32.mrf.mxu3  ;;  %v1703_v63 = vpop.f32.mrf.mxu0  ;;  %v1228_v10 = vrot.slane %v1194_v60, 1 }
 0x16c   : > { %v1758_v47 = vadd.f32 %v1755_v62, %v1612_v58  ;;  %v1737_v16 = vrot.slane %v1703_v63, 1 }
 0x16e   : > { %v2827_v0 = vpack.c.bf16 %v1758_v47, %v1757_v50  ;;  %v1781_v38 = vadd.f32 %v1758_v47, %v1757_v50  ;;  %v1795_v2 = vmul.f32 %v1758_v47, %v1758_v47 }
 0x170   : > { %2828 = vst [vmem:[%s3333_s6] sm:$0xff] %v2827_v0   ;;  %v1802_v3 = vadd.f32 %v1795_v2, %v1794_v41  ;;  %v1406_v5 = vpop.f32.mrf.mxu2 }
 0x172   : > { %v1196_v7 = vpop.f32.mrf.mxu1 }
 0x173   : > { %v1587_v6 = vpop.f32.mrf.mxu3  ;;  %v1229_v15 = vrot.slane %v1196_v7, 1  ;;  %v1705_v55 = vpop.f32.mrf.mxu0 }
 0x174   : > { %v1738_v12 = vrot.slane %v1705_v55, 1 }
 0x175   : > { %v1245_v11 = vsel %vm731_vm0, %v1228_v10, %v1229_v15 }
 0x176   : > { %v1250_v40 = vadd.f32 %v1245_v11, %v3281_v61  ;;  %v1754_v21 = vsel %vm731_vm0, %v1737_v16, %v1738_v12 }
 0x178   : > { %v1432_v14 = vadd.f32 %v1406_v5, %v1250_v40  ;;  %v1408_v17 = vpop.f32.mrf.mxu2 }
 0x17a   : > { %v1613_v18 = vadd.f32 %v1587_v6, %v1432_v14  ;;  %v1199_v20 = vpop.f32.mrf.mxu1 }
 0x17b   : > { %v1589_v49 = vpop.f32.mrf.mxu3  ;;  %v1708_v23 = vpop.f32.mrf.mxu0  ;;  %v1230_v1 = vrot.slane %v1199_v20, 1 }
 0x17c   : > { %v1759_v25 = vadd.f32 %v1754_v21, %v1613_v18  ;;  %v1739_v37 = vrot.slane %v1708_v23, 1 }
 0x17e   : > { %v1782_v26 = vadd.f32 %v1781_v38, %v1759_v25  ;;  %v1796_v22 = vmul.f32 %v1759_v25, %v1759_v25 }
 0x180   : > { %v1803_v27 = vadd.f32 %v1802_v3, %v1796_v22  ;;  %v1410_v28 = vpop.f32.mrf.mxu2 }
 0x182   : > { %v1201_v31 = vpop.f32.mrf.mxu1 }
 0x183   : > { %v1591_v30 = vpop.f32.mrf.mxu3  ;;  %v1231_v61 = vrot.slane %v1201_v31, 1  ;;  %v1710_v51 = vpop.f32.mrf.mxu0 }
 0x184   : > { %v1740_v39 = vrot.slane %v1710_v51, 1 }
 0x185   : > { %v1244_v33 = vsel %vm731_vm0, %v1230_v1, %v1231_v61 }
 0x186   : > { %v1251_v34 = vadd.f32 %v1244_v33, %v3288_v13  ;;  %v1753_v45 = vsel %vm731_vm0, %v1739_v37, %v1740_v39 }
 0x188   : > { %v1433_v35 = vadd.f32 %v1410_v28, %v1251_v34  ;;  %v1412_v42 = vpop.f32.mrf.mxu2 }
 0x18a   : > { %v1614_v43 = vadd.f32 %v1591_v30, %v1433_v35  ;;  %v1204_v44 = vpop.f32.mrf.mxu1 }
 0x18b   : > { %v1593_v36 = vpop.f32.mrf.mxu3  ;;  %v1713_v29 = vpop.f32.mrf.mxu0  ;;  %v1232_v57 = vrot.slane %v1204_v44, 1 }
 0x18c   : > { %v1760_v46 = vadd.f32 %v1753_v45, %v1614_v43  ;;  %v1741_v47 = vrot.slane %v1713_v29, 1 }
 0x18e   : > { %v2832_v48 = vpack.c.bf16 %v1760_v46, %v1759_v25  ;;  %v1783_v52 = vadd.f32 %v1782_v26, %v1760_v46  ;;  %v1797_v53 = vmul.f32 %v1760_v46, %v1760_v46 }
 0x190   : > { %2844 = vst [vmem:[%s3333_s6 + $0x8] sm:$0xff] %v2832_v48   ;;  %v1804_v54 = vadd.f32 %v1803_v27, %v1797_v53  ;;  %v1414_v19 = vpop.f32.mrf.mxu2 }
 0x192   : > { %v1206_v13 = vpop.f32.mrf.mxu1 }
 0x193   : > { %v1595_v56 = vpop.f32.mrf.mxu3  ;;  %v1233_v50 = vrot.slane %v1206_v13, 1  ;;  %v1715_v58 = vpop.f32.mrf.mxu0 }
 0x194   : > { %v1742_v62 = vrot.slane %v1715_v58, 1 }
 0x195   : > { %v1243_v59 = vsel %vm731_vm0, %v1232_v57, %v1233_v50 }
 0x196   : > { %v1252_v60 = vadd.f32 %v1243_v59, %v3296_v32  ;;  %v1752_v3 = vsel %vm731_vm0, %v1741_v47, %v1742_v62 }
 0x198   : > { %v1434_v63 = vadd.f32 %v1414_v19, %v1252_v60  ;;  %v1416_v41 = vpop.f32.mrf.mxu2 }
 0x19a   : > { %v1615_v0 = vadd.f32 %v1595_v56, %v1434_v63  ;;  %v1209_v2 = vpop.f32.mrf.mxu1 }
 0x19b   : > { %v1597_v38 = vpop.f32.mrf.mxu3  ;;  %v1718_v5 = vpop.f32.mrf.mxu0  ;;  %v1234_v12 = vrot.slane %v1209_v2, 1 }
 0x19c   : > { %v1761_v6 = vadd.f32 %v1752_v3, %v1615_v0  ;;  %v1743_v20 = vrot.slane %v1718_v5, 1 }
 0x19e   : > { %v1784_v7 = vadd.f32 %v1783_v52, %v1761_v6  ;;  %v1798_v10 = vmul.f32 %v1761_v6, %v1761_v6 }
 0x1a0   : > { %v1805_v15 = vadd.f32 %v1804_v54, %v1798_v10  ;;  %v1418_v55 = vpop.f32.mrf.mxu2 }
 0x1a2   : > { %v1211_v40 = vpop.f32.mrf.mxu1 }
 0x1a3   : > { %v1599_v11 = vpop.f32.mrf.mxu3  ;;  %v1235_v32 = vrot.slane %v1211_v40, 1  ;;  %v1720_v14 = vpop.f32.mrf.mxu0 }
 0x1a4   : > { %v1744_v18 = vrot.slane %v1720_v14, 1 }
 0x1a5   : > { %v1242_v16 = vsel %vm731_vm0, %v1234_v12, %v1235_v32 }
 0x1a6   : > { %v1253_v17 = vadd.f32 %v1242_v16, %v3304_v8  ;;  %v1751_v22 = vsel %vm731_vm0, %v1743_v20, %v1744_v18 }
 0x1a8   : > { %v1435_v49 = vadd.f32 %v1418_v55, %v1253_v17  ;;  %v1420_v21 = vpop.f32.mrf.mxu2 }
 0x1aa   : > { %v1616_v23 = vadd.f32 %v1599_v11, %v1435_v49  ;;  %v1214_v26 = vpop.f32.mrf.mxu1 }
 0x1ab   : > { %v1601_v25 = vpop.f32.mrf.mxu3  ;;  %v1723_v27 = vpop.f32.mrf.mxu0  ;;  %v1236_v34 = vrot.slane %v1214_v26, 1 }
 0x1ac   : > { %v1762_v28 = vadd.f32 %v1751_v22, %v1616_v23  ;;  %v1745_v44 = vrot.slane %v1723_v27, 1 }
 0x1ae   : > { %v2837_v30 = vpack.c.bf16 %v1762_v28, %v1761_v6  ;;  %v1785_v31 = vadd.f32 %v1784_v7, %v1762_v28  ;;  %v1799_v1 = vmul.f32 %v1762_v28, %v1762_v28 }
 0x1b0   : > { %2845 = vst [vmem:[%s3333_s6 + $0x10] sm:$0xff] %v2837_v30   ;;  %v1806_v61 = vadd.f32 %v1805_v15, %v1799_v1  ;;  %v1422_v51 = vpop.f32.mrf.mxu2 }
 0x1b2   : > { %v1216_v8 = vpop.f32.mrf.mxu1 }
 0x1b3   : > { %v1603_v33 = vpop.f32.mrf.mxu3  ;;  %v1237_v39 = vrot.slane %v1216_v8, 1  ;;  %v1725_v35 = vpop.f32.mrf.mxu0 }
 0x1b4   : > { %v1746_v43 = vrot.slane %v1725_v35, 1 }
 0x1b5   : > { %v1241_v37 = vsel %vm731_vm0, %v1236_v34, %v1237_v39 }
 0x1b6   : > { %v1254_v42 = vadd.f32 %v1241_v37, %v3312_v9  ;;  %v1750_v52 = vsel %vm731_vm0, %v1745_v44, %v1746_v43 }
 0x1b8   : > { %v1436_v36 = vadd.f32 %v1422_v51, %v1254_v42  ;;  %v1424_v45 = vpop.f32.mrf.mxu2 }
 0x1ba   : > { %v1617_v29 = vadd.f32 %v1603_v33, %v1436_v36  ;;  %v1219_v48 = vpop.f32.mrf.mxu1 }
 0x1bb   : > { %v1605_v46 = vpop.f32.mrf.mxu3  ;;  %v1728_v53 = vpop.f32.mrf.mxu0  ;;  %v1238_v59 = vrot.slane %v1219_v48, 1 }
 0x1bc   : > { %v1763_v54 = vadd.f32 %v1750_v52, %v1617_v29  ;;  %v1747_v0 = vrot.slane %v1728_v53, 1 }
 0x1be   : > { %v1786_v19 = vadd.f32 %v1785_v31, %v1763_v54  ;;  %v1800_v56 = vmul.f32 %v1763_v54, %v1763_v54 }
 0x1c0   : > { %v1807_v13 = vadd.f32 %v1806_v61, %v1800_v56  ;;  %v1426_v57 = vpop.f32.mrf.mxu2 }
 0x1c2   : > { %v1221_v58 = vpop.f32.mrf.mxu1 }
 0x1c3   : > { %v1607_v50 = vpop.f32.mrf.mxu3  ;;  %v1239_v9 = vrot.slane %v1221_v58, 1  ;;  %v1730_v60 = vpop.f32.mrf.mxu0 }
 0x1c4   : > { %v1748_v47 = vrot.slane %v1730_v60, 1 }
 0x1c5   : > { %v1240_v62 = vsel %vm731_vm0, %v1238_v59, %v1239_v9 }
 0x1c6   : > { %v1255_v63 = vadd.f32 %v1240_v62, %v3317_v24  ;;  %v1749_v5 = vsel %vm731_vm0, %v1747_v0, %v1748_v47 }
 0x1c8   : > { %v1437_v41 = vadd.f32 %v1426_v57, %v1255_v63  ;;  %v1428_v38 = vpop.f32.mrf.mxu2 }
 0x1ca   : > { %v1618_v2 = vadd.f32 %v1607_v50, %v1437_v41 }
 0x1cb   : > { %v1609_v3 = vpop.f32.mrf.mxu3 }
 0x1cc   : > { %v1764_v6 = vadd.f32 %v1749_v5, %v1618_v2 }
 0x1ce   : > { %v2842_v7 = vpack.c.bf16 %v1764_v6, %v1763_v54  ;;  %v1787_v10 = vadd.f32 %v1786_v19, %v1764_v6  ;;  %v1801_v15 = vmul.f32 %v1764_v6, %v1764_v6 }
 0x1d0   : > { %2846 = vst [vmem:[%s3333_s6 + $0x18] sm:$0xff] %v2842_v7   ;;  %v1788_v55 = vrot.slane %v1787_v10, 4  ;;  %v1808_v11 = vadd.f32 %v1807_v13, %v1801_v15 }
 0x1d2   : > { %v1789_v40 = vadd.f32 %v1788_v55, %v1787_v10  ;;  %v1809_v12 = vrot.slane %v1808_v11, 4 }
 0x1d4   : > { %v1790_v24 = vrot.slane %v1789_v40, 2  ;;  %v1810_v32 = vadd.f32 %v1809_v12, %v1808_v11 }
 0x1d6   : > { %v1791_v14 = vadd.f32 %v1790_v24, %v1789_v40  ;;  %v1811_v16 = vrot.slane %v1810_v32, 2 }
 0x1d8   : > { %v1792_v17 = vrot.slane %v1791_v14, 1  ;;  %v1812_v18 = vadd.f32 %v1811_v16, %v1810_v32 }
 0x1da   : > { %v1813_v49 = vrot.slane %v1812_v18, 1  ;;  %v1793_v4 = vadd.f32 %v1792_v17, %v1791_v14 }
 0x1dc   : > { %v1814_v20 = vadd.f32 %v1813_v49, %v1812_v18 }
 0x1de   : > { %v1816_v21 = vsel %vm1815_vm1, %v1793_v4, %v1814_v20 }
 0x1df   : > { %v1818_v23 = vsel %vm1817_vm2, %v1816_v21, 0.0 }
 0x1e0   : > { %1819 = vst [vmem:[%s252_s11] sm:$0xff] %v1818_v23 }
 0x1e1 PF: > { %s14_s14 = sadd.s32 1, %s2918_s14   ;;  %s3386_s12 = smov %s2914_s13 }
 0x1e2   : > { %p11_p5 = scmp.ge.s32.totalorder %s14_s14, 4   ;;  %s3387_s13 = smov %s3389_s15 }
 0x1e4   :  { %13 = sbr.rel (!%p11_p5) target bundleno = 2 (0x2), region = 87 }

</bundles_post_ra>
